<compile_context>
chip_gen: v7x
topology: tpu7x:2x2x1
jax: 0.10.0
libtpu: 0.0.40
codegen_flags: <defaults>
</compile_context>

<pallas_src>
import numpy as np
import jax
import jax.numpy as jnp
from jax.experimental import pallas as pl
from jax.experimental.pallas import tpu as pltpu

SIZE = 16          # network input resolution (net_meta 'size')
NUM_CLASSES = 4
ATTR = NUM_CLASSES + 5          # 9
N_ANCH = 3

# Synthetic darknet cfg (same schema as parse_cfg output).
CFG = [
    {'type': 'net'},
    {'type': 'convolutional', 'filters': 16, 'size': 3, 'stride': 1, 'pad': 1,
     'batch_normalize': 1, 'activation': 'leaky'},                              # 0: (B,16,16,16)
    {'type': 'convolutional', 'filters': 32, 'size': 3, 'stride': 2, 'pad': 1,
     'batch_normalize': 1, 'activation': 'leaky'},                              # 1: (B,32,8,8)
    {'type': 'convolutional', 'filters': 32, 'size': 1, 'stride': 1, 'pad': 1,
     'batch_normalize': 1, 'activation': 'leaky'},                              # 2: (B,32,8,8)
    {'type': 'shortcut', 'from': -2, 'activation': 'linear'},                   # 3: (B,32,8,8)
    {'type': 'convolutional', 'filters': 27, 'size': 1, 'stride': 1, 'pad': 1,
     'activation': 'linear'},                                                   # 4: (B,27,8,8)
    {'type': 'yolo', 'mask': '3,4,5',
     'anchors': '10,14, 23,27, 37,58, 81,82, 135,169, 344,319', 'classes': 4},  # 5
    {'type': 'route', 'layers': '-3'},                                          # 6: (B,32,8,8)
    {'type': 'upsample', 'stride': 2},                                          # 7: (B,32,16,16)
    {'type': 'route', 'layers': '-1, -8'},                                      # 8: (B,48,16,16)
    {'type': 'convolutional', 'filters': 32, 'size': 3, 'stride': 1, 'pad': 1,
     'batch_normalize': 1, 'activation': 'leaky'},                              # 9: (B,32,16,16)
    {'type': 'convolutional', 'filters': 27, 'size': 1, 'stride': 1, 'pad': 1,
     'activation': 'linear'},                                                   # 10: (B,27,16,16)
    {'type': 'yolo', 'mask': '0,1,2',
     'anchors': '10,14, 23,27, 37,58, 81,82, 135,169, 344,319', 'classes': 4},  # 11
]


# ---------------- geometry constants (built once per batch size) --------------

def _geometry(batch):
    """Roll shifts + boundary masks, stride-2 / upsample 0-1 matmuls, YOLO tables."""
    H = W = SIZE
    HW = H * W                        # 256
    Hc = Wc = H // 2
    HWc = Hc * Wc                     # 64
    M = batch * HW

    m = np.arange(HW)
    i, j = m // W, m % W

    # 3x3 stride-1 pad-1 taps, d = di*3 + dj: dest (i, j) reads src (i+di-1, j+dj-1).
    # tap_d = roll(x, shift_d) * mask_d ; wrap-around (incl. across images in the
    # batched lane axis) only ever lands on positions the mask zeroes.
    shifts = []
    masks = np.zeros((9, HW), np.float32)
    for di in range(3):
        for dj in range(3):
            d = di * 3 + dj
            s = (di - 1) * W + (dj - 1)
            shifts.append((-s) % M)
            ok = ((i + di - 1 >= 0) & (i + di - 1 < H) &
                  (j + dj - 1 >= 0) & (j + dj - 1 < W))
            masks[d, ok] = 1.0
    masks = np.tile(masks, (1, batch))                       # (9, B*HW)

    # stride-2 subsample (fine -> coarse, picks even (i, j)) and nearest 2x
    # upsample (coarse -> fine), block-diagonal over the batch.
    mc = np.arange(HWc)
    ic, jc = mc // Wc, mc % Wc
    T = np.zeros((HW, HWc), np.float32)
    T[2 * ic * W + 2 * jc, mc] = 1.0
    U = np.zeros((HWc, HW), np.float32)
    U[(i // 2) * Wc + (j // 2), m] = 1.0
    eye = np.eye(batch, dtype=np.float32)
    Tb = np.kron(eye, T)                                     # (B*HW, B*HWc)
    Ub = np.kron(eye, U)                                     # (B*HWc, B*HW)

    # YOLO per-row grid offsets: row a*ATTR+t, t==0 -> gx*stride, t==1 -> gy*stride.
    def offsets(g, stride):
        p = np.arange(g * g)
        off = np.zeros((N_ANCH * ATTR, g * g), np.float32)
        for a in range(N_ANCH):
            off[a * ATTR + 0] = (p % g) * stride
            off[a * ATTR + 1] = (p // g) * stride
        return np.tile(off, (1, batch))

    iswh = np.zeros((N_ANCH * ATTR, 1), np.float32)          # rows with exp (tw, th)
    for a in range(N_ANCH):
        iswh[a * ATTR + 2, 0] = 1.0
        iswh[a * ATTR + 3, 0] = 1.0

    return dict(
        shifts=tuple(shifts),
        masks=jnp.asarray(masks, jnp.float32),
        tsub=jnp.asarray(Tb, jnp.bfloat16),
        ups=jnp.asarray(Ub, jnp.bfloat16),
        off_c=jnp.asarray(offsets(Hc, SIZE // Hc), jnp.float32),
        off_f=jnp.asarray(offsets(H, SIZE // H), jnp.float32),
        iswh=jnp.asarray(iswh, jnp.float32),
    )


# ---------------- fused Darknet kernel ----------------------------------------

def _make_kernel(batch, shifts):
    def kernel(x_ref,
               w0_ref, b0_ref, w1_ref, b1_ref, w2_ref, b2_ref,
               w4_ref, b4_ref, w9_ref, b9_ref, w10_ref, b10_ref,
               mask_ref, tsub_ref, ups_ref,
               iswh_ref, scale_c_ref, off_c_ref, scale_f_ref, off_f_ref,
               detc_ref, detf_ref, slab_ref):
        f32, bf16 = jnp.float32, jnp.bfloat16

        def leaky(v):                                    # LeakyReLU(0.1)
            return jnp.where(v >= 0.0, v, 0.1 * v)

        def tap(v, d):
            # shifted + boundary-masked 3x3 tap d of a (C, B*HW) f32 slab, as bf16.
            sh = shifts[d]
            r = v if sh == 0 else pltpu.roll(v, sh, 1)   # XLU lane rotate
            return (r * mask_ref[pl.ds(d, 1), :]).astype(bf16)

        def yolo(v, scale_ref, off_ref):
            # rows a*ATTR+t:  t<2: sigmoid*stride + grid*stride,
            #                 t in {2,3}: exp*anchor,  t>=4: sigmoid.
            sig = 1.0 / (1.0 + jnp.exp(-v))
            core = jnp.where(iswh_ref[...] > 0.5, jnp.exp(v), sig)
            return core * scale_ref[...] + off_ref[...]

        # batched input slab (3, B*HW): lane = b*HW + pixel
        x = jnp.concatenate([x_ref[b] for b in range(batch)], axis=-1)
        M = x.shape[-1]

        # -- layer 0: conv 3->16, k3 s1 p1, BN(folded) + leaky ------------------
        acc0 = jnp.zeros((w0_ref.shape[1], M), f32)
        for d in range(9):
            acc0 = acc0 + jnp.dot(w0_ref[d], tap(x, d), preferred_element_type=f32)
        x0 = leaky(acc0 + b0_ref[...])                                  # (16, M) f32

        # taps of x0 -> slab rows [0, 144): shared by conv1 (layer 1) and conv9
        # (layer 9, where they are the route(-8) half of its input).
        for d in range(9):
            slab_ref[pl.ds(d * 16, 16), :] = tap(x0, d)

        # -- layer 1: conv 16->32, k3 s2 p1, BN + leaky -------------------------
        # fused stride-1 conv on the fine grid (one K=144 matmul), then the even
        # (i, j) columns are picked with one 0/1 block-diagonal matmul.
        z1 = leaky(jnp.dot(w1_ref[...], slab_ref[pl.ds(0, 144), :],
                           preferred_element_type=f32) + b1_ref[...])   # (32, M)
        x1 = jnp.dot(z1.astype(bf16), tsub_ref[...],
                     preferred_element_type=f32)                        # (32, Mc)
        x1b = x1.astype(bf16)

        # -- layer 2: conv 32->32 1x1 BN+leaky; layer 3: shortcut(from=-2) ------
        x2 = leaky(jnp.dot(w2_ref[...], x1b, preferred_element_type=f32)
                   + b2_ref[...])
        x3 = x2 + x1
        x3b = x3.astype(bf16)

        # -- layer 4: conv 32->27 1x1 (bias, linear); layer 5: yolo (coarse) ----
        x4 = jnp.dot(w4_ref[...], x3b, preferred_element_type=f32) + b4_ref[...]
        detc_ref[...] = yolo(x4, scale_c_ref, off_c_ref)                # (27, Mc)

        # -- layer 6: route(-3) = x3; layer 7: nearest 2x upsample --------------
        up3 = jnp.dot(x3b, ups_ref[...], preferred_element_type=f32)    # (32, M)

        # -- layer 8: route(-1, -8): taps of the upsampled half -> slab rows
        #    [144, 432); the x0 half is already in rows [0, 144) -> concat free.
        for d in range(9):
            slab_ref[pl.ds(144 + d * 32, 32), :] = tap(up3, d)

        # -- layer 9: conv 48->32, k3 s1 p1, BN + leaky (one K=432 matmul) ------
        x9 = leaky(jnp.dot(w9_ref[...], slab_ref[...],
                           preferred_element_type=f32) + b9_ref[...]).astype(bf16)

        # -- layer 10: conv 32->27 1x1 (bias); layer 11: yolo (fine) ------------
        x10 = jnp.dot(w10_ref[...], x9, preferred_element_type=f32) + b10_ref[...]
        detf_ref[...] = yolo(x10, scale_f_ref, off_f_ref)               # (27, M)

    return kernel


# ---------------- Parameters ---------------------------------------------------

def build_params(key):
    raw = {}
    in_channels = [3]
    for idx, block in enumerate(CFG[1:]):
        t = block['type']
        out_ch = None
        if t == 'convolutional':
            O = int(block['filters'])
            k = int(block['size'])
            C = in_channels[-1]
            key, kw, k2, k3, k4, k5 = jax.random.split(key, 6)
            w = 0.05 * jax.random.normal(kw, (O, C, k, k), jnp.float32)
            if 'batch_normalize' in block:
                gamma = 1.0 + 0.1 * jax.random.normal(k2, (O,), jnp.float32)
                beta = 0.1 * jax.random.normal(k3, (O,), jnp.float32)
                rmean = 0.1 * jax.random.normal(k4, (O,), jnp.float32)
                rvar = 1.0 + 0.1 * jnp.abs(jax.random.normal(k5, (O,), jnp.float32))
                eps = 1e-5  # PyTorch BatchNorm2d default
                scale = gamma / jnp.sqrt(rvar + eps)
                bias = beta - rmean * scale
            else:
                scale = jnp.ones((O,), jnp.float32)
                bias = 0.1 * jax.random.normal(k2, (O,), jnp.float32)
            raw[idx] = dict(w=w, scale=scale, bias=bias)
            out_ch = O
        elif t == 'route':
            idxs = [int(s.strip()) for s in str(block['layers']).split(',')]
            out_ch = sum(in_channels[j] for j in idxs)
        elif t == 'yolo':
            masks = [int(mk) for mk in block['mask'].split(',')]
            av = [int(a.strip()) for a in block['anchors'].split(',')]
            raw[idx] = dict(anchors=tuple(
                (float(av[2 * mk]), float(av[2 * mk + 1])) for mk in masks))
        in_channels.append(out_ch if out_ch else in_channels[-1])

    def fold(p):          # fold BN scale into the conv weights: w' = w * scale_o
        return p['w'] * p['scale'][:, None, None, None]

    def pack3x3(w):       # (O, C, 3, 3) -> (O, 9C), column = d*C + c, d = di*3+dj
        O, C = w.shape[0], w.shape[1]
        return jnp.transpose(w, (0, 2, 3, 1)).reshape(O, 9 * C).astype(jnp.bfloat16)

    def pack1x1(p):
        w = fold(p)
        return w.reshape(w.shape[0], w.shape[1]).astype(jnp.bfloat16)

    def colb(p):          # per-channel bias as a (O, 1) column (broadcasts on lanes)
        return p['bias'].reshape(-1, 1).astype(jnp.float32)

    # conv0: per-tap (9, 16, 3) weights (kept as 9 tiny accumulating matmuls).
    w0 = fold(raw[0])
    w0p = jnp.transpose(w0, (2, 3, 0, 1)).reshape(
        9, w0.shape[0], w0.shape[1]).astype(jnp.bfloat16)

    # conv9: packed to match the scratch-slab row layout:
    #   rows [0, 144)   = x0 taps       -> route(-8) channels 32..47 of conv9
    #   rows [144, 432) = upsample taps -> route(-1) channels  0..31 of conv9
    w9 = fold(raw[9])
    w9p = jnp.concatenate([pack3x3(w9[:, 32:48]), pack3x3(w9[:, 0:32])], axis=1)

    def yolo_scale(anchors, stride):
        s = np.ones((N_ANCH * ATTR, 1), np.float32)
        for a, (aw, ah) in enumerate(anchors):
            s[a * ATTR + 0, 0] = stride
            s[a * ATTR + 1, 0] = stride
            s[a * ATTR + 2, 0] = aw        # (anchor/stride)*exp, *stride cancels
            s[a * ATTR + 3, 0] = ah
        return jnp.asarray(s)

    stride_c = SIZE // (SIZE // 2)    # coarse 8x8 head -> 2
    stride_f = SIZE // SIZE           # fine 16x16 head -> 1
    return dict(
        w0=w0p, b0=colb(raw[0]),
        w1=pack3x3(fold(raw[1])), b1=colb(raw[1]),
        w2=pack1x1(raw[2]), b2=colb(raw[2]),
        w4=pack1x1(raw[4]), b4=colb(raw[4]),
        w9=w9p, b9=colb(raw[9]),
        w10=pack1x1(raw[10]), b10=colb(raw[10]),
        scale_c=yolo_scale(raw[5]['anchors'], stride_c),
        scale_f=yolo_scale(raw[11]['anchors'], stride_f),
    )


# ---------------- Forward -------------------------------------------------------

def darknet_forward(params, x):
    B, C, H, W = x.shape
    HW = H * W
    HWc = HW // 4
    M = B * HW
    Mc = B * HWc

    geo = _geometry(B)
    kernel = _make_kernel(B, geo['shifts'])

    # NCHW -> (B, C, H*W); the kernel concatenates images along lanes itself.
    xs = x.reshape(B, C, HW)

    inputs = (xs,
              params['w0'], params['b0'], params['w1'], params['b1'],
              params['w2'], params['b2'], params['w4'], params['b4'],
              params['w9'], params['b9'], params['w10'], params['b10'],
              geo['masks'], geo['tsub'], geo['ups'],
              geo['iswh'], params['scale_c'], geo['off_c'],
              params['scale_f'], geo['off_f'])

    # No grid: one invocation, everything resident in VMEM (total < ~1 MiB,
    # well under the scoped limit on v5e/v6e/v7x), no constant double-buffering.
    vmem = pl.BlockSpec(memory_space=pltpu.MemorySpace.VMEM)
    detc, detf = pl.pallas_call(
        kernel,
        out_shape=(jax.ShapeDtypeStruct((N_ANCH * ATTR, Mc), jnp.float32),
                   jax.ShapeDtypeStruct((N_ANCH * ATTR, M), jnp.float32)),
        in_specs=[vmem] * len(inputs),
        out_specs=(vmem, vmem),
        scratch_shapes=[pltpu.VMEM((9 * 48, M), jnp.bfloat16)],   # shared tap slab
    )(*inputs)

    # (A*ATTR, B*G*G) -> (B, A*G*G, ATTR), matching the reference view/permute/cat.
    def to_ref_layout(det, gg):
        return (det.reshape(N_ANCH, ATTR, B, gg)
                   .transpose(2, 0, 3, 1)
                   .reshape(B, N_ANCH * gg, ATTR))

    det_c = to_ref_layout(detc, HWc)
    det_f = to_ref_layout(detf, HW)
    # TODO(synk): nms(dets, obj_thresh, nms_thresh) is data-dependent box
    # suppression with no clean Pallas equivalent; return pre-NMS detections.
    return jnp.concatenate([det_c, det_f], axis=1)


if __name__ == "__main__":
    key = jax.random.PRNGKey(0)
    key, kx = jax.random.split(key)
    x = jax.random.normal(kx, (2, 3, SIZE, SIZE), jnp.float32)
    params = build_params(key)

    fwd = jax.jit(lambda inp: darknet_forward(params, inp))
    out = jax.block_until_ready(fwd(x))

    expected = (2, 3 * 8 * 8 + 3 * 16 * 16, NUM_CLASSES + 5)
    assert out.shape == expected, (out.shape, expected)
    assert bool(jnp.all(jnp.isfinite(out)))
    # objectness / class scores come from an exact sigmoid -> must lie in [0, 1]
    assert bool(jnp.all((out[..., 4:] >= 0.0) & (out[..., 4:] <= 1.0)))
    print("KERNEL_OK")
</pallas_src>

<mosaic_0001>
module attributes {stable_mosaic.version = 11 : i64} {
  func.func @kernel(%arg0: memref<2x3x256xf32, #tpu.memory_space<vmem>>, %arg1: memref<9x16x3xbf16, #tpu.memory_space<vmem>>, %arg2: memref<16x1xf32, #tpu.memory_space<vmem>>, %arg3: memref<32x144xbf16, #tpu.memory_space<vmem>>, %arg4: memref<32x1xf32, #tpu.memory_space<vmem>>, %arg5: memref<32x32xbf16, #tpu.memory_space<vmem>>, %arg6: memref<32x1xf32, #tpu.memory_space<vmem>>, %arg7: memref<27x32xbf16, #tpu.memory_space<vmem>>, %arg8: memref<27x1xf32, #tpu.memory_space<vmem>>, %arg9: memref<32x432xbf16, #tpu.memory_space<vmem>>, %arg10: memref<32x1xf32, #tpu.memory_space<vmem>>, %arg11: memref<27x32xbf16, #tpu.memory_space<vmem>>, %arg12: memref<27x1xf32, #tpu.memory_space<vmem>>, %arg13: memref<9x512xf32, #tpu.memory_space<vmem>>, %arg14: memref<512x128xbf16, #tpu.memory_space<vmem>>, %arg15: memref<128x512xbf16, #tpu.memory_space<vmem>>, %arg16: memref<27x1xf32, #tpu.memory_space<vmem>>, %arg17: memref<27x1xf32, #tpu.memory_space<vmem>>, %arg18: memref<27x128xf32, #tpu.memory_space<vmem>>, %arg19: memref<27x1xf32, #tpu.memory_space<vmem>>, %arg20: memref<27x512xf32, #tpu.memory_space<vmem>>, %arg21: memref<27x128xf32, #tpu.memory_space<vmem>>, %arg22: memref<27x512xf32, #tpu.memory_space<vmem>>, %arg23: memref<432x512xbf16, #tpu.memory_space<vmem>>) attributes {dimension_semantics = [], scalar_prefetch = 0 : i64, scratch_operands = 1 : i64, tpu.core_type = #tpu.core_type<tc>} {
    %c0 = arith.constant 0 : index
    %c0_0 = arith.constant 0 : index
    %c0_1 = arith.constant 0 : index
    %0 = vector.load %arg0[%c0, %c0_0, %c0_1] : memref<2x3x256xf32, #tpu.memory_space<vmem>>, vector<1x3x256xf32>
    %1 = vector.shape_cast %0 : vector<1x3x256xf32> to vector<3x256xf32>
    %c1 = arith.constant 1 : index
    %c0_2 = arith.constant 0 : index
    %c0_3 = arith.constant 0 : index
    %2 = vector.load %arg0[%c1, %c0_2, %c0_3] : memref<2x3x256xf32, #tpu.memory_space<vmem>>, vector<1x3x256xf32>
    %3 = vector.shape_cast %2 : vector<1x3x256xf32> to vector<3x256xf32>
    %4 = tpu.concatenate %1, %3 in 1 : vector<3x256xf32>, vector<3x256xf32> -> vector<3x512xf32>
    %cst = arith.constant 0.000000e+00 : f32
    %5 = vector.broadcast %cst : f32 to vector<16x512xf32>
    %c0_4 = arith.constant 0 : index
    %c0_5 = arith.constant 0 : index
    %c0_6 = arith.constant 0 : index
    %6 = vector.load %arg1[%c0_4, %c0_5, %c0_6] : memref<9x16x3xbf16, #tpu.memory_space<vmem>>, vector<1x16x3xbf16>
    %7 = vector.shape_cast %6 : vector<1x16x3xbf16> to vector<16x3xbf16>
    %c17_i32 = arith.constant 17 : i32
    %8 = tpu.dynamic_rotate %4 by %c17_i32 dim 1 : vector<3x512xf32>, i32 -> vector<3x512xf32>
    %c0_7 = arith.constant 0 : index
    %c0_8 = arith.constant 0 : index
    %9 = vector.load %arg13[%c0_7, %c0_8] : memref<9x512xf32, #tpu.memory_space<vmem>>, vector<1x512xf32>
    %10 = vector.broadcast %9 : vector<1x512xf32> to vector<3x512xf32>
    %11 = arith.mulf %8, %10 : vector<3x512xf32>
    %12 = arith.truncf %11 : vector<3x512xf32> to vector<3x512xbf16>
    %cst_9 = arith.constant dense<0.000000e+00> : vector<16x512xf32>
    %13 = tpu.matmul %7, %12, %cst_9 {dimension_numbers = #tpu.dot_dimension_numbers<[1], [0], [0], [1], [0, 0, 1, 1], [], []>} : vector<16x3xbf16>, vector<3x512xbf16>, vector<16x512xf32> -> vector<16x512xf32>
    %14 = arith.addf %5, %13 : vector<16x512xf32>
    %c1_10 = arith.constant 1 : index
    %c0_11 = arith.constant 0 : index
    %c0_12 = arith.constant 0 : index
    %15 = vector.load %arg1[%c1_10, %c0_11, %c0_12] : memref<9x16x3xbf16, #tpu.memory_space<vmem>>, vector<1x16x3xbf16>
    %16 = vector.shape_cast %15 : vector<1x16x3xbf16> to vector<16x3xbf16>
    %c16_i32 = arith.constant 16 : i32
    %17 = tpu.dynamic_rotate %4 by %c16_i32 dim 1 : vector<3x512xf32>, i32 -> vector<3x512xf32>
    %c1_13 = arith.constant 1 : index
    %c0_14 = arith.constant 0 : index
    %18 = vector.load %arg13[%c1_13, %c0_14] : memref<9x512xf32, #tpu.memory_space<vmem>>, vector<1x512xf32>
    %19 = vector.broadcast %18 : vector<1x512xf32> to vector<3x512xf32>
    %20 = arith.mulf %17, %19 : vector<3x512xf32>
    %21 = arith.truncf %20 : vector<3x512xf32> to vector<3x512xbf16>
    %cst_15 = arith.constant dense<0.000000e+00> : vector<16x512xf32>
    %22 = tpu.matmul %16, %21, %cst_15 {dimension_numbers = #tpu.dot_dimension_numbers<[1], [0], [0], [1], [0, 0, 1, 1], [], []>} : vector<16x3xbf16>, vector<3x512xbf16>, vector<16x512xf32> -> vector<16x512xf32>
    %23 = arith.addf %14, %22 : vector<16x512xf32>
    %c2 = arith.constant 2 : index
    %c0_16 = arith.constant 0 : index
    %c0_17 = arith.constant 0 : index
    %24 = vector.load %arg1[%c2, %c0_16, %c0_17] : memref<9x16x3xbf16, #tpu.memory_space<vmem>>, vector<1x16x3xbf16>
    %25 = vector.shape_cast %24 : vector<1x16x3xbf16> to vector<16x3xbf16>
    %c15_i32 = arith.constant 15 : i32
    %26 = tpu.dynamic_rotate %4 by %c15_i32 dim 1 : vector<3x512xf32>, i32 -> vector<3x512xf32>
    %c2_18 = arith.constant 2 : index
    %c0_19 = arith.constant 0 : index
    %27 = vector.load %arg13[%c2_18, %c0_19] : memref<9x512xf32, #tpu.memory_space<vmem>>, vector<1x512xf32>
    %28 = vector.broadcast %27 : vector<1x512xf32> to vector<3x512xf32>
    %29 = arith.mulf %26, %28 : vector<3x512xf32>
    %30 = arith.truncf %29 : vector<3x512xf32> to vector<3x512xbf16>
    %cst_20 = arith.constant dense<0.000000e+00> : vector<16x512xf32>
    %31 = tpu.matmul %25, %30, %cst_20 {dimension_numbers = #tpu.dot_dimension_numbers<[1], [0], [0], [1], [0, 0, 1, 1], [], []>} : vector<16x3xbf16>, vector<3x512xbf16>, vector<16x512xf32> -> vector<16x512xf32>
    %32 = arith.addf %23, %31 : vector<16x512xf32>
    %c3 = arith.constant 3 : index
    %c0_21 = arith.constant 0 : index
    %c0_22 = arith.constant 0 : index
    %33 = vector.load %arg1[%c3, %c0_21, %c0_22] : memref<9x16x3xbf16, #tpu.memory_space<vmem>>, vector<1x16x3xbf16>
    %34 = vector.shape_cast %33 : vector<1x16x3xbf16> to vector<16x3xbf16>
    %c1_i32 = arith.constant 1 : i32
    %35 = tpu.dynamic_rotate %4 by %c1_i32 dim 1 : vector<3x512xf32>, i32 -> vector<3x512xf32>
    %c3_23 = arith.constant 3 : index
    %c0_24 = arith.constant 0 : index
    %36 = vector.load %arg13[%c3_23, %c0_24] : memref<9x512xf32, #tpu.memory_space<vmem>>, vector<1x512xf32>
    %37 = vector.broadcast %36 : vector<1x512xf32> to vector<3x512xf32>
    %38 = arith.mulf %35, %37 : vector<3x512xf32>
    %39 = arith.truncf %38 : vector<3x512xf32> to vector<3x512xbf16>
    %cst_25 = arith.constant dense<0.000000e+00> : vector<16x512xf32>
    %40 = tpu.matmul %34, %39, %cst_25 {dimension_numbers = #tpu.dot_dimension_numbers<[1], [0], [0], [1], [0, 0, 1, 1], [], []>} : vector<16x3xbf16>, vector<3x512xbf16>, vector<16x512xf32> -> vector<16x512xf32>
    %41 = arith.addf %32, %40 : vector<16x512xf32>
    %c4 = arith.constant 4 : index
    %c0_26 = arith.constant 0 : index
    %c0_27 = arith.constant 0 : index
    %42 = vector.load %arg1[%c4, %c0_26, %c0_27] : memref<9x16x3xbf16, #tpu.memory_space<vmem>>, vector<1x16x3xbf16>
    %43 = vector.shape_cast %42 : vector<1x16x3xbf16> to vector<16x3xbf16>
    %c4_28 = arith.constant 4 : index
    %c0_29 = arith.constant 0 : index
    %44 = vector.load %arg13[%c4_28, %c0_29] : memref<9x512xf32, #tpu.memory_space<vmem>>, vector<1x512xf32>
    %45 = vector.broadcast %44 : vector<1x512xf32> to vector<3x512xf32>
    %46 = arith.mulf %4, %45 : vector<3x512xf32>
    %47 = arith.truncf %46 : vector<3x512xf32> to vector<3x512xbf16>
    %cst_30 = arith.constant dense<0.000000e+00> : vector<16x512xf32>
    %48 = tpu.matmul %43, %47, %cst_30 {dimension_numbers = #tpu.dot_dimension_numbers<[1], [0], [0], [1], [0, 0, 1, 1], [], []>} : vector<16x3xbf16>, vector<3x512xbf16>, vector<16x512xf32> -> vector<16x512xf32>
    %49 = arith.addf %41, %48 : vector<16x512xf32>
    %c5 = arith.constant 5 : index
    %c0_31 = arith.constant 0 : index
    %c0_32 = arith.constant 0 : index
    %50 = vector.load %arg1[%c5, %c0_31, %c0_32] : memref<9x16x3xbf16, #tpu.memory_space<vmem>>, vector<1x16x3xbf16>
    %51 = vector.shape_cast %50 : vector<1x16x3xbf16> to vector<16x3xbf16>
    %c511_i32 = arith.constant 511 : i32
    %52 = tpu.dynamic_rotate %4 by %c511_i32 dim 1 : vector<3x512xf32>, i32 -> vector<3x512xf32>
    %c5_33 = arith.constant 5 : index
    %c0_34 = arith.constant 0 : index
    %53 = vector.load %arg13[%c5_33, %c0_34] : memref<9x512xf32, #tpu.memory_space<vmem>>, vector<1x512xf32>
    %54 = vector.broadcast %53 : vector<1x512xf32> to vector<3x512xf32>
    %55 = arith.mulf %52, %54 : vector<3x512xf32>
    %56 = arith.truncf %55 : vector<3x512xf32> to vector<3x512xbf16>
    %cst_35 = arith.constant dense<0.000000e+00> : vector<16x512xf32>
    %57 = tpu.matmul %51, %56, %cst_35 {dimension_numbers = #tpu.dot_dimension_numbers<[1], [0], [0], [1], [0, 0, 1, 1], [], []>} : vector<16x3xbf16>, vector<3x512xbf16>, vector<16x512xf32> -> vector<16x512xf32>
    %58 = arith.addf %49, %57 : vector<16x512xf32>
    %c6 = arith.constant 6 : index
    %c0_36 = arith.constant 0 : index
    %c0_37 = arith.constant 0 : index
    %59 = vector.load %arg1[%c6, %c0_36, %c0_37] : memref<9x16x3xbf16, #tpu.memory_space<vmem>>, vector<1x16x3xbf16>
    %60 = vector.shape_cast %59 : vector<1x16x3xbf16> to vector<16x3xbf16>
    %c497_i32 = arith.constant 497 : i32
    %61 = tpu.dynamic_rotate %4 by %c497_i32 dim 1 : vector<3x512xf32>, i32 -> vector<3x512xf32>
    %c6_38 = arith.constant 6 : index
    %c0_39 = arith.constant 0 : index
    %62 = vector.load %arg13[%c6_38, %c0_39] : memref<9x512xf32, #tpu.memory_space<vmem>>, vector<1x512xf32>
    %63 = vector.broadcast %62 : vector<1x512xf32> to vector<3x512xf32>
    %64 = arith.mulf %61, %63 : vector<3x512xf32>
    %65 = arith.truncf %64 : vector<3x512xf32> to vector<3x512xbf16>
    %cst_40 = arith.constant dense<0.000000e+00> : vector<16x512xf32>
    %66 = tpu.matmul %60, %65, %cst_40 {dimension_numbers = #tpu.dot_dimension_numbers<[1], [0], [0], [1], [0, 0, 1, 1], [], []>} : vector<16x3xbf16>, vector<3x512xbf16>, vector<16x512xf32> -> vector<16x512xf32>
    %67 = arith.addf %58, %66 : vector<16x512xf32>
    %c7 = arith.constant 7 : index
    %c0_41 = arith.constant 0 : index
    %c0_42 = arith.constant 0 : index
    %68 = vector.load %arg1[%c7, %c0_41, %c0_42] : memref<9x16x3xbf16, #tpu.memory_space<vmem>>, vector<1x16x3xbf16>
    %69 = vector.shape_cast %68 : vector<1x16x3xbf16> to vector<16x3xbf16>
    %c496_i32 = arith.constant 496 : i32
    %70 = tpu.dynamic_rotate %4 by %c496_i32 dim 1 : vector<3x512xf32>, i32 -> vector<3x512xf32>
    %c7_43 = arith.constant 7 : index
    %c0_44 = arith.constant 0 : index
    %71 = vector.load %arg13[%c7_43, %c0_44] : memref<9x512xf32, #tpu.memory_space<vmem>>, vector<1x512xf32>
    %72 = vector.broadcast %71 : vector<1x512xf32> to vector<3x512xf32>
    %73 = arith.mulf %70, %72 : vector<3x512xf32>
    %74 = arith.truncf %73 : vector<3x512xf32> to vector<3x512xbf16>
    %cst_45 = arith.constant dense<0.000000e+00> : vector<16x512xf32>
    %75 = tpu.matmul %69, %74, %cst_45 {dimension_numbers = #tpu.dot_dimension_numbers<[1], [0], [0], [1], [0, 0, 1, 1], [], []>} : vector<16x3xbf16>, vector<3x512xbf16>, vector<16x512xf32> -> vector<16x512xf32>
    %76 = arith.addf %67, %75 : vector<16x512xf32>
    %c8 = arith.constant 8 : index
    %c0_46 = arith.constant 0 : index
    %c0_47 = arith.constant 0 : index
    %77 = vector.load %arg1[%c8, %c0_46, %c0_47] : memref<9x16x3xbf16, #tpu.memory_space<vmem>>, vector<1x16x3xbf16>
    %78 = vector.shape_cast %77 : vector<1x16x3xbf16> to vector<16x3xbf16>
    %c495_i32 = arith.constant 495 : i32
    %79 = tpu.dynamic_rotate %4 by %c495_i32 dim 1 : vector<3x512xf32>, i32 -> vector<3x512xf32>
    %c8_48 = arith.constant 8 : index
    %c0_49 = arith.constant 0 : index
    %80 = vector.load %arg13[%c8_48, %c0_49] : memref<9x512xf32, #tpu.memory_space<vmem>>, vector<1x512xf32>
    %81 = vector.broadcast %80 : vector<1x512xf32> to vector<3x512xf32>
    %82 = arith.mulf %79, %81 : vector<3x512xf32>
    %83 = arith.truncf %82 : vector<3x512xf32> to vector<3x512xbf16>
    %cst_50 = arith.constant dense<0.000000e+00> : vector<16x512xf32>
    %84 = tpu.matmul %78, %83, %cst_50 {dimension_numbers = #tpu.dot_dimension_numbers<[1], [0], [0], [1], [0, 0, 1, 1], [], []>} : vector<16x3xbf16>, vector<3x512xbf16>, vector<16x512xf32> -> vector<16x512xf32>
    %85 = arith.addf %76, %84 : vector<16x512xf32>
    %c0_51 = arith.constant 0 : index
    %c0_52 = arith.constant 0 : index
    %86 = vector.load %arg2[%c0_51, %c0_52] : memref<16x1xf32, #tpu.memory_space<vmem>>, vector<16x1xf32>
    %87 = vector.broadcast %86 : vector<16x1xf32> to vector<16x512xf32>
    %88 = arith.addf %85, %87 : vector<16x512xf32>
    %cst_53 = arith.constant 0.000000e+00 : f32
    %89 = vector.broadcast %cst_53 : f32 to vector<16x512xf32>
    %90 = arith.cmpf oge, %88, %89 : vector<16x512xf32>
    %cst_54 = arith.constant 1.000000e-01 : f32
    %91 = vector.broadcast %cst_54 : f32 to vector<16x512xf32>
    %92 = arith.mulf %91, %88 : vector<16x512xf32>
    %93 = arith.select %90, %88, %92 : vector<16x512xi1>, vector<16x512xf32>
    %c17_i32_55 = arith.constant 17 : i32
    %94 = tpu.dynamic_rotate %93 by %c17_i32_55 dim 1 : vector<16x512xf32>, i32 -> vector<16x512xf32>
    %c0_56 = arith.constant 0 : index
    %c0_57 = arith.constant 0 : index
    %95 = vector.load %arg13[%c0_56, %c0_57] : memref<9x512xf32, #tpu.memory_space<vmem>>, vector<1x512xf32>
    %96 = vector.broadcast %95 : vector<1x512xf32> to vector<16x512xf32>
    %97 = arith.mulf %94, %96 : vector<16x512xf32>
    %98 = arith.truncf %97 : vector<16x512xf32> to vector<16x512xbf16>
    %c0_58 = arith.constant 0 : index
    %c0_59 = arith.constant 0 : index
    %99 = vector.load %arg23[%c0_58, %c0_59] : memref<432x512xbf16, #tpu.memory_space<vmem>>, vector<16x512xbf16>
    tpu.vector_store %arg23[%c0_58, %c0_59], %98 {strides = array<i32>} : memref<432x512xbf16, #tpu.memory_space<vmem>>, vector<16x512xbf16>,
    %c16_i32_60 = arith.constant 16 : i32
    %100 = tpu.dynamic_rotate %93 by %c16_i32_60 dim 1 : vector<16x512xf32>, i32 -> vector<16x512xf32>
    %c1_61 = arith.constant 1 : index
    %c0_62 = arith.constant 0 : index
    %101 = vector.load %arg13[%c1_61, %c0_62] : memref<9x512xf32, #tpu.memory_space<vmem>>, vector<1x512xf32>
    %102 = vector.broadcast %101 : vector<1x512xf32> to vector<16x512xf32>
    %103 = arith.mulf %100, %102 : vector<16x512xf32>
    %104 = arith.truncf %103 : vector<16x512xf32> to vector<16x512xbf16>
    %c16 = arith.constant 16 : index
    %c0_63 = arith.constant 0 : index
    %105 = vector.load %arg23[%c16, %c0_63] : memref<432x512xbf16, #tpu.memory_space<vmem>>, vector<16x512xbf16>
    tpu.vector_store %arg23[%c16, %c0_63], %104 {strides = array<i32>} : memref<432x512xbf16, #tpu.memory_space<vmem>>, vector<16x512xbf16>,
    %c15_i32_64 = arith.constant 15 : i32
    %106 = tpu.dynamic_rotate %93 by %c15_i32_64 dim 1 : vector<16x512xf32>, i32 -> vector<16x512xf32>
    %c2_65 = arith.constant 2 : index
    %c0_66 = arith.constant 0 : index
    %107 = vector.load %arg13[%c2_65, %c0_66] : memref<9x512xf32, #tpu.memory_space<vmem>>, vector<1x512xf32>
    %108 = vector.broadcast %107 : vector<1x512xf32> to vector<16x512xf32>
    %109 = arith.mulf %106, %108 : vector<16x512xf32>
    %110 = arith.truncf %109 : vector<16x512xf32> to vector<16x512xbf16>
    %c32 = arith.constant 32 : index
    %c0_67 = arith.constant 0 : index
    %111 = vector.load %arg23[%c32, %c0_67] : memref<432x512xbf16, #tpu.memory_space<vmem>>, vector<16x512xbf16>
    tpu.vector_store %arg23[%c32, %c0_67], %110 {strides = array<i32>} : memref<432x512xbf16, #tpu.memory_space<vmem>>, vector<16x512xbf16>,
    %c1_i32_68 = arith.constant 1 : i32
    %112 = tpu.dynamic_rotate %93 by %c1_i32_68 dim 1 : vector<16x512xf32>, i32 -> vector<16x512xf32>
    %c3_69 = arith.constant 3 : index
    %c0_70 = arith.constant 0 : index
    %113 = vector.load %arg13[%c3_69, %c0_70] : memref<9x512xf32, #tpu.memory_space<vmem>>, vector<1x512xf32>
    %114 = vector.broadcast %113 : vector<1x512xf32> to vector<16x512xf32>
    %115 = arith.mulf %112, %114 : vector<16x512xf32>
    %116 = arith.truncf %115 : vector<16x512xf32> to vector<16x512xbf16>
    %c48 = arith.constant 48 : index
    %c0_71 = arith.constant 0 : index
    %117 = vector.load %arg23[%c48, %c0_71] : memref<432x512xbf16, #tpu.memory_space<vmem>>, vector<16x512xbf16>
    tpu.vector_store %arg23[%c48, %c0_71], %116 {strides = array<i32>} : memref<432x512xbf16, #tpu.memory_space<vmem>>, vector<16x512xbf16>,
    %c4_72 = arith.constant 4 : index
    %c0_73 = arith.constant 0 : index
    %118 = vector.load %arg13[%c4_72, %c0_73] : memref<9x512xf32, #tpu.memory_space<vmem>>, vector<1x512xf32>
    %119 = vector.broadcast %118 : vector<1x512xf32> to vector<16x512xf32>
    %120 = arith.mulf %93, %119 : vector<16x512xf32>
    %121 = arith.truncf %120 : vector<16x512xf32> to vector<16x512xbf16>
    %c64 = arith.constant 64 : index
    %c0_74 = arith.constant 0 : index
    %122 = vector.load %arg23[%c64, %c0_74] : memref<432x512xbf16, #tpu.memory_space<vmem>>, vector<16x512xbf16>
    tpu.vector_store %arg23[%c64, %c0_74], %121 {strides = array<i32>} : memref<432x512xbf16, #tpu.memory_space<vmem>>, vector<16x512xbf16>,
    %c511_i32_75 = arith.constant 511 : i32
    %123 = tpu.dynamic_rotate %93 by %c511_i32_75 dim 1 : vector<16x512xf32>, i32 -> vector<16x512xf32>
    %c5_76 = arith.constant 5 : index
    %c0_77 = arith.constant 0 : index
    %124 = vector.load %arg13[%c5_76, %c0_77] : memref<9x512xf32, #tpu.memory_space<vmem>>, vector<1x512xf32>
    %125 = vector.broadcast %124 : vector<1x512xf32> to vector<16x512xf32>
    %126 = arith.mulf %123, %125 : vector<16x512xf32>
    %127 = arith.truncf %126 : vector<16x512xf32> to vector<16x512xbf16>
    %c80 = arith.constant 80 : index
    %c0_78 = arith.constant 0 : index
    %128 = vector.load %arg23[%c80, %c0_78] : memref<432x512xbf16, #tpu.memory_space<vmem>>, vector<16x512xbf16>
    tpu.vector_store %arg23[%c80, %c0_78], %127 {strides = array<i32>} : memref<432x512xbf16, #tpu.memory_space<vmem>>, vector<16x512xbf16>,
    %c497_i32_79 = arith.constant 497 : i32
    %129 = tpu.dynamic_rotate %93 by %c497_i32_79 dim 1 : vector<16x512xf32>, i32 -> vector<16x512xf32>
    %c6_80 = arith.constant 6 : index
    %c0_81 = arith.constant 0 : index
    %130 = vector.load %arg13[%c6_80, %c0_81] : memref<9x512xf32, #tpu.memory_space<vmem>>, vector<1x512xf32>
    %131 = vector.broadcast %130 : vector<1x512xf32> to vector<16x512xf32>
    %132 = arith.mulf %129, %131 : vector<16x512xf32>
    %133 = arith.truncf %132 : vector<16x512xf32> to vector<16x512xbf16>
    %c96 = arith.constant 96 : index
    %c0_82 = arith.constant 0 : index
    %134 = vector.load %arg23[%c96, %c0_82] : memref<432x512xbf16, #tpu.memory_space<vmem>>, vector<16x512xbf16>
    tpu.vector_store %arg23[%c96, %c0_82], %133 {strides = array<i32>} : memref<432x512xbf16, #tpu.memory_space<vmem>>, vector<16x512xbf16>,
    %c496_i32_83 = arith.constant 496 : i32
    %135 = tpu.dynamic_rotate %93 by %c496_i32_83 dim 1 : vector<16x512xf32>, i32 -> vector<16x512xf32>
    %c7_84 = arith.constant 7 : index
    %c0_85 = arith.constant 0 : index
    %136 = vector.load %arg13[%c7_84, %c0_85] : memref<9x512xf32, #tpu.memory_space<vmem>>, vector<1x512xf32>
    %137 = vector.broadcast %136 : vector<1x512xf32> to vector<16x512xf32>
    %138 = arith.mulf %135, %137 : vector<16x512xf32>
    %139 = arith.truncf %138 : vector<16x512xf32> to vector<16x512xbf16>
    %c112 = arith.constant 112 : index
    %c0_86 = arith.constant 0 : index
    %140 = vector.load %arg23[%c112, %c0_86] : memref<432x512xbf16, #tpu.memory_space<vmem>>, vector<16x512xbf16>
    tpu.vector_store %arg23[%c112, %c0_86], %139 {strides = array<i32>} : memref<432x512xbf16, #tpu.memory_space<vmem>>, vector<16x512xbf16>,
    %c495_i32_87 = arith.constant 495 : i32
    %141 = tpu.dynamic_rotate %93 by %c495_i32_87 dim 1 : vector<16x512xf32>, i32 -> vector<16x512xf32>
    %c8_88 = arith.constant 8 : index
    %c0_89 = arith.constant 0 : index
    %142 = vector.load %arg13[%c8_88, %c0_89] : memref<9x512xf32, #tpu.memory_space<vmem>>, vector<1x512xf32>
    %143 = vector.broadcast %142 : vector<1x512xf32> to vector<16x512xf32>
    %144 = arith.mulf %141, %143 : vector<16x512xf32>
    %145 = arith.truncf %144 : vector<16x512xf32> to vector<16x512xbf16>
    %c128 = arith.constant 128 : index
    %c0_90 = arith.constant 0 : index
    %146 = vector.load %arg23[%c128, %c0_90] : memref<432x512xbf16, #tpu.memory_space<vmem>>, vector<16x512xbf16>
    tpu.vector_store %arg23[%c128, %c0_90], %145 {strides = array<i32>} : memref<432x512xbf16, #tpu.memory_space<vmem>>, vector<16x512xbf16>,
    %c0_91 = arith.constant 0 : index
    %c0_92 = arith.constant 0 : index
    %147 = vector.load %arg3[%c0_91, %c0_92] : memref<32x144xbf16, #tpu.memory_space<vmem>>, vector<32x144xbf16>
    %c0_93 = arith.constant 0 : index
    %c0_94 = arith.constant 0 : index
    %148 = vector.load %arg23[%c0_93, %c0_94] : memref<432x512xbf16, #tpu.memory_space<vmem>>, vector<144x512xbf16>
    %cst_95 = arith.constant dense<0.000000e+00> : vector<32x512xf32>
    %149 = tpu.matmul %147, %148, %cst_95 {dimension_numbers = #tpu.dot_dimension_numbers<[1], [0], [0], [1], [0, 0, 1, 1], [], []>} : vector<32x144xbf16>, vector<144x512xbf16>, vector<32x512xf32> -> vector<32x512xf32>
    %c0_96 = arith.constant 0 : index
    %c0_97 = arith.constant 0 : index
    %150 = vector.load %arg4[%c0_96, %c0_97] : memref<32x1xf32, #tpu.memory_space<vmem>>, vector<32x1xf32>
    %151 = vector.broadcast %150 : vector<32x1xf32> to vector<32x512xf32>
    %152 = arith.addf %149, %151 : vector<32x512xf32>
    %cst_98 = arith.constant 0.000000e+00 : f32
    %153 = vector.broadcast %cst_98 : f32 to vector<32x512xf32>
    %154 = arith.cmpf oge, %152, %153 : vector<32x512xf32>
    %cst_99 = arith.constant 1.000000e-01 : f32
    %155 = vector.broadcast %cst_99 : f32 to vector<32x512xf32>
    %156 = arith.mulf %155, %152 : vector<32x512xf32>
    %157 = arith.select %154, %152, %156 : vector<32x512xi1>, vector<32x512xf32>
    %158 = arith.truncf %157 : vector<32x512xf32> to vector<32x512xbf16>
    %c0_100 = arith.constant 0 : index
    %c0_101 = arith.constant 0 : index
    %159 = vector.load %arg14[%c0_100, %c0_101] : memref<512x128xbf16, #tpu.memory_space<vmem>>, vector<512x128xbf16>
    %cst_102 = arith.constant dense<0.000000e+00> : vector<32x128xf32>
    %160 = tpu.matmul %158, %159, %cst_102 {dimension_numbers = #tpu.dot_dimension_numbers<[1], [0], [0], [1], [0, 0, 1, 1], [], []>} : vector<32x512xbf16>, vector<512x128xbf16>, vector<32x128xf32> -> vector<32x128xf32>
    %161 = arith.truncf %160 : vector<32x128xf32> to vector<32x128xbf16>
    %c0_103 = arith.constant 0 : index
    %c0_104 = arith.constant 0 : index
    %162 = vector.load %arg5[%c0_103, %c0_104] : memref<32x32xbf16, #tpu.memory_space<vmem>>, vector<32x32xbf16>
    %cst_105 = arith.constant dense<0.000000e+00> : vector<32x128xf32>
    %163 = tpu.matmul %162, %161, %cst_105 {dimension_numbers = #tpu.dot_dimension_numbers<[1], [0], [0], [1], [0, 0, 1, 1], [], []>} : vector<32x32xbf16>, vector<32x128xbf16>, vector<32x128xf32> -> vector<32x128xf32>
    %c0_106 = arith.constant 0 : index
    %c0_107 = arith.constant 0 : index
    %164 = vector.load %arg6[%c0_106, %c0_107] : memref<32x1xf32, #tpu.memory_space<vmem>>, vector<32x1xf32>
    %165 = vector.broadcast %164 : vector<32x1xf32> to vector<32x128xf32>
    %166 = arith.addf %163, %165 : vector<32x128xf32>
    %cst_108 = arith.constant 0.000000e+00 : f32
    %167 = vector.broadcast %cst_108 : f32 to vector<32x128xf32>
    %168 = arith.cmpf oge, %166, %167 : vector<32x128xf32>
    %cst_109 = arith.constant 1.000000e-01 : f32
    %169 = vector.broadcast %cst_109 : f32 to vector<32x128xf32>
    %170 = arith.mulf %169, %166 : vector<32x128xf32>
    %171 = arith.select %168, %166, %170 : vector<32x128xi1>, vector<32x128xf32>
    %172 = arith.addf %171, %160 : vector<32x128xf32>
    %173 = arith.truncf %172 : vector<32x128xf32> to vector<32x128xbf16>
    %c0_110 = arith.constant 0 : index
    %c0_111 = arith.constant 0 : index
    %174 = vector.load %arg7[%c0_110, %c0_111] : memref<27x32xbf16, #tpu.memory_space<vmem>>, vector<27x32xbf16>
    %cst_112 = arith.constant dense<0.000000e+00> : vector<27x128xf32>
    %175 = tpu.matmul %174, %173, %cst_112 {dimension_numbers = #tpu.dot_dimension_numbers<[1], [0], [0], [1], [0, 0, 1, 1], [], []>} : vector<27x32xbf16>, vector<32x128xbf16>, vector<27x128xf32> -> vector<27x128xf32>
    %c0_113 = arith.constant 0 : index
    %c0_114 = arith.constant 0 : index
    %176 = vector.load %arg8[%c0_113, %c0_114] : memref<27x1xf32, #tpu.memory_space<vmem>>, vector<27x1xf32>
    %177 = vector.broadcast %176 : vector<27x1xf32> to vector<27x128xf32>
    %178 = arith.addf %175, %177 : vector<27x128xf32>
    %cst_115 = arith.constant 0.000000e+00 : f32
    %179 = vector.broadcast %cst_115 : f32 to vector<27x128xf32>
    %180 = arith.subf %179, %178 : vector<27x128xf32>
    %181 = math.exp %180 : vector<27x128xf32>
    %cst_116 = arith.constant 1.000000e+00 : f32
    %182 = vector.broadcast %cst_116 : f32 to vector<27x128xf32>
    %183 = arith.addf %182, %181 : vector<27x128xf32>
    %cst_117 = arith.constant 1.000000e+00 : f32
    %184 = vector.broadcast %cst_117 : f32 to vector<27x128xf32>
    %185 = arith.divf %184, %183 : vector<27x128xf32>
    %c0_118 = arith.constant 0 : index
    %c0_119 = arith.constant 0 : index
    %186 = vector.load %arg16[%c0_118, %c0_119] : memref<27x1xf32, #tpu.memory_space<vmem>>, vector<27x1xf32>
    %cst_120 = arith.constant 5.000000e-01 : f32
    %187 = vector.broadcast %cst_120 : f32 to vector<27x1xf32>
    %188 = arith.cmpf ogt, %186, %187 : vector<27x1xf32>
    %189 = math.exp %178 : vector<27x128xf32>
    %190 = vector.shape_cast %188 : vector<27x1xi1> to vector<27x1xi1>
    %191 = vector.broadcast %190 : vector<27x1xi1> to vector<27x128xi1>
    %192 = arith.select %191, %189, %185 : vector<27x128xi1>, vector<27x128xf32>
    %c0_121 = arith.constant 0 : index
    %c0_122 = arith.constant 0 : index
    %193 = vector.load %arg17[%c0_121, %c0_122] : memref<27x1xf32, #tpu.memory_space<vmem>>, vector<27x1xf32>
    %194 = vector.broadcast %193 : vector<27x1xf32> to vector<27x128xf32>
    %195 = arith.mulf %192, %194 : vector<27x128xf32>
    %c0_123 = arith.constant 0 : index
    %c0_124 = arith.constant 0 : index
    %196 = vector.load %arg18[%c0_123, %c0_124] : memref<27x128xf32, #tpu.memory_space<vmem>>, vector<27x128xf32>
    %197 = arith.addf %195, %196 : vector<27x128xf32>
    %c0_125 = arith.constant 0 : index
    %c0_126 = arith.constant 0 : index
    %198 = vector.load %arg21[%c0_125, %c0_126] : memref<27x128xf32, #tpu.memory_space<vmem>>, vector<27x128xf32>
    tpu.vector_store %arg21[%c0_125, %c0_126], %197 {strides = array<i32>} : memref<27x128xf32, #tpu.memory_space<vmem>>, vector<27x128xf32>,
    %c0_127 = arith.constant 0 : index
    %c0_128 = arith.constant 0 : index
    %199 = vector.load %arg15[%c0_127, %c0_128] : memref<128x512xbf16, #tpu.memory_space<vmem>>, vector<128x512xbf16>
    %cst_129 = arith.constant dense<0.000000e+00> : vector<32x512xf32>
    %200 = tpu.matmul %173, %199, %cst_129 {dimension_numbers = #tpu.dot_dimension_numbers<[1], [0], [0], [1], [0, 0, 1, 1], [], []>} : vector<32x128xbf16>, vector<128x512xbf16>, vector<32x512xf32> -> vector<32x512xf32>
    %c17_i32_130 = arith.constant 17 : i32
    %201 = tpu.dynamic_rotate %200 by %c17_i32_130 dim 1 : vector<32x512xf32>, i32 -> vector<32x512xf32>
    %c0_131 = arith.constant 0 : index
    %c0_132 = arith.constant 0 : index
    %202 = vector.load %arg13[%c0_131, %c0_132] : memref<9x512xf32, #tpu.memory_space<vmem>>, vector<1x512xf32>
    %203 = vector.broadcast %202 : vector<1x512xf32> to vector<32x512xf32>
    %204 = arith.mulf %201, %203 : vector<32x512xf32>
    %205 = arith.truncf %204 : vector<32x512xf32> to vector<32x512xbf16>
    %c144 = arith.constant 144 : index
    %c0_133 = arith.constant 0 : index
    %206 = vector.load %arg23[%c144, %c0_133] : memref<432x512xbf16, #tpu.memory_space<vmem>>, vector<32x512xbf16>
    tpu.vector_store %arg23[%c144, %c0_133], %205 {strides = array<i32>} : memref<432x512xbf16, #tpu.memory_space<vmem>>, vector<32x512xbf16>,
    %c16_i32_134 = arith.constant 16 : i32
    %207 = tpu.dynamic_rotate %200 by %c16_i32_134 dim 1 : vector<32x512xf32>, i32 -> vector<32x512xf32>
    %c1_135 = arith.constant 1 : index
    %c0_136 = arith.constant 0 : index
    %208 = vector.load %arg13[%c1_135, %c0_136] : memref<9x512xf32, #tpu.memory_space<vmem>>, vector<1x512xf32>
    %209 = vector.broadcast %208 : vector<1x512xf32> to vector<32x512xf32>
    %210 = arith.mulf %207, %209 : vector<32x512xf32>
    %211 = arith.truncf %210 : vector<32x512xf32> to vector<32x512xbf16>
    %c176 = arith.constant 176 : index
    %c0_137 = arith.constant 0 : index
    %212 = vector.load %arg23[%c176, %c0_137] : memref<432x512xbf16, #tpu.memory_space<vmem>>, vector<32x512xbf16>
    tpu.vector_store %arg23[%c176, %c0_137], %211 {strides = array<i32>} : memref<432x512xbf16, #tpu.memory_space<vmem>>, vector<32x512xbf16>,
    %c15_i32_138 = arith.constant 15 : i32
    %213 = tpu.dynamic_rotate %200 by %c15_i32_138 dim 1 : vector<32x512xf32>, i32 -> vector<32x512xf32>
    %c2_139 = arith.constant 2 : index
    %c0_140 = arith.constant 0 : index
    %214 = vector.load %arg13[%c2_139, %c0_140] : memref<9x512xf32, #tpu.memory_space<vmem>>, vector<1x512xf32>
    %215 = vector.broadcast %214 : vector<1x512xf32> to vector<32x512xf32>
    %216 = arith.mulf %213, %215 : vector<32x512xf32>
    %217 = arith.truncf %216 : vector<32x512xf32> to vector<32x512xbf16>
    %c208 = arith.constant 208 : index
    %c0_141 = arith.constant 0 : index
    %218 = vector.load %arg23[%c208, %c0_141] : memref<432x512xbf16, #tpu.memory_space<vmem>>, vector<32x512xbf16>
    tpu.vector_store %arg23[%c208, %c0_141], %217 {strides = array<i32>} : memref<432x512xbf16, #tpu.memory_space<vmem>>, vector<32x512xbf16>,
    %c1_i32_142 = arith.constant 1 : i32
    %219 = tpu.dynamic_rotate %200 by %c1_i32_142 dim 1 : vector<32x512xf32>, i32 -> vector<32x512xf32>
    %c3_143 = arith.constant 3 : index
    %c0_144 = arith.constant 0 : index
    %220 = vector.load %arg13[%c3_143, %c0_144] : memref<9x512xf32, #tpu.memory_space<vmem>>, vector<1x512xf32>
    %221 = vector.broadcast %220 : vector<1x512xf32> to vector<32x512xf32>
    %222 = arith.mulf %219, %221 : vector<32x512xf32>
    %223 = arith.truncf %222 : vector<32x512xf32> to vector<32x512xbf16>
    %c240 = arith.constant 240 : index
    %c0_145 = arith.constant 0 : index
    %224 = vector.load %arg23[%c240, %c0_145] : memref<432x512xbf16, #tpu.memory_space<vmem>>, vector<32x512xbf16>
    tpu.vector_store %arg23[%c240, %c0_145], %223 {strides = array<i32>} : memref<432x512xbf16, #tpu.memory_space<vmem>>, vector<32x512xbf16>,
    %c4_146 = arith.constant 4 : index
    %c0_147 = arith.constant 0 : index
    %225 = vector.load %arg13[%c4_146, %c0_147] : memref<9x512xf32, #tpu.memory_space<vmem>>, vector<1x512xf32>
    %226 = vector.broadcast %225 : vector<1x512xf32> to vector<32x512xf32>
    %227 = arith.mulf %200, %226 : vector<32x512xf32>
    %228 = arith.truncf %227 : vector<32x512xf32> to vector<32x512xbf16>
    %c272 = arith.constant 272 : index
    %c0_148 = arith.constant 0 : index
    %229 = vector.load %arg23[%c272, %c0_148] : memref<432x512xbf16, #tpu.memory_space<vmem>>, vector<32x512xbf16>
    tpu.vector_store %arg23[%c272, %c0_148], %228 {strides = array<i32>} : memref<432x512xbf16, #tpu.memory_space<vmem>>, vector<32x512xbf16>,
    %c511_i32_149 = arith.constant 511 : i32
    %230 = tpu.dynamic_rotate %200 by %c511_i32_149 dim 1 : vector<32x512xf32>, i32 -> vector<32x512xf32>
    %c5_150 = arith.constant 5 : index
    %c0_151 = arith.constant 0 : index
    %231 = vector.load %arg13[%c5_150, %c0_151] : memref<9x512xf32, #tpu.memory_space<vmem>>, vector<1x512xf32>
    %232 = vector.broadcast %231 : vector<1x512xf32> to vector<32x512xf32>
    %233 = arith.mulf %230, %232 : vector<32x512xf32>
    %234 = arith.truncf %233 : vector<32x512xf32> to vector<32x512xbf16>
    %c304 = arith.constant 304 : index
    %c0_152 = arith.constant 0 : index
    %235 = vector.load %arg23[%c304, %c0_152] : memref<432x512xbf16, #tpu.memory_space<vmem>>, vector<32x512xbf16>
    tpu.vector_store %arg23[%c304, %c0_152], %234 {strides = array<i32>} : memref<432x512xbf16, #tpu.memory_space<vmem>>, vector<32x512xbf16>,
    %c497_i32_153 = arith.constant 497 : i32
    %236 = tpu.dynamic_rotate %200 by %c497_i32_153 dim 1 : vector<32x512xf32>, i32 -> vector<32x512xf32>
    %c6_154 = arith.constant 6 : index
    %c0_155 = arith.constant 0 : index
    %237 = vector.load %arg13[%c6_154, %c0_155] : memref<9x512xf32, #tpu.memory_space<vmem>>, vector<1x512xf32>
    %238 = vector.broadcast %237 : vector<1x512xf32> to vector<32x512xf32>
    %239 = arith.mulf %236, %238 : vector<32x512xf32>
    %240 = arith.truncf %239 : vector<32x512xf32> to vector<32x512xbf16>
    %c336 = arith.constant 336 : index
    %c0_156 = arith.constant 0 : index
    %241 = vector.load %arg23[%c336, %c0_156] : memref<432x512xbf16, #tpu.memory_space<vmem>>, vector<32x512xbf16>
    tpu.vector_store %arg23[%c336, %c0_156], %240 {strides = array<i32>} : memref<432x512xbf16, #tpu.memory_space<vmem>>, vector<32x512xbf16>,
    %c496_i32_157 = arith.constant 496 : i32
    %242 = tpu.dynamic_rotate %200 by %c496_i32_157 dim 1 : vector<32x512xf32>, i32 -> vector<32x512xf32>
    %c7_158 = arith.constant 7 : index
    %c0_159 = arith.constant 0 : index
    %243 = vector.load %arg13[%c7_158, %c0_159] : memref<9x512xf32, #tpu.memory_space<vmem>>, vector<1x512xf32>
    %244 = vector.broadcast %243 : vector<1x512xf32> to vector<32x512xf32>
    %245 = arith.mulf %242, %244 : vector<32x512xf32>
    %246 = arith.truncf %245 : vector<32x512xf32> to vector<32x512xbf16>
    %c368 = arith.constant 368 : index
    %c0_160 = arith.constant 0 : index
    %247 = vector.load %arg23[%c368, %c0_160] : memref<432x512xbf16, #tpu.memory_space<vmem>>, vector<32x512xbf16>
    tpu.vector_store %arg23[%c368, %c0_160], %246 {strides = array<i32>} : memref<432x512xbf16, #tpu.memory_space<vmem>>, vector<32x512xbf16>,
    %c495_i32_161 = arith.constant 495 : i32
    %248 = tpu.dynamic_rotate %200 by %c495_i32_161 dim 1 : vector<32x512xf32>, i32 -> vector<32x512xf32>
    %c8_162 = arith.constant 8 : index
    %c0_163 = arith.constant 0 : index
    %249 = vector.load %arg13[%c8_162, %c0_163] : memref<9x512xf32, #tpu.memory_space<vmem>>, vector<1x512xf32>
    %250 = vector.broadcast %249 : vector<1x512xf32> to vector<32x512xf32>
    %251 = arith.mulf %248, %250 : vector<32x512xf32>
    %252 = arith.truncf %251 : vector<32x512xf32> to vector<32x512xbf16>
    %c400 = arith.constant 400 : index
    %c0_164 = arith.constant 0 : index
    %253 = vector.load %arg23[%c400, %c0_164] : memref<432x512xbf16, #tpu.memory_space<vmem>>, vector<32x512xbf16>
    tpu.vector_store %arg23[%c400, %c0_164], %252 {strides = array<i32>} : memref<432x512xbf16, #tpu.memory_space<vmem>>, vector<32x512xbf16>,
    %c0_165 = arith.constant 0 : index
    %c0_166 = arith.constant 0 : index
    %254 = vector.load %arg9[%c0_165, %c0_166] : memref<32x432xbf16, #tpu.memory_space<vmem>>, vector<32x432xbf16>
    %c0_167 = arith.constant 0 : index
    %c0_168 = arith.constant 0 : index
    %255 = vector.load %arg23[%c0_167, %c0_168] : memref<432x512xbf16, #tpu.memory_space<vmem>>, vector<432x512xbf16>
    %cst_169 = arith.constant dense<0.000000e+00> : vector<32x512xf32>
    %256 = tpu.matmul %254, %255, %cst_169 {dimension_numbers = #tpu.dot_dimension_numbers<[1], [0], [0], [1], [0, 0, 1, 1], [], []>} : vector<32x432xbf16>, vector<432x512xbf16>, vector<32x512xf32> -> vector<32x512xf32>
    %c0_170 = arith.constant 0 : index
    %c0_171 = arith.constant 0 : index
    %257 = vector.load %arg10[%c0_170, %c0_171] : memref<32x1xf32, #tpu.memory_space<vmem>>, vector<32x1xf32>
    %258 = vector.broadcast %257 : vector<32x1xf32> to vector<32x512xf32>
    %259 = arith.addf %256, %258 : vector<32x512xf32>
    %cst_172 = arith.constant 0.000000e+00 : f32
    %260 = vector.broadcast %cst_172 : f32 to vector<32x512xf32>
    %261 = arith.cmpf oge, %259, %260 : vector<32x512xf32>
    %cst_173 = arith.constant 1.000000e-01 : f32
    %262 = vector.broadcast %cst_173 : f32 to vector<32x512xf32>
    %263 = arith.mulf %262, %259 : vector<32x512xf32>
    %264 = arith.select %261, %259, %263 : vector<32x512xi1>, vector<32x512xf32>
    %265 = arith.truncf %264 : vector<32x512xf32> to vector<32x512xbf16>
    %c0_174 = arith.constant 0 : index
    %c0_175 = arith.constant 0 : index
    %266 = vector.load %arg11[%c0_174, %c0_175] : memref<27x32xbf16, #tpu.memory_space<vmem>>, vector<27x32xbf16>
    %cst_176 = arith.constant dense<0.000000e+00> : vector<27x512xf32>
    %267 = tpu.matmul %266, %265, %cst_176 {dimension_numbers = #tpu.dot_dimension_numbers<[1], [0], [0], [1], [0, 0, 1, 1], [], []>} : vector<27x32xbf16>, vector<32x512xbf16>, vector<27x512xf32> -> vector<27x512xf32>
    %c0_177 = arith.constant 0 : index
    %c0_178 = arith.constant 0 : index
    %268 = vector.load %arg12[%c0_177, %c0_178] : memref<27x1xf32, #tpu.memory_space<vmem>>, vector<27x1xf32>
    %269 = vector.broadcast %268 : vector<27x1xf32> to vector<27x512xf32>
    %270 = arith.addf %267, %269 : vector<27x512xf32>
    %cst_179 = arith.constant 0.000000e+00 : f32
    %271 = vector.broadcast %cst_179 : f32 to vector<27x512xf32>
    %272 = arith.subf %271, %270 : vector<27x512xf32>
    %273 = math.exp %272 : vector<27x512xf32>
    %cst_180 = arith.constant 1.000000e+00 : f32
    %274 = vector.broadcast %cst_180 : f32 to vector<27x512xf32>
    %275 = arith.addf %274, %273 : vector<27x512xf32>
    %cst_181 = arith.constant 1.000000e+00 : f32
    %276 = vector.broadcast %cst_181 : f32 to vector<27x512xf32>
    %277 = arith.divf %276, %275 : vector<27x512xf32>
    %c0_182 = arith.constant 0 : index
    %c0_183 = arith.constant 0 : index
    %278 = vector.load %arg16[%c0_182, %c0_183] : memref<27x1xf32, #tpu.memory_space<vmem>>, vector<27x1xf32>
    %cst_184 = arith.constant 5.000000e-01 : f32
    %279 = vector.broadcast %cst_184 : f32 to vector<27x1xf32>
    %280 = arith.cmpf ogt, %278, %279 : vector<27x1xf32>
    %281 = math.exp %270 : vector<27x512xf32>
    %282 = vector.shape_cast %280 : vector<27x1xi1> to vector<27x1xi1>
    %283 = vector.broadcast %282 : vector<27x1xi1> to vector<27x512xi1>
    %284 = arith.select %283, %281, %277 : vector<27x512xi1>, vector<27x512xf32>
    %c0_185 = arith.constant 0 : index
    %c0_186 = arith.constant 0 : index
    %285 = vector.load %arg19[%c0_185, %c0_186] : memref<27x1xf32, #tpu.memory_space<vmem>>, vector<27x1xf32>
    %286 = vector.broadcast %285 : vector<27x1xf32> to vector<27x512xf32>
    %287 = arith.mulf %284, %286 : vector<27x512xf32>
    %c0_187 = arith.constant 0 : index
    %c0_188 = arith.constant 0 : index
    %288 = vector.load %arg20[%c0_187, %c0_188] : memref<27x512xf32, #tpu.memory_space<vmem>>, vector<27x512xf32>
    %289 = arith.addf %287, %288 : vector<27x512xf32>
    %c0_189 = arith.constant 0 : index
    %c0_190 = arith.constant 0 : index
    %290 = vector.load %arg22[%c0_189, %c0_190] : memref<27x512xf32, #tpu.memory_space<vmem>>, vector<27x512xf32>
    tpu.vector_store %arg22[%c0_189, %c0_190], %289 {strides = array<i32>} : memref<27x512xf32, #tpu.memory_space<vmem>>, vector<27x512xf32>,
    return
  }
}

</mosaic_0001>

<bundles_post_ra>
// kernel: _lambda_.1
= control target key start
LH: loop header
LB: loop body
LE: loop exit
PB: predicated region body
PF: predicated region fallthrough
CT: control target
= control target key end

     0   :  { %s9326_s0 = inlined_call_operand.vmem [shape: f32[2,3,256], index: 0, kind: input, shape index: {}]   ;;  %s9327_s1 = inlined_call_operand.vmem [shape: bf16[9,16,3], index: 1, kind: input, shape index: {}]   ;;  %s9328_s2 = inlined_call_operand.hbm [shape: f32[16,1], index: 2, kind: input, shape index: {}]   ;;  %s9329_s3 = inlined_call_operand.vmem [shape: bf16[32,144], index: 3, kind: input, shape index: {}]   ;;  %s9330_s4 = inlined_call_operand.hbm [shape: f32[32,1], index: 4, kind: input, shape index: {}]   ;;  %s9331_s5 = inlined_call_operand.vmem [shape: bf16[32,32], index: 5, kind: input, shape index: {}]   ;;  %s9332_s6 = inlined_call_operand.hbm [shape: f32[32,1], index: 6, kind: input, shape index: {}]   ;;  %s9333_s7 = inlined_call_operand.hbm [shape: bf16[27,32], index: 7, kind: input, shape index: {}]   ;;  %s9334_s8 = inlined_call_operand.hbm [shape: f32[27,1], index: 8, kind: input, shape index: {}]   ;;  %s9335_s9 = inlined_call_operand.vmem [shape: bf16[32,432], index: 9, kind: input, shape index: {}]   ;;  %s9336_s10 = inlined_call_operand.hbm [shape: f32[32,1], index: 10, kind: input, shape index: {}]   ;;  %s9337_s11 = inlined_call_operand.hbm [shape: bf16[27,32], index: 11, kind: input, shape index: {}]   ;;  %s9338_s12 = inlined_call_operand.hbm [shape: f32[27,1], index: 12, kind: input, shape index: {}]   ;;  %s9339_s13 = inlined_call_operand.vmem [shape: f32[9,512], index: 13, kind: input, shape index: {}]   ;;  %s9340_s14 = inlined_call_operand.vmem [shape: bf16[512,128], index: 14, kind: input, shape index: {}]   ;;  %s9341_s15 = inlined_call_operand.vmem [shape: bf16[128,512], index: 15, kind: input, shape index: {}]   ;;  %s9342_s16 = inlined_call_operand.hbm [shape: f32[27,1], index: 16, kind: input, shape index: {}]   ;;  %s9343_s17 = inlined_call_operand.hbm [shape: f32[27,1], index: 17, kind: input, shape index: {}]   ;;  %s9344_s18 = inlined_call_operand.hbm [shape: f32[27,128], index: 18, kind: input, shape index: {}]   ;;  %s9345_s19 = inlined_call_operand.vmem [shape: f32[27,1], index: 19, kind: input, shape index: {}]   ;;  %s9346_s20 = inlined_call_operand.vmem [shape: f32[27,512], index: 20, kind: input, shape index: {}]   ;;  %s9347_s21 = inlined_call_operand.vmem [shape: f32[27,128], index: 21, kind: output, shape index: {0}]   ;;  %s9348_s22 = inlined_call_operand.vmem [shape: f32[27,512], index: 22, kind: output, shape index: {1}]  }
   0x1   :  { %9492 = sst [smem:[#allocation130_spill]] %s9326_s0 }
   0x2   :  { %9493 = sst [smem:[#allocation131_spill]] %s9327_s1 }
   0x3   :  { %9494 = sst [smem:[#allocation132_spill]] %s9328_s2 }
   0x4   :  { %9495 = sst [smem:[#allocation133_spill]] %s9329_s3 }
   0x5   :  { %9496 = sst [smem:[#allocation134_spill]] %s9330_s4 }
   0x6   :  { %9497 = sst [smem:[#allocation135_spill]] %s9331_s5 }
   0x7   :  { %9498 = sst [smem:[#allocation136_spill]] %s9332_s6 }
   0x8   :  { %9499 = sst [smem:[#allocation137_spill]] %s9348_s22 }
   0x9   :  { %28 = vsyncpa [#allocation4], 0 }
   0xa   :  { %29 = vsyncpa [#allocation6], 0 }
   0xb   :  { %30 = vsyncpa [#allocation9], 0 }
   0xc   :  { %31 = vsyncpa [#allocation12], 0 }
   0xd   :  { %32 = vsyncpa [#allocation15], 0 }
   0xe   :  { %33 = vsyncpa [#allocation18], 0  ;;  %s6029_s3 = smov [#allocation5]   ;;  %s6030_s29 = smov [#allocation8]  }
   0xf   :  { %s57_s28 = sshll.u32 %s6029_s3, 4  ;;  %s83_s30 = sshll.u32 %s6030_s29, 4  ;;  %s58_s28 = int_to_ptr.vmem [resolvable:$true] %s57_s28  ;;  %s6169_s30 = int_to_ptr.vmem [resolvable:$true] %s83_s30 }
  0x10   :  { %s9500_s23 = sld [smem:[#allocation134_spill]] }
  0x16   :  { %s5775_s1 = scalar_lea.hbm %s9500_s23, 512 }
  0x17   :  { %p5776_p0 = scmp.ne.s32.totalorder %s9500_s23, %s5775_s1  ;;  %p5779_p1 = scmp.lt.u32.totalorder %s5775_s1, %s9500_s23 }
  0x19   :  { %p5781_p2 = pnand %p5779_p1, %p5776_p0 }
  0x1b   :  { %5784 = shalt.err (!%p5781_p2)
}
  0x1c   :  { %s5785_s26 = scalar_lea.vmem %s58_s28, 512  ;;  %p5790_p4 = scmp.lt.s32.totalorder %s58_s28, %s58_s28 }
  0x1d   :  { %p5786_p3 = scmp.ne.s32.totalorder %s58_s28, %s5785_s26  ;;  %p5791_p5 = scmp.lt.s32.totalorder %s5785_s26, %s5785_s26 }
  0x1f   :  { %p5792_p6 = por %p5791_p5, %p5790_p4 }
  0x21   :  { %p5793_p7 = pnand %p5792_p6, %p5786_p3 }
  0x23   :  { %5796 = shalt.err (!%p5793_p7)
}
  0x24   :  { %s9356_s2 = smov 128   ;;  %s9358_s27 = smov 8  }
  0x25   :  { %63 = dma.hbm_to_vmem [thread:$0]  %s9500_s23, 512, %s58_s28, [#allocation6], %s9356_s2, %s9356_s2, %s9358_s27  }
  0x26   :  { %s5797_s1 = scalar_lea.hbm %s9333_s7, 256 }
  0x27   :  { %p5798_p8 = scmp.ne.s32.totalorder %s9333_s7, %s5797_s1  ;;  %p5801_p9 = scmp.lt.u32.totalorder %s5797_s1, %s9333_s7 }
  0x29   :  { %p5803_p10 = pnand %p5801_p9, %p5798_p8 }
  0x2b   :  { %5806 = shalt.err (!%p5803_p10)
}
  0x2c   :  { %s5807_s26 = scalar_lea.vmem %s6169_s30, 256  ;;  %p5812_p12 = scmp.lt.s32.totalorder %s6169_s30, %s6169_s30 }
  0x2d   :  { %p5808_p11 = scmp.ne.s32.totalorder %s6169_s30, %s5807_s26  ;;  %p5813_p13 = scmp.lt.s32.totalorder %s5807_s26, %s5807_s26 }
  0x2f   :  { %p5814_p0 = por %p5813_p13, %p5812_p12 }
  0x31   :  { %p5815_p1 = pnand %p5814_p0, %p5808_p11 }
  0x33   :  { %5818 = shalt.err (!%p5815_p1)
}
  0x34   :  { %s6033_s28 = smov 64   ;;  %s6034_s23 = smov 4  }
  0x35   :  { %89 = dma.hbm_to_vmem [thread:$0]  %s9333_s7, 256, %s6169_s30, [#allocation9], %s6033_s28, %s6033_s28, %s6034_s23  }
  0x36   :  { %s6035_s4 = smov [#allocation11]   ;;  %s6036_s1 = smov [#allocation14]  }
  0x37   :  { %s109_s0 = sshll.u32 %s6035_s4, 4  ;;  %s133_s5 = sshll.u32 %s6036_s1, 4  ;;  %s110_s0 = int_to_ptr.vmem [resolvable:$true] %s109_s0  ;;  %s6206_s5 = int_to_ptr.vmem [resolvable:$true] %s133_s5 }
  0x38   :  { %s5819_s25 = scalar_lea.hbm %s9336_s10, 512 }
  0x39   :  { %p5820_p2 = scmp.ne.s32.totalorder %s9336_s10, %s5819_s25  ;;  %p5823_p3 = scmp.lt.u32.totalorder %s5819_s25, %s9336_s10 }
  0x3b   :  { %p5825_p4 = pnand %p5823_p3, %p5820_p2 }
  0x3d   :  { %5828 = shalt.err (!%p5825_p4)
}
  0x3e   :  { %s5829_s7 = scalar_lea.vmem %s110_s0, 512  ;;  %p5834_p6 = scmp.lt.s32.totalorder %s110_s0, %s110_s0 }
  0x3f   :  { %p5830_p5 = scmp.ne.s32.totalorder %s110_s0, %s5829_s7  ;;  %p5835_p7 = scmp.lt.s32.totalorder %s5829_s7, %s5829_s7 }
  0x41   :  { %p5836_p8 = por %p5835_p7, %p5834_p6 }
  0x43   :  { %p5837_p9 = pnand %p5836_p8, %p5830_p5 }
  0x45   :  { %5840 = shalt.err (!%p5837_p9)
}
  0x46   :  { %s9501_s30 = smov 8   ;;  %s9502_s3 = smov 128  }
  0x47   :  { %115 = dma.hbm_to_vmem [thread:$0]  %s9336_s10, 512, %s110_s0, [#allocation12], %s9502_s3, %s9502_s3, %s9501_s30  }
  0x48   :  { %s5841_s22 = scalar_lea.hbm %s9338_s12, 512 }
  0x49   :  { %p5842_p10 = scmp.ne.s32.totalorder %s9338_s12, %s5841_s22  ;;  %p5845_p11 = scmp.lt.u32.totalorder %s5841_s22, %s9338_s12 }
  0x4b   :  { %p5847_p12 = pnand %p5845_p11, %p5842_p10 }
  0x4d   :  { %5850 = shalt.err (!%p5847_p12)
}
  0x4e   :  { %s5851_s26 = scalar_lea.vmem %s6206_s5, 512  ;;  %p5856_p0 = scmp.lt.s32.totalorder %s6206_s5, %s6206_s5 }
  0x4f   :  { %p5852_p13 = scmp.ne.s32.totalorder %s6206_s5, %s5851_s26  ;;  %p5857_p1 = scmp.lt.s32.totalorder %s5851_s26, %s5851_s26 }
  0x51   :  { %p5858_p2 = por %p5857_p1, %p5856_p0 }
  0x53   :  { %p5859_p3 = pnand %p5858_p2, %p5852_p13 }
  0x55   :  { %5862 = shalt.err (!%p5859_p3)
}
  0x56   :  { %139 = dma.hbm_to_vmem [thread:$0]  %s9338_s12, 512, %s6206_s5, [#allocation15], %s9502_s3, %s9502_s3, %s9501_s30  }
  0x57   :  { %s6037_s7 = smov [#allocation17]   ;;  %s6038_s4 = smov [#allocation3]  }
  0x58   :  { %s163_s29 = sshll.u32 %s6037_s7, 4  ;;  %s43_s2 = sshll.u32 %s6038_s4, 4  ;;  %s164_s29 = int_to_ptr.vmem [resolvable:$true] %s163_s29  ;;  %s6243_s2 = int_to_ptr.vmem [resolvable:$true] %s43_s2 }
  0x59   :  { %s5863_s27 = scalar_lea.hbm %s9343_s17, 512 }
  0x5a   :  { %p5864_p4 = scmp.ne.s32.totalorder %s9343_s17, %s5863_s27  ;;  %p5867_p5 = scmp.lt.u32.totalorder %s5863_s27, %s9343_s17 }
  0x5c   :  { %p5869_p6 = pnand %p5867_p5, %p5864_p4 }
  0x5e   :  { %5872 = shalt.err (!%p5869_p6)
}
  0x5f   :  { %s5873_s12 = scalar_lea.vmem %s164_s29, 512  ;;  %p5878_p8 = scmp.lt.s32.totalorder %s164_s29, %s164_s29 }
  0x60   :  { %p5874_p7 = scmp.ne.s32.totalorder %s164_s29, %s5873_s12  ;;  %p5879_p9 = scmp.lt.s32.totalorder %s5873_s12, %s5873_s12 }
  0x62   :  { %p5880_p10 = por %p5879_p9, %p5878_p8 }
  0x64   :  { %p5881_p11 = pnand %p5880_p10, %p5874_p7 }
  0x66   :  { %5884 = shalt.err (!%p5881_p11)
}
  0x67   :  { %169 = dma.hbm_to_vmem [thread:$0]  %s9343_s17, 512, %s164_s29, [#allocation18], %s9502_s3, %s9502_s3, %s9501_s30  }
  0x68   :  { %s9503_s4 = sld [smem:[#allocation132_spill]] }
  0x6e   :  { %s5885_s1 = scalar_lea.hbm %s9503_s4, 256 }
  0x6f   :  { %p5886_p12 = scmp.ne.s32.totalorder %s9503_s4, %s5885_s1  ;;  %p5889_p13 = scmp.lt.u32.totalorder %s5885_s1, %s9503_s4 }
  0x71   :  { %p5891_p0 = pnand %p5889_p13, %p5886_p12 }
  0x73   :  { %5894 = shalt.err (!%p5891_p0)
}
  0x74   :  { %s5895_s25 = scalar_lea.vmem %s6243_s2, 256  ;;  %p5900_p2 = scmp.lt.s32.totalorder %s6243_s2, %s6243_s2 }
  0x75   :  { %p5896_p1 = scmp.ne.s32.totalorder %s6243_s2, %s5895_s25  ;;  %p5901_p3 = scmp.lt.s32.totalorder %s5895_s25, %s5895_s25 }
  0x77   :  { %p5902_p4 = por %p5901_p3, %p5900_p2 }
  0x79   :  { %p5903_p5 = pnand %p5902_p4, %p5896_p1 }
  0x7b   :  { %5906 = shalt.err (!%p5903_p5)
}
  0x7c   :  { %49 = dma.hbm_to_vmem [thread:$0]  %s9503_s4, 256, %s6243_s2, [#allocation4], %s9502_s3, %s9502_s3, %s9501_s30  }
  0x7d   :  { %s6039_s26 = smov [#allocation7]   ;;  %s6040_s5 = smov [#allocation10]  }
  0x7e   :  { %s71_s12 = sshll.u32 %s6039_s26, 4  ;;  %s95_s10 = sshll.u32 %s6040_s5, 4  ;;  %s72_s12 = int_to_ptr.vmem [resolvable:$true] %s71_s12  ;;  %s6280_s10 = int_to_ptr.vmem [resolvable:$true] %s95_s10 }
  0x7f   :  { %s9504_s1 = sld [smem:[#allocation136_spill]] }
  0x85   :  { %s5907_s22 = scalar_lea.hbm %s9504_s1, 512 }
  0x86   :  { %p5908_p6 = scmp.ne.s32.totalorder %s9504_s1, %s5907_s22  ;;  %p5911_p7 = scmp.lt.u32.totalorder %s5907_s22, %s9504_s1 }
  0x88   :  { %p5913_p8 = pnand %p5911_p7, %p5908_p6 }
  0x8a   :  { %5916 = shalt.err (!%p5913_p8)
}
  0x8b   :  { %s5917_s2 = scalar_lea.vmem %s72_s12, 512  ;;  %p5922_p10 = scmp.lt.s32.totalorder %s72_s12, %s72_s12 }
  0x8c   :  { %p5918_p9 = scmp.ne.s32.totalorder %s72_s12, %s5917_s2  ;;  %p5923_p11 = scmp.lt.s32.totalorder %s5917_s2, %s5917_s2 }
  0x8e   :  { %p5924_p12 = por %p5923_p11, %p5922_p10 }
  0x90   :  { %p5925_p13 = pnand %p5924_p12, %p5918_p9 }
  0x92   :  { %5928 = shalt.err (!%p5925_p13)
}
  0x93   :  { %77 = dma.hbm_to_vmem [thread:$0]  %s9504_s1, 512, %s72_s12, [#allocation6], %s9502_s3, %s9502_s3, %s9501_s30  }
  0x94   :  { %s5929_s5 = scalar_lea.hbm %s9334_s8, 512 }
  0x95   :  { %p5930_p0 = scmp.ne.s32.totalorder %s9334_s8, %s5929_s5  ;;  %p5933_p1 = scmp.lt.u32.totalorder %s5929_s5, %s9334_s8 }
  0x97   :  { %p5935_p2 = pnand %p5933_p1, %p5930_p0 }
  0x99   :  { %5938 = shalt.err (!%p5935_p2)
}
  0x9a   :  { %s5939_s24 = scalar_lea.vmem %s6280_s10, 512  ;;  %p5944_p4 = scmp.lt.s32.totalorder %s6280_s10, %s6280_s10 }
  0x9b   :  { %p5940_p3 = scmp.ne.s32.totalorder %s6280_s10, %s5939_s24  ;;  %p5945_p5 = scmp.lt.s32.totalorder %s5939_s24, %s5939_s24 }
  0x9d   :  { %p5946_p6 = por %p5945_p5, %p5944_p4 }
  0x9f   :  { %p5947_p7 = pnand %p5946_p6, %p5940_p3 }
  0xa1   :  { %5950 = shalt.err (!%p5947_p7)
}
  0xa2   :  { %101 = dma.hbm_to_vmem [thread:$0]  %s9334_s8, 512, %s6280_s10, [#allocation9], %s9502_s3, %s9502_s3, %s9501_s30  }
  0xa3   :  { %s6041_s6 = smov [#allocation13]   ;;  %s6042_s2 = smov [#allocation16]  }
  0xa4   :  { %s121_s25 = sshll.u32 %s6041_s6, 4  ;;  %s151_s4 = sshll.u32 %s6042_s2, 4  ;;  %s122_s25 = int_to_ptr.vmem [resolvable:$true] %s121_s25  ;;  %s6317_s4 = int_to_ptr.vmem [resolvable:$true] %s151_s4 }
  0xa5   :  { %s5951_s26 = scalar_lea.hbm %s9337_s11, 256 }
  0xa6   :  { %p5952_p8 = scmp.ne.s32.totalorder %s9337_s11, %s5951_s26  ;;  %p5955_p9 = scmp.lt.u32.totalorder %s5951_s26, %s9337_s11 }
  0xa8   :  { %p5957_p10 = pnand %p5955_p9, %p5952_p8 }
  0xaa   :  { %5960 = shalt.err (!%p5957_p10)
}
  0xab   :  { %s5961_s8 = scalar_lea.vmem %s122_s25, 256  ;;  %p5966_p12 = scmp.lt.s32.totalorder %s122_s25, %s122_s25 }
  0xac   :  { %p5962_p11 = scmp.ne.s32.totalorder %s122_s25, %s5961_s8  ;;  %p5967_p13 = scmp.lt.s32.totalorder %s5961_s8, %s5961_s8 }
  0xae   :  { %p5968_p0 = por %p5967_p13, %p5966_p12 }
  0xb0   :  { %p5969_p1 = pnand %p5968_p0, %p5962_p11 }
  0xb2   :  { %5972 = shalt.err (!%p5969_p1)
}
  0xb3   :  { %127 = dma.hbm_to_vmem [thread:$0]  %s9337_s11, 256, %s122_s25, [#allocation12], %s6033_s28, %s6033_s28, %s6034_s23  }
  0xb4   :  { %s5973_s1 = scalar_lea.hbm %s9342_s16, 512 }
  0xb5   :  { %p5974_p2 = scmp.ne.s32.totalorder %s9342_s16, %s5973_s1  ;;  %p5977_p3 = scmp.lt.u32.totalorder %s5973_s1, %s9342_s16 }
  0xb7   :  { %p5979_p4 = pnand %p5977_p3, %p5974_p2 }
  0xb9   :  { %5982 = shalt.err (!%p5979_p4)
}
  0xba   :  { %s5983_s26 = scalar_lea.vmem %s6317_s4, 512  ;;  %p5988_p6 = scmp.lt.s32.totalorder %s6317_s4, %s6317_s4 }
  0xbb   :  { %p5984_p5 = scmp.ne.s32.totalorder %s6317_s4, %s5983_s26  ;;  %p5989_p7 = scmp.lt.s32.totalorder %s5983_s26, %s5983_s26 }
  0xbd   :  { %p5990_p8 = por %p5989_p7, %p5988_p6 }
  0xbf   :  { %p5991_p9 = pnand %p5990_p8, %p5984_p5 }
  0xc1   :  { %5994 = shalt.err (!%p5991_p9)
}
  0xc2   :  { %157 = dma.hbm_to_vmem [thread:$0]  %s9342_s16, 512, %s6317_s4, [#allocation15], %s9502_s3, %s9502_s3, %s9501_s30  }
  0xc3   :  { %s6043_s23 = smov [#allocation19]   ;;  %s5995_s7 = scalar_lea.hbm %s9344_s18, 512 }
  0xc4   :  { %s175_s25 = sshll.u32 %s6043_s23, 4  ;;  %p5996_p10 = scmp.ne.s32.totalorder %s9344_s18, %s5995_s7  ;;  %s176_s25 = int_to_ptr.vmem [resolvable:$true] %s175_s25 }
  0xc5   :  { %p5999_p11 = scmp.lt.u32.totalorder %s5995_s7, %s9344_s18 }
  0xc7   :  { %p6001_p12 = pnand %p5999_p11, %p5996_p10 }
  0xc9   :  { %6004 = shalt.err (!%p6001_p12)
}
  0xca   :  { %s6005_s24 = scalar_lea.vmem %s176_s25, 512  ;;  %p6010_p0 = scmp.lt.s32.totalorder %s176_s25, %s176_s25 }
  0xcb   :  { %p6006_p13 = scmp.ne.s32.totalorder %s176_s25, %s6005_s24  ;;  %p6011_p1 = scmp.lt.s32.totalorder %s6005_s24, %s6005_s24 }
  0xcd   :  { %p6012_p2 = por %p6011_p1, %p6010_p0 }
  0xcf   :  { %p6013_p3 = pnand %p6012_p2, %p6006_p13 }
  0xd1   :  { %6016 = shalt.err (!%p6013_p3)
}
  0xd2   :  { %181 = dma.hbm_to_vmem [thread:$0]  %s9344_s18, 512, %s176_s25, [#allocation18], %s9502_s3, %s9502_s3, %s9501_s30  }
  0xd3   :  { %6017 = dma.done.wait [#allocation4], 256  }
  0xd4   :  { %6018 = vsyncadd [#allocation4], 4294967040 }
  0xd5   :  { %6019 = dma.done.wait [#allocation6], 1024  }
  0xd6   :  { %6020 = vsyncadd [#allocation6], 4294966272 }
  0xd7   :  { %6021 = dma.done.wait [#allocation9], 768  }
  0xd8   :  { %6022 = vsyncadd [#allocation9], 4294966528 }
  0xd9   :  { %6023 = dma.done.wait [#allocation12], 768  }
  0xda   :  { %6024 = vsyncadd [#allocation12], 4294966528 }
  0xdb   :  { %6025 = dma.done.wait [#allocation15], 1024  }
  0xdc   :  { %6026 = vsyncadd [#allocation15], 4294966272 }
  0xdd   :  { %6027 = dma.done.wait [#allocation18], 1024  }
  0xde   :  { %6028 = vsyncadd [#allocation18], 4294966272  ;;  %s9505_s6 = sld [smem:[#allocation130_spill]]  ;;  %s6044_s18 = smov 16   ;;  %v9361_v4 = vmov 0   ;;  %v1654_v5 = vld [vmem:[#allocation3] sm:$0xff]  ;;  %v239_v7 = vlaneseq }
  0xdf   :  { %380 = vmatprep.mubr.bf16.mxu0 %v9361_v4  ;;  %423 = vmatprep.mubr.bf16.mxu1 %v9361_v4  ;;  %s6046_s30 = smov 17   ;;  %s6047_s3 = smov 15   ;;  %v1655_v6 = vld [vmem:[#allocation3 + $0x8] sm:$0xff]  ;;  %vm332_vm1 = vcmask 1040384   ;;  %vm333_vm3 = vcmask 1041408   ;;  %v6053_v25 = vmov 65535  }
  0xe0   :  { %5538 = vset.pattern.permute.xlu0 %v9361_v4  ;;  %5539 = vset.pattern.permute.xlu1 %v9361_v4  ;;  %s6048_s29 = smov 1   ;;  %s6049_s26 = smov 127   ;;  %v249_v8 = vshrl.u32 %v239_v7, 7  ;;  %v6455_v9 = vand.u32 127, %v239_v7  ;;  %v334_v26 = vsel %vm332_vm1, 4294967295, %v6053_v25  ;;  %vm328_vm4 = vcmask 23552  }
  0xe1   :  { %s6050_s11 = smov 113   ;;  %s6051_s28 = smov 112   ;;  %v5174_v14 = vld [vmem:[%s9339_s13 + $0x1] ss:$8 sm:$0xf]  ;;  %v6488_v35 = vsel %vm333_vm3, %v334_v26, 0 }
  0xe2   :  { %s6052_s23 = smov 111   ;;  %9506 = vst [vmem:[#allocation26_spill] sm:$0xff] %v6455_v9  ;;  %v6457_v10 = vsub.s32 1, %v249_v8  ;;  %v6459_v11 = vsub.s32 0, %v249_v8  ;;  %v6461_v12 = vsub.s32 2, %v249_v8  ;;  %v6463_v13 = vsub.s32 3, %v249_v8 }
  0xe3   :  { %vm9378_vm0 = vcmp.lt.s32.totalorder %v6455_v9, 16  ;;  %v246_v17 = vld [vmem:[%s9339_s13] ss:$8 sm:$0xf]  ;;  %vm241_vm2 = vcmp.lt.s32.totalorder %v6455_v9, 17  ;;  %s9511_s24 = sld [smem:[#allocation131_spill]] }
  0xe4   :  { %v6372_v0 = vld [vmem:[%s9505_s6 + $0x8] sm:$0x77]  ;;  %v6377_v1 = vld [vmem:[%s9505_s6] sm:$0x77]  ;;  %9507 = vst [vmem:[#allocation27_spill] sm:$0xff] %v6457_v10  ;;  %9508 = vst [vmem:[#allocation28_spill] sm:$0xff] %v6459_v11  ;;  %v310_v18 = vrot.slane %v5174_v14, %v6463_v13  ;;  %v302_v19 = vrot.slane %v5174_v14, %v6457_v10  ;;  %v298_v20 = vrot.slane %v5174_v14, %v6459_v11 }
  0xe5   :  { %283 = vrot.lane.b32.xlu1 %v6372_v0, %s6044_s18  ;;  %279 = vrot.lane.b32.xlu0 %v6377_v1, %s6044_s18  ;;  %v6385_v2 = vcombine.high %v6372_v0, %v6372_v0  ;;  %v6389_v3 = vcombine.high %v6377_v1, %v6377_v1  ;;  %9509 = vst [vmem:[#allocation29_spill] sm:$0xff] %v6461_v12  ;;  %9510 = vst [vmem:[#allocation30_spill] sm:$0xff] %v6463_v13  ;;  %v5183_v46 = vld [vmem:[%s9339_s13 + $0x2] ss:$8 sm:$0xf]  ;;  %vm551_vm5 = vcmp.lt.s32.totalorder %v6455_v9, 15 }
  0xe6   :  { %v306_v21 = vrot.slane %v5174_v14, %v6461_v12  ;;  %v6478_v24 = vrot.slane %v246_v17, %v6457_v10  ;;  %v6493_v43 = vrot.slane %v246_v17, %v6459_v11  ;;  %v6496_v44 = vrot.slane %v246_v17, %v6461_v12  ;;  %s9512_s4 = sld [smem:[#allocation133_spill]]  ;;  %s9517_s0 = sld [smem:[#allocation135_spill]] }
  0xe7   :  { %v6499_v45 = vrot.slane %v246_v17, %v6463_v13  ;;  %v566_v56 = vrot.slane %v5183_v46, %v6457_v10  ;;  %v570_v17 = vrot.slane %v5183_v46, %v6461_v12  ;;  %vm712_vm6 = vcmp.lt.s32.totalorder %v6455_v9, 1  ;;  %s9786_s7 = sld [smem:[#allocation137_spill]] }
  0xe8   :  { %vm1021_vm7 = vcmp.lt.s32.totalorder %v6455_v9, 127  ;;  %vm1182_vm8 = vcmp.lt.s32.totalorder %v6455_v9, 113  ;;  %vm1343_vm9 = vcmp.lt.s32.totalorder %v6455_v9, 112  ;;  %vm9377_vm10 = vcmp.lt.s32.totalorder %v6455_v9, 111 }
  0xe9   :  { %285 = vrot.lane.b32.xlu1 %v6385_v2, %s6044_s18  ;;  %281 = vrot.lane.b32.xlu0 %v6389_v3, %s6044_s18  ;;  %v5542_v55 = vld [vmem:[%s9511_s24 + $0x8] sm:$0xff]  }
  0xed   :  { %233 = vrot.lane.b32.xlu1 %v6389_v3, %s6046_s30  ;;  %231 = vrot.lane.b32.xlu0 %v6377_v1, %s6046_s30 }
  0xf1   :  { %237 = vrot.lane.b32.xlu1 %v6385_v2, %s6046_s30  ;;  %235 = vrot.lane.b32.xlu0 %v6372_v0, %s6046_s30 }
  0xf5   :  { %545 = vrot.lane.b32.xlu1 %v6389_v3, %s6047_s3  ;;  %543 = vrot.lane.b32.xlu0 %v6377_v1, %s6047_s3 }
  0xf9   :  { %549 = vrot.lane.b32.xlu1 %v6385_v2, %s6047_s3  ;;  %547 = vrot.lane.b32.xlu0 %v6372_v0, %s6047_s3 }
  0xfd   :  { %706 = vrot.lane.b32.xlu1 %v6389_v3, %s6048_s29  ;;  %704 = vrot.lane.b32.xlu0 %v6377_v1, %s6048_s29 }
 0x101   :  { %710 = vrot.lane.b32.xlu1 %v6385_v2, %s6048_s29  ;;  %708 = vrot.lane.b32.xlu0 %v6372_v0, %s6048_s29 }
 0x105   :  { %1013 = vrot.lane.b32.xlu0 %v6377_v1, %s6049_s26  ;;  %1015 = vrot.lane.b32.xlu1 %v6389_v3, %s6049_s26 }
 0x109   :  { %1017 = vrot.lane.b32.xlu0 %v6372_v0, %s6049_s26  ;;  %1019 = vrot.lane.b32.xlu1 %v6385_v2, %s6049_s26 }
 0x10d   :  { %1174 = vrot.lane.b32.xlu0 %v6377_v1, %s6050_s11  ;;  %1176 = vrot.lane.b32.xlu1 %v6389_v3, %s6050_s11 }
 0x111   :  { %1178 = vrot.lane.b32.xlu0 %v6372_v0, %s6050_s11  ;;  %1180 = vrot.lane.b32.xlu1 %v6385_v2, %s6050_s11 }
 0x115   :  { %1335 = vrot.lane.b32.xlu0 %v6377_v1, %s6051_s28  ;;  %1337 = vrot.lane.b32.xlu1 %v6389_v3, %s6051_s28 }
 0x119   :  { %1339 = vrot.lane.b32.xlu0 %v6372_v0, %s6051_s28  ;;  %1341 = vrot.lane.b32.xlu1 %v6385_v2, %s6051_s28 }
 0x11d   :  { %1496 = vrot.lane.b32.xlu0 %v6377_v1, %s6052_s23  ;;  %1498 = vrot.lane.b32.xlu1 %v6389_v3, %s6052_s23 }
 0x121   :  { %1500 = vrot.lane.b32.xlu0 %v6372_v0, %s6052_s23  ;;  %1502 = vrot.lane.b32.xlu1 %v6385_v2, %s6052_s23 }
 0x125   :  { %1658 = vperm.xlu0 %5538, %v1654_v5   ;;  %1663 = vperm.xlu1 %5539, %v1655_v6   ;;  %v562_v5 = vrot.slane %v5183_v46, %v6459_v11 }
 0x157   :  { %v284_v15 = vpop.permute.xlu1 %283  ;;  %v280_v16 = vpop.permute.xlu0 %279 }
 0x15b   :  { %v286_v22 = vpop.permute.xlu1 %285  ;;  %v282_v23 = vpop.permute.xlu0 %281 }
 0x15c   :  { %v291_v27 = vsel %vm9378_vm0, %v286_v22, %v280_v16  ;;  %v289_v28 = vsel %vm9378_vm0, %v282_v23, %v284_v15  ;;  %v288_v29 = vsel %vm9378_vm0, %v284_v15, %v286_v22  ;;  %v290_v30 = vsel %vm9378_vm0, %v280_v16, %v282_v23  ;;  %v5189_v23 = vld [vmem:[%s9339_s13 + $0x3] ss:$8 sm:$0xf] }
 0x15d   :  { %v318_v31 = vmul.f32 %v310_v18, %v288_v29  ;;  %v316_v32 = vmul.f32 %v302_v19, %v290_v30  ;;  %v315_v33 = vmul.f32 %v298_v20, %v291_v27  ;;  %v317_v34 = vmul.f32 %v306_v21, %v289_v28 }
 0x15e   :  { %v574_v18 = vrot.slane %v5183_v46, %v6463_v13  ;;  %v5195_v46 = vld [vmem:[%s9339_s13 + $0x4] ss:$8 sm:$0xf] }
 0x15f   :  { %v234_v36 = vpop.permute.xlu1 %233  ;;  %v232_v37 = vpop.permute.xlu0 %231  ;;  %v322_v38 = vpack.c.bf16 %v318_v31, %v318_v31  ;;  %v320_v39 = vpack.c.bf16 %v316_v32, %v316_v32  ;;  %v319_v40 = vpack.c.bf16 %v315_v33, %v315_v33  ;;  %v321_v41 = vpack.c.bf16 %v317_v34, %v317_v34 }
 0x160   :  { %v244_v42 = vsel %vm241_vm2, %v232_v37, %v234_v36  ;;  %v727_v31 = vrot.slane %v5189_v23, %v6457_v10 }
 0x161   :  { %v269_v47 = vmul.f32 %v6478_v24, %v244_v42  ;;  %v346_v48 = vand.u32 %v6488_v35, %v322_v38  ;;  %v340_v49 = vand.u32 %v6488_v35, %v320_v39  ;;  %v337_v50 = vand.u32 %v6488_v35, %v319_v40 }
 0x162   :  { %v343_v51 = vand.u32 %v6488_v35, %v321_v41  ;;  %v5543_v41 = vld [vmem:[%s9511_s24] sm:$0xff]  }
 0x163   :  { %v273_v52 = vpack.c.bf16 %v269_v47, %v269_v47  ;;  %391 = vmatprep.subr.bf16.mxu1 %v346_v48  ;;  %v238_v53 = vpop.permute.xlu1 %237  ;;  %348 = vmatprep.subr.bf16.mxu0 %v340_v49  ;;  %v236_v54 = vpop.permute.xlu0 %235  ;;  %v723_v48 = vrot.slane %v5189_v23, %v6459_v11  ;;  %v731_v49 = vrot.slane %v5189_v23, %v6461_v12 }
 0x164   :  { %v245_v57 = vsel %vm241_vm2, %v238_v53, %v232_v37  ;;  %v242_v58 = vsel %vm241_vm2, %v236_v54, %v238_v53  ;;  %v243_v59 = vsel %vm241_vm2, %v234_v36, %v236_v54  ;;  %349 = vmatpush1.bf16.msra.mxu0 %v337_v50  ;;  %392 = vmatpush1.bf16.msra.mxu1 %v343_v51 }
 0x165   :  { %v268_v60 = vmul.f32 %v6493_v43, %v245_v57  ;;  %v270_v61 = vmul.f32 %v6496_v44, %v243_v59  ;;  %v271_v62 = vmul.f32 %v6499_v45, %v242_v58  ;;  %v446_v63 = vand.u32 %v6488_v35, %v273_v52 }
 0x166   :  { %v735_v50 = vrot.slane %v5189_v23, %v6463_v13  ;;  %v5544_v23 = vld [vmem:[%s9511_s24 + $0x10] sm:$0xff]  }
 0x167   :  { %v272_v6 = vpack.c.bf16 %v268_v60, %v268_v60  ;;  %v274_v7 = vpack.c.bf16 %v270_v61, %v270_v61  ;;  %v275_v8 = vpack.c.bf16 %v271_v62, %v271_v62  ;;  %v546_v14 = vpop.permute.xlu1 %545  ;;  %5176 = vmatmul.mubr.msk.bf16.vlgmr.msra.gmra.mrb[0].mxu0 %vm328_vm4, %v5542_v55  ;;  %5177 = vmatmul.mubr.msk.bf16.vlgmr.msra.gmra.mrb[0].mxu1 %vm328_vm4, %v5542_v55  ;;  %v544_v15 = vpop.permute.xlu0 %543 }
 0x168   :  { %v554_v16 = vsel %vm551_vm5, %v544_v15, %v546_v14  ;;  %454 = vmatprep.subr.bf16.mxu0 %v446_v63  ;;  %486 = vmatprep.mubr.bf16.mxu0 %v9361_v4  ;;  %v875_v55 = vrot.slane %v5195_v46, %v6457_v10 }
 0x169   :  { %v443_v19 = vand.u32 %v6488_v35, %v272_v6  ;;  %v449_v20 = vand.u32 %v6488_v35, %v274_v7  ;;  %v580_v21 = vmul.f32 %v566_v56, %v554_v16  ;;  %v452_v22 = vand.u32 %v6488_v35, %v275_v8  ;;  %529 = vmatprep.mubr.bf16.mxu1 %v9361_v4 }
 0x16a   :  { %v883_v56 = vrot.slane %v5195_v46, %v6463_v13  ;;  %v889_v8 = vmul.f32 %v875_v55, %v6389_v3 }
 0x16b   :  { %v584_v25 = vpack.c.bf16 %v580_v21, %v580_v21  ;;  %v550_v26 = vpop.permute.xlu1 %549  ;;  %455 = vmatpush1.bf16.msra.mxu0 %v443_v19  ;;  %497 = vmatprep.subr.bf16.mxu1 %v452_v22  ;;  %v548_v27 = vpop.permute.xlu0 %547 }
 0x16c   :  { %v555_v28 = vsel %vm551_vm5, %v550_v26, %v544_v15  ;;  %v552_v29 = vsel %vm551_vm5, %v548_v27, %v550_v26  ;;  %v553_v30 = vsel %vm551_vm5, %v546_v14, %v548_v27  ;;  %498 = vmatpush1.bf16.msra.mxu1 %v449_v20  ;;  %v891_v14 = vmul.f32 %v883_v56, %v6385_v2  ;;  %v5201_v2 = vld [vmem:[%s9339_s13 + $0x5] ss:$8 sm:$0xf] }
 0x16d   :  { %v579_v32 = vmul.f32 %v562_v5, %v555_v28  ;;  %v581_v33 = vmul.f32 %v570_v17, %v553_v30  ;;  %v582_v34 = vmul.f32 %v574_v18, %v552_v29  ;;  %v599_v36 = vand.u32 %v584_v25, %v6488_v35 }
 0x16e   :  { %v893_v21 = vpack.c.bf16 %v889_v8, %v889_v8  ;;  %v895_v22 = vpack.c.bf16 %v891_v14, %v891_v14  ;;  %v871_v28 = vrot.slane %v5195_v46, %v6459_v11  ;;  %v879_v29 = vrot.slane %v5195_v46, %v6461_v12 }
 0x16f   :  { %v583_v37 = vpack.c.bf16 %v579_v32, %v579_v32  ;;  %v585_v38 = vpack.c.bf16 %v581_v33, %v581_v33  ;;  %v586_v39 = vpack.c.bf16 %v582_v34, %v582_v34  ;;  %v707_v40 = vpop.permute.xlu1 %706  ;;  %v705_v42 = vpop.permute.xlu0 %704  ;;  %607 = vmatprep.subr.bf16.mxu0 %v599_v36  ;;  %v1036_v30 = vrot.slane %v5201_v2, %v6457_v10 }
 0x170   :  { %v715_v47 = vsel %vm712_vm6, %v705_v42, %v707_v40  ;;  %v908_v32 = vand.u32 %v893_v21, %v6488_v35  ;;  %v914_v33 = vand.u32 %v895_v22, %v6488_v35  ;;  %v5546_v21 = vld [vmem:[%s9511_s24 + $0x20] sm:$0xff]  }
 0x171   :  { %v596_v51 = vand.u32 %v583_v37, %v6488_v35  ;;  %v602_v52 = vand.u32 %v585_v38, %v6488_v35  ;;  %v605_v53 = vand.u32 %v586_v39, %v6488_v35  ;;  %v741_v54 = vmul.f32 %v727_v31, %v715_v47  ;;  %v5213_v22 = vld [vmem:[%s9339_s13 + $0x7] ss:$8 sm:$0xf] }
 0x172   :  { %v1044_v31 = vrot.slane %v5201_v2, %v6463_v13  ;;  %v888_v37 = vmul.f32 %v871_v28, %v6377_v1  ;;  %v890_v38 = vmul.f32 %v6372_v0, %v879_v29  ;;  %v5545_v0 = vld [vmem:[%s9511_s24 + $0x18] sm:$0xff]  }
 0x173   :  { %5179 = vmatmul.mubr.msk.bf16.vlgmr.msra.gmra.mrb[0].mxu0 %vm328_vm4, %v5543_v41  ;;  %5180 = vmatmul.mubr.msk.bf16.vlgmr.msra.gmra.mrb[0].mxu1 %vm328_vm4, %v5543_v41  ;;  %v745_v57 = vpack.c.bf16 %v741_v54, %v741_v54  ;;  %v711_v58 = vpop.permute.xlu1 %710  ;;  %v709_v59 = vpop.permute.xlu0 %708  ;;  %v5207_v1 = vld [vmem:[%s9339_s13 + $0x6] ss:$8 sm:$0xf] }
 0x174   :  { %650 = vmatprep.subr.bf16.mxu1 %v605_v53  ;;  %v716_v60 = vsel %vm712_vm6, %v711_v58, %v705_v42  ;;  %608 = vmatpush1.bf16.msra.mxu0 %v596_v51  ;;  %v713_v61 = vsel %vm712_vm6, %v709_v59, %v711_v58  ;;  %v714_v62 = vsel %vm712_vm6, %v707_v40, %v709_v59 }
 0x175   :  { %651 = vmatpush1.bf16.msra.mxu1 %v602_v52  ;;  %v740_v63 = vmul.f32 %v723_v48, %v716_v60  ;;  %v742_v5 = vmul.f32 %v731_v49, %v714_v62  ;;  %v743_v6 = vmul.f32 %v735_v50, %v713_v61  ;;  %639 = vmatprep.mubr.bf16.mxu0 %v9361_v4 }
 0x176   :  { %682 = vmatprep.mubr.bf16.mxu1 %v9361_v4  ;;  %v760_v7 = vand.u32 %v745_v57, %v6488_v35  ;;  %v892_v46 = vpack.c.bf16 %v888_v37, %v888_v37  ;;  %v894_v47 = vpack.c.bf16 %v890_v38, %v890_v38  ;;  %v1032_v50 = vrot.slane %v5201_v2, %v6459_v11 }
 0x177   :  { %v747_v15 = vpack.c.bf16 %v743_v6, %v743_v6  ;;  %v1014_v16 = vpop.permute.xlu0 %1013  ;;  %v1016_v17 = vpop.permute.xlu1 %1015  ;;  %v744_v18 = vpack.c.bf16 %v740_v63, %v740_v63  ;;  %v746_v19 = vpack.c.bf16 %v742_v5, %v742_v5  ;;  %v1040_v51 = vrot.slane %v5201_v2, %v6461_v12 }
 0x178   :  { %768 = vmatprep.subr.bf16.mxu0 %v760_v7  ;;  %v905_v52 = vand.u32 %v892_v46, %v6488_v35  ;;  %v911_v53 = vand.u32 %v894_v47, %v6488_v35  ;;  %v1024_v56 = vsel %vm1021_vm7, %v1014_v16, %v1016_v17  ;;  %v1197_v60 = vrot.slane %v5207_v1, %v6457_v10 }
 0x179   :  { %v766_v20 = vand.u32 %v747_v15, %v6488_v35  ;;  %v757_v3 = vand.u32 %v744_v18, %v6488_v35  ;;  %v763_v25 = vand.u32 %v746_v19, %v6488_v35  ;;  %v1205_v61 = vrot.slane %v5207_v1, %v6463_v13 }
 0x17a   :  { %v1049_v5 = vmul.f32 %v1032_v50, %v1024_v56  ;;  %v5547_v50 = vld [vmem:[%s9511_s24 + $0x28] sm:$0xff]  }
 0x17b   :  { %811 = vmatprep.subr.bf16.mxu1 %v766_v20  ;;  %v1018_v26 = vpop.permute.xlu0 %1017  ;;  %v1020_v27 = vpop.permute.xlu1 %1019  ;;  %v1193_v20 = vrot.slane %v5207_v1, %v6459_v11 }
 0x17c   :  { %v1023_v34 = vsel %vm1021_vm7, %v1016_v17, %v1018_v26  ;;  %v1025_v36 = vsel %vm1021_vm7, %v1020_v27, %v1014_v16  ;;  %v1022_v57 = vsel %vm1021_vm7, %v1018_v26, %v1020_v27  ;;  %v1053_v16 = vpack.c.bf16 %v1049_v5, %v1049_v5 }
 0x17d   :  { %v1050_v39 = vmul.f32 %v1036_v30, %v1023_v34  ;;  %v1052_v40 = vmul.f32 %v1044_v31, %v1025_v36  ;;  %v1051_v6 = vmul.f32 %v1040_v51, %v1022_v57  ;;  %v1358_v31 = vrot.slane %v5213_v22, %v6457_v10 }
 0x17f   :  { %5185 = vmatmul.mubr.msk.bf16.vlgmr.msra.gmra.mrb[0].mxu0 %vm328_vm4, %v5544_v23  ;;  %5186 = vmatmul.mubr.msk.bf16.vlgmr.msra.gmra.mrb[0].mxu1 %vm328_vm4, %v5544_v23  ;;  %v1175_v41 = vpop.permute.xlu0 %1174  ;;  %v1177_v42 = vpop.permute.xlu1 %1176  ;;  %v1054_v48 = vpack.c.bf16 %v1050_v39, %v1050_v39  ;;  %v1056_v49 = vpack.c.bf16 %v1052_v40, %v1052_v40  ;;  %v1055_v17 = vpack.c.bf16 %v1051_v6, %v1051_v6 }
 0x180   :  { %812 = vmatpush1.bf16.msra.mxu1 %v763_v25  ;;  %769 = vmatpush1.bf16.msra.mxu0 %v757_v3  ;;  %v1066_v23 = vand.u32 %v1053_v16, %v6488_v35  ;;  %v1201_v3 = vrot.slane %v5207_v1, %v6461_v12  ;;  %v1185_v27 = vsel %vm1182_vm8, %v1175_v41, %v1177_v42 }
 0x181   :  { %800 = vmatprep.mubr.bf16.mxu0 %v9361_v4  ;;  %843 = vmatprep.mubr.bf16.mxu1 %v9361_v4  ;;  %v1069_v58 = vand.u32 %v1054_v48, %v6488_v35  ;;  %v1075_v59 = vand.u32 %v1056_v49, %v6488_v35  ;;  %v1072_v2 = vand.u32 %v1055_v17, %v6488_v35  ;;  %v5548_v17 = vld [vmem:[%s9511_s24 + $0x30] sm:$0xff]  }
 0x182   :  { %916 = vmatprep.subr.bf16.mxu0 %v908_v32  ;;  %959 = vmatprep.subr.bf16.mxu1 %v914_v33  ;;  %v1366_v32 = vrot.slane %v5213_v22, %v6463_v13  ;;  %v1210_v36 = vmul.f32 %v1193_v20, %v1185_v27  ;;  %v1354_v49 = vrot.slane %v5213_v22, %v6459_v11 }
 0x183   :  { %v1179_v54 = vpop.permute.xlu0 %1178  ;;  %v1181_v55 = vpop.permute.xlu1 %1180 }
 0x184   :  { %v1184_v62 = vsel %vm1182_vm8, %v1177_v42, %v1179_v54  ;;  %v1186_v63 = vsel %vm1182_vm8, %v1181_v55, %v1175_v41  ;;  %v1183_v28 = vsel %vm1182_vm8, %v1179_v54, %v1181_v55  ;;  %v1214_v42 = vpack.c.bf16 %v1210_v36, %v1210_v36 }
 0x185   :  { %v1211_v7 = vmul.f32 %v1197_v60, %v1184_v62  ;;  %v1213_v8 = vmul.f32 %v1205_v61, %v1186_v63  ;;  %v1212_v37 = vmul.f32 %v1201_v3, %v1183_v28 }
 0x186   :  { %v1227_v1 = vand.u32 %v1214_v42, %v6488_v35 }
 0x187   :  { %v1336_v14 = vpop.permute.xlu0 %1335  ;;  %v1338_v15 = vpop.permute.xlu1 %1337  ;;  %v1215_v18 = vpack.c.bf16 %v1211_v7, %v1211_v7  ;;  %v1217_v19 = vpack.c.bf16 %v1213_v8, %v1213_v8  ;;  %v1216_v46 = vpack.c.bf16 %v1212_v37, %v1212_v37 }
 0x188   :  { %v1346_v55 = vsel %vm1343_vm9, %v1336_v14, %v1338_v15 }
 0x189   :  { %v1230_v29 = vand.u32 %v1215_v18, %v6488_v35  ;;  %v1236_v30 = vand.u32 %v1217_v19, %v6488_v35  ;;  %v1233_v51 = vand.u32 %v1216_v46, %v6488_v35  ;;  %v1371_v63 = vmul.f32 %v1354_v49, %v1346_v55 }
 0x18b   :  { %5191 = vmatmul.mubr.msk.bf16.vlgmr.msra.gmra.mrb[0].mxu0 %vm328_vm4, %v5545_v0  ;;  %5192 = vmatmul.mubr.msk.bf16.vlgmr.msra.gmra.mrb[0].mxu1 %vm328_vm4, %v5545_v0  ;;  %v1340_v25 = vpop.permute.xlu0 %1339  ;;  %v1342_v26 = vpop.permute.xlu1 %1341  ;;  %v5219_v0 = vld [vmem:[%s9339_s13 + $0x20] ss:$8 sm:$0xf]  ;;  %v1375_v8 = vpack.c.bf16 %v1371_v63, %v1371_v63 }
 0x18c   :  { %917 = vmatpush1.bf16.msra.mxu0 %v905_v52  ;;  %960 = vmatpush1.bf16.msra.mxu1 %v911_v53  ;;  %v1345_v33 = vsel %vm1343_vm9, %v1338_v15, %v1340_v25  ;;  %v1347_v34 = vsel %vm1343_vm9, %v1342_v26, %v1336_v14  ;;  %v1362_v52 = vrot.slane %v5213_v22, %v6461_v12 }
 0x18d   :  { %948 = vmatprep.mubr.bf16.mxu0 %v9361_v4  ;;  %991 = vmatprep.mubr.bf16.mxu1 %v9361_v4  ;;  %v1372_v38 = vmul.f32 %v1358_v31, %v1345_v33  ;;  %v1374_v39 = vmul.f32 %v1366_v32, %v1347_v34  ;;  %v1344_v56 = vsel %vm1343_vm9, %v1340_v25, %v1342_v26  ;;  %v5550_v32 = vld [vmem:[%s9511_s24 + $0x40] sm:$0xff]  }
 0x18e   :  { %1077 = vmatprep.subr.bf16.mxu0 %v1069_v58  ;;  %1120 = vmatprep.subr.bf16.mxu1 %v1075_v59  ;;  %v1519_v59 = vrot.slane %v5219_v0, %v6457_v10  ;;  %v1527_v60 = vrot.slane %v5219_v0, %v6463_v13  ;;  %v1373_v5 = vmul.f32 %v1362_v52, %v1344_v56 }
 0x18f   :  { %v1497_v40 = vpop.permute.xlu0 %1496  ;;  %v1499_v41 = vpop.permute.xlu1 %1498  ;;  %v1376_v47 = vpack.c.bf16 %v1372_v38, %v1372_v38  ;;  %v1378_v48 = vpack.c.bf16 %v1374_v39, %v1374_v39  ;;  %v1388_v18 = vand.u32 %v1375_v8, %v6488_v35  ;;  %v1515_v20 = vrot.slane %v5219_v0, %v6459_v11 }
 0x190   :  { %v1377_v14 = vpack.c.bf16 %v1373_v5, %v1373_v5  ;;  %v1507_v22 = vsel %vm9377_vm10, %v1497_v40, %v1499_v41 }
 0x191   :  { %v1391_v57 = vand.u32 %v1376_v47, %v6488_v35  ;;  %v1397_v58 = vand.u32 %v1378_v48, %v6488_v35  ;;  %v1532_v25 = vmul.f32 %v1515_v20, %v1507_v22  ;;  %v6724_v47 = vld [vmem:[%s9339_s13 + $0x4] ss:$8 sm:$0xf] }
 0x192   :  { %v1394_v19 = vand.u32 %v1377_v14, %v6488_v35  ;;  %v1929_v52 = vrot.slane %v6724_v47, %v6459_v11  ;;  %v1937_v55 = vrot.slane %v6724_v47, %v6461_v12 }
 0x193   :  { %v1501_v53 = vpop.permute.xlu0 %1500  ;;  %v1503_v54 = vpop.permute.xlu1 %1502  ;;  %v1536_v27 = vpack.c.bf16 %v1532_v25, %v1532_v25  ;;  %v5551_v25 = vld [vmem:[%s9512_s4 + $0x4] ss:$8 sps:$4 sm:$0xff]  }
 0x194   :  { %v1506_v61 = vsel %vm9377_vm10, %v1499_v41, %v1501_v53  ;;  %v1508_v62 = vsel %vm9377_vm10, %v1503_v54, %v1497_v40 }
 0x195   :  { %v1533_v6 = vmul.f32 %v1519_v59, %v1506_v61  ;;  %v1535_v7 = vmul.f32 %v1527_v60, %v1508_v62 }
 0x197   :  { %5197 = vmatmul.mubr.msk.bf16.vlgmr.msra.gmra.mrb[0].mxu0 %vm328_vm4, %v5546_v21  ;;  %5198 = vmatmul.mubr.msk.bf16.vlgmr.msra.gmra.mrb[0].mxu1 %vm328_vm4, %v5546_v21  ;;  %v1537_v15 = vpack.c.bf16 %v1533_v6, %v1533_v6  ;;  %v1539_v16 = vpack.c.bf16 %v1535_v7, %v1535_v7  ;;  %v1523_v21 = vrot.slane %v5219_v0, %v6461_v12 }
 0x198   :  { %1078 = vmatpush1.bf16.msra.mxu0 %v1066_v23  ;;  %1121 = vmatpush1.bf16.msra.mxu1 %v1072_v2  ;;  %v1505_v23 = vsel %vm9377_vm10, %v1501_v53, %v1503_v54 }
 0x199   :  { %1152 = vmatprep.mubr.bf16.mxu1 %v9361_v4  ;;  %1109 = vmatprep.mubr.bf16.mxu0 %v9361_v4  ;;  %v1552_v2 = vand.u32 %v1537_v15, %v6488_v35  ;;  %v1558_v3 = vand.u32 %v1539_v16, %v6488_v35  ;;  %v1534_v26 = vmul.f32 %v1523_v21, %v1505_v23 }
 0x19a   :  { %1238 = vmatprep.subr.bf16.mxu0 %v1230_v29  ;;  %1281 = vmatprep.subr.bf16.mxu1 %v1236_v30  ;;  %v5549_v29 = vld [vmem:[%s9511_s24 + $0x38] sm:$0xff]   ;;  %v1549_v30 = vand.u32 %v1536_v27, %v6488_v35 }
 0x19b   :  { %v1538_v28 = vpack.c.bf16 %v1534_v26, %v1534_v26 }
 0x19d   :  { %v1555_v31 = vand.u32 %v1538_v28, %v6488_v35  ;;  %v2250_v28 = vld [vmem:[#allocation5] sm:$0xff] }
 0x1a3   :  { %5203 = vmatmul.mubr.msk.bf16.vlgmr.msra.gmra.mrb[0].mxu0 %vm328_vm4, %v5547_v50  ;;  %5204 = vmatmul.mubr.msk.bf16.vlgmr.msra.gmra.mrb[0].mxu1 %vm328_vm4, %v5547_v50 }
 0x1a4   :  { %1239 = vmatpush1.bf16.msra.mxu0 %v1227_v1  ;;  %1282 = vmatpush1.bf16.msra.mxu1 %v1233_v51  ;;  %v6715_v33 = vpop.permute.xlu0 %1658  ;;  %v6717_v35 = vpop.permute.xlu1 %1663 }
 0x1a5   :  { %1313 = vmatprep.mubr.bf16.mxu1 %v9361_v4  ;;  %1270 = vmatprep.mubr.bf16.mxu0 %v9361_v4 }
 0x1a6   :  { %1399 = vmatprep.subr.bf16.mxu0 %v1391_v57  ;;  %1442 = vmatprep.subr.bf16.mxu1 %v1397_v58 }
 0x1af   :  { %5209 = vmatmul.mubr.msk.bf16.vlgmr.msra.gmra.mrb[0].mxu0 %vm328_vm4, %v5548_v17  ;;  %5210 = vmatmul.mubr.msk.bf16.vlgmr.msra.gmra.mrb[0].mxu1 %vm328_vm4, %v5548_v17 }
 0x1b0   :  { %1400 = vmatpush1.bf16.msra.mxu0 %v1388_v18  ;;  %1443 = vmatpush1.bf16.msra.mxu1 %v1394_v19 }
 0x1b1   :  { %1431 = vmatprep.mubr.bf16.mxu0 %v9361_v4  ;;  %1474 = vmatprep.mubr.bf16.mxu1 %v9361_v4 }
 0x1b2   :  { %1560 = vmatprep.subr.bf16.mxu0 %v1552_v2  ;;  %1603 = vmatprep.subr.bf16.mxu1 %v1558_v3 }
 0x1bb   :  { %5215 = vmatmul.mubr.msk.bf16.vlgmr.msra.gmra.mrb[0].mxu0 %vm328_vm4, %v5549_v29  ;;  %5216 = vmatmul.mubr.msk.bf16.vlgmr.msra.gmra.mrb[0].mxu1 %vm328_vm4, %v5549_v29 }
 0x1bc   :  { %1561 = vmatpush1.bf16.msra.mxu0 %v1549_v30  ;;  %1604 = vmatpush1.bf16.msra.mxu1 %v1555_v31  ;;  %v2251_v31 = vld [vmem:[#allocation5 + $0x8] sm:$0xff] }
 0x1bd   :  { %1592 = vmatprep.mubr.bf16.mxu0 %v9361_v4  ;;  %1635 = vmatprep.mubr.bf16.mxu1 %v9361_v4 }
 0x1c7   :  { %5221 = vmatmul.mubr.msk.bf16.vlgmr.msra.gmra.mrb[0].mxu0 %vm328_vm4, %v5550_v32  ;;  %5222 = vmatmul.mubr.msk.bf16.vlgmr.msra.gmra.mrb[0].mxu1 %vm328_vm4, %v5550_v32  ;;  %v2252_v32 = vld [vmem:[#allocation5 + $0x10] sm:$0xff] }
 0x29a   :  { %v1637_v34 = vpop.f32.mrb[0].mxu1  ;;  %v1594_v36 = vpop.f32.mrb[0].mxu0 }
 0x29b   :  { %v1668_v37 = vadd.f32 %v6715_v33, %v1637_v34  ;;  %v1666_v38 = vadd.f32 %v6715_v33, %v1594_v36  ;;  %v1596_v39 = vpop.f32.mrb[1].mxu0  ;;  %v1639_v40 = vpop.f32.mrb[1].mxu1  ;;  %v2253_v34 = vld [vmem:[#allocation5 + $0x18] sm:$0xff]  ;;  %v2821_v36 = vld [vmem:[#allocation7] sm:$0xff] }
 0x29c   :  { %v1598_v41 = vpop.f32.mrb[2].mxu0  ;;  %v1641_v42 = vpop.f32.mrb[2].mxu1  ;;  %v1667_v6 = vadd.f32 %v6715_v33, %v1596_v39  ;;  %v1669_v8 = vadd.f32 %v6715_v33, %v1639_v40  ;;  %v2822_v39 = vld [vmem:[#allocation7 + $0x8] sm:$0xff]  ;;  %v2823_v40 = vld [vmem:[#allocation7 + $0x10] sm:$0xff] }
 0x29d   :  { %vm1674_vm11 = vcmp.ge.f32.partialorder %v1666_v38, 0.0  ;;  %v1682_v46 = vmul.f32 0.1, %v1666_v38  ;;  %v1684_v48 = vmul.f32 0.1, %v1668_v37  ;;  %v1670_v50 = vadd.f32 %v6717_v35, %v1598_v41  ;;  %v1600_v1 = vpop.f32.mrb[3].mxu0 }
 0x29e   :  { %v1672_v0 = vadd.f32 %v6717_v35, %v1641_v42  ;;  %v1643_v51 = vpop.f32.mrb[3].mxu1  ;;  %vm1676_vm12 = vcmp.ge.f32.partialorder %v1668_v37, 0.0  ;;  %v1683_v7 = vmul.f32 0.1, %v1667_v6  ;;  %v1671_v14 = vadd.f32 %v6717_v35, %v1600_v1 }
 0x29f   :  { %v1690_v49 = vsel %vm1674_vm11, %v1666_v38, %v1682_v46  ;;  %vm1678_vm13 = vcmp.ge.f32.partialorder %v1670_v50, 0.0  ;;  %v1686_v53 = vmul.f32 0.1, %v1670_v50  ;;  %v1692_v56 = vsel %vm1676_vm12, %v1668_v37, %v1684_v48  ;;  %v2824_v46 = vld [vmem:[#allocation7 + $0x18] sm:$0xff] }
 0x2a0   :  { %1698 = vrot.lane.b32.xlu1 %v1690_v49, %s6046_s30  ;;  %vm1680_vm14 = vcmp.ge.f32.partialorder %v1672_v0, 0.0  ;;  %v1688_v54 = vmul.f32 0.1, %v1672_v0  ;;  %v1946_v59 = vmul.f32 %v1929_v52, %v1690_v49  ;;  %v1948_v61 = vmul.f32 %v1937_v55, %v1692_v56 }
 0x2a1   :  { %v1694_v57 = vsel %vm1678_vm13, %v1670_v50, %v1686_v53  ;;  %vm1675_vm15 = vcmp.ge.f32.partialorder %v1667_v6, 0.0  ;;  %v1685_v16 = vmul.f32 0.1, %v1669_v8  ;;  %v1687_v17 = vmul.f32 0.1, %v1671_v14 }
 0x2a2   :  { %v1696_v58 = vsel %vm1680_vm14, %v1672_v0, %v1688_v54  ;;  %1700 = vrot.lane.b32.xlu0 %v1694_v57, %s6046_s30  ;;  %v1950_v60 = vmul.f32 %v1929_v52, %v1694_v57  ;;  %v6770_v15 = vsel %vm1675_vm15, %v1667_v6, %v1683_v7  ;;  %v1673_v18 = vadd.f32 %v6717_v35, %v1643_v51 }
 0x2a3   :  { %v1952_v62 = vmul.f32 %v1937_v55, %v1696_v58  ;;  %vm1677_vm1 = vcmp.ge.f32.partialorder %v1669_v8, 0.0  ;;  %vm1679_vm3 = vcmp.ge.f32.partialorder %v1671_v14, 0.0  ;;  %vm2292_vm11 = vcmask 130048  }
 0x2a4   :  { %1706 = vrot.lane.b32.xlu1 %v1692_v56, %s6046_s30  ;;  %v6735_v63 = vpack.c.bf16 %v1950_v60, %v1946_v59  ;;  %v6776_v19 = vsel %vm1677_vm1, %v1669_v8, %v1685_v16  ;;  %v6778_v20 = vsel %vm1679_vm3, %v1671_v14, %v1687_v17  ;;  %v1689_v21 = vmul.f32 0.1, %v1673_v18  ;;  %5235 = vmatprep.mubr.msk.bf16.mxu0 %vm2292_vm11, %v5551_v25 }
 0x2a5   :  { %v6739_v5 = vpack.c.bf16 %v1952_v62, %v1948_v61  ;;  %vm1681_vm4 = vcmp.ge.f32.partialorder %v1673_v18, 0.0  ;;  %5237 = vmatprep.mubr.msk.bf16.mxu1 %vm2292_vm11, %v5551_v25 }
 0x2a6   :  { %1708 = vrot.lane.b32.xlu0 %v1696_v58, %s6046_s30  ;;  %v6784_v22 = vsel %vm1681_vm4, %v1673_v18, %v1689_v21  ;;  %v5223_v21 = vld [vmem:[%s9339_s13 + $0x1] ss:$8 sm:$0xf] }
 0x2a8   :  { %1738 = vrot.lane.b32.xlu1 %v1690_v49, %s6044_s18 }
 0x2aa   :  { %1740 = vrot.lane.b32.xlu0 %v1694_v57, %s6044_s18 }
 0x2ac   :  { %1746 = vrot.lane.b32.xlu1 %v1692_v56, %s6044_s18 }
 0x2ae   :  { %1748 = vrot.lane.b32.xlu0 %v1696_v58, %s6044_s18 }
 0x2b0   :  { %1800 = vrot.lane.b32.xlu1 %v1690_v49, %s6047_s3 }
 0x2b2   :  { %1802 = vrot.lane.b32.xlu0 %v1694_v57, %s6047_s3 }
 0x2b4   :  { %1808 = vrot.lane.b32.xlu1 %v1692_v56, %s6047_s3 }
 0x2b6   :  { %1810 = vrot.lane.b32.xlu0 %v1696_v58, %s6047_s3 }
 0x2b8   :  { %1862 = vrot.lane.b32.xlu1 %v1690_v49, %s6048_s29 }
 0x2ba   :  { %1864 = vrot.lane.b32.xlu0 %v1694_v57, %s6048_s29 }
 0x2bc   :  { %1870 = vrot.lane.b32.xlu1 %v1692_v56, %s6048_s29 }
 0x2be   :  { %1872 = vrot.lane.b32.xlu0 %v1696_v58, %s6048_s29 }
 0x2c0   :  { %1962 = vrot.lane.b32.xlu1 %v1690_v49, %s6049_s26 }
 0x2c2   :  { %1964 = vrot.lane.b32.xlu0 %v1694_v57, %s6049_s26 }
 0x2c4   :  { %1970 = vrot.lane.b32.xlu1 %v1692_v56, %s6049_s26 }
 0x2c6   :  { %1972 = vrot.lane.b32.xlu0 %v1696_v58, %s6049_s26 }
 0x2c8   :  { %2024 = vrot.lane.b32.xlu1 %v1690_v49, %s6050_s11 }
 0x2ca   :  { %2026 = vrot.lane.b32.xlu0 %v1694_v57, %s6050_s11 }
 0x2cc   :  { %2032 = vrot.lane.b32.xlu1 %v1692_v56, %s6050_s11 }
 0x2ce   :  { %2034 = vrot.lane.b32.xlu0 %v1696_v58, %s6050_s11 }
 0x2d0   :  { %2086 = vrot.lane.b32.xlu1 %v1690_v49, %s6051_s28 }
 0x2d2   :  { %2088 = vrot.lane.b32.xlu0 %v1694_v57, %s6051_s28 }
 0x2d4   :  { %2094 = vrot.lane.b32.xlu1 %v1692_v56, %s6051_s28 }
 0x2d6   :  { %2096 = vrot.lane.b32.xlu0 %v1696_v58, %s6051_s28 }
 0x2d8   :  { %2148 = vrot.lane.b32.xlu1 %v1690_v49, %s6052_s23 }
 0x2da   :  { %2150 = vrot.lane.b32.xlu0 %v1694_v57, %s6052_s23 }
 0x2dc   :  { %2156 = vrot.lane.b32.xlu1 %v1692_v56, %s6052_s23 }
 0x2de   :  { %2158 = vrot.lane.b32.xlu0 %v1696_v58, %s6052_s23 }
 0x2e0   :  { %1702 = vrot.lane.b32.xlu1 %v6770_v15, %s6046_s30 }
 0x2e2   :  { %1704 = vrot.lane.b32.xlu0 %v6778_v20, %s6046_s30 }
 0x2e4   :  { %1710 = vrot.lane.b32.xlu1 %v6776_v19, %s6046_s30 }
 0x2e6   :  { %1712 = vrot.lane.b32.xlu0 %v6784_v22, %s6046_s30 }
 0x2e8   :  { %1742 = vrot.lane.b32.xlu1 %v6770_v15, %s6044_s18 }
 0x2ea   :  { %1744 = vrot.lane.b32.xlu0 %v6778_v20, %s6044_s18 }
 0x2ec   :  { %1750 = vrot.lane.b32.xlu1 %v6776_v19, %s6044_s18 }
 0x2ee   :  { %1752 = vrot.lane.b32.xlu0 %v6784_v22, %s6044_s18 }
 0x2f0   :  { %1804 = vrot.lane.b32.xlu1 %v6770_v15, %s6047_s3 }
 0x2f2   :  { %1806 = vrot.lane.b32.xlu0 %v6778_v20, %s6047_s3 }
 0x2f4   :  { %1812 = vrot.lane.b32.xlu1 %v6776_v19, %s6047_s3 }
 0x2f6   :  { %1814 = vrot.lane.b32.xlu0 %v6784_v22, %s6047_s3 }
 0x2f8   :  { %1866 = vrot.lane.b32.xlu1 %v6770_v15, %s6048_s29 }
 0x2fa   :  { %1868 = vrot.lane.b32.xlu0 %v6778_v20, %s6048_s29 }
 0x2fc   :  { %1874 = vrot.lane.b32.xlu1 %v6776_v19, %s6048_s29 }
 0x2fe   :  { %1876 = vrot.lane.b32.xlu0 %v6784_v22, %s6048_s29 }
 0x300   :  { %1966 = vrot.lane.b32.xlu1 %v6770_v15, %s6049_s26 }
 0x302   :  { %1968 = vrot.lane.b32.xlu0 %v6778_v20, %s6049_s26 }
 0x304   :  { %1974 = vrot.lane.b32.xlu1 %v6776_v19, %s6049_s26 }
 0x306   :  { %1976 = vrot.lane.b32.xlu0 %v6784_v22, %s6049_s26 }
 0x308   :  { %2028 = vrot.lane.b32.xlu1 %v6770_v15, %s6050_s11 }
 0x30a   :  { %2030 = vrot.lane.b32.xlu0 %v6778_v20, %s6050_s11 }
 0x30c   :  { %2036 = vrot.lane.b32.xlu1 %v6776_v19, %s6050_s11 }
 0x30e   :  { %2038 = vrot.lane.b32.xlu0 %v6784_v22, %s6050_s11 }
 0x310   :  { %2090 = vrot.lane.b32.xlu1 %v6770_v15, %s6051_s28 }
 0x312   :  { %v6830_v23 = vpop.permute.xlu1 %1698  ;;  %2092 = vrot.lane.b32.xlu0 %v6778_v20, %s6051_s28 }
 0x314   :  { %2098 = vrot.lane.b32.xlu1 %v6776_v19, %s6051_s28  ;;  %v6836_v2 = vpop.permute.xlu0 %1700 }
 0x316   :  { %v6838_v3 = vpop.permute.xlu1 %1706  ;;  %2100 = vrot.lane.b32.xlu0 %v6784_v22, %s6051_s28 }
 0x318   :  { %2152 = vrot.lane.b32.xlu1 %v6770_v15, %s6052_s23  ;;  %v6849_v26 = vpop.permute.xlu0 %1708 }
 0x31a   :  { %v6851_v27 = vpop.permute.xlu1 %1738  ;;  %2154 = vrot.lane.b32.xlu0 %v6778_v20, %s6052_s23 }
 0x31c   :  { %2160 = vrot.lane.b32.xlu1 %v6776_v19, %s6052_s23  ;;  %v6857_v29 = vpop.permute.xlu0 %1740 }
 0x31e   :  { %v6859_v30 = vpop.permute.xlu1 %1746  ;;  %2162 = vrot.lane.b32.xlu0 %v6784_v22, %s6052_s23 }
 0x320   :  { %2256 = vperm.xlu1 %5539, %v2250_v28   ;;  %v6863_v33 = vpop.permute.xlu0 %1748 }
 0x322   :  { %v6865_v35 = vpop.permute.xlu1 %1800  ;;  %2261 = vperm.xlu0 %5538, %v2251_v31  }
 0x324   :  { %2266 = vperm.xlu1 %5539, %v2252_v32   ;;  %v6867_v37 = vpop.permute.xlu0 %1802 }
 0x326   :  { %v6869_v38 = vpop.permute.xlu1 %1808  ;;  %2271 = vperm.xlu0 %5538, %v2253_v34  }
 0x328   :  { %2827 = vperm.xlu1 %5539, %v2821_v36   ;;  %v6871_v41 = vpop.permute.xlu0 %1810 }
 0x32a   :  { %v6873_v42 = vpop.permute.xlu1 %1862  ;;  %2832 = vperm.xlu0 %5538, %v2822_v39   ;;  %v1771_v39 = vrot.slane %v5223_v21, %v6457_v10 }
 0x32c   :  { %2837 = vperm.xlu1 %5539, %v2823_v40   ;;  %v6875_v48 = vpop.permute.xlu0 %1864 }
 0x32e   :  { %v6877_v49 = vpop.permute.xlu1 %1870  ;;  %2842 = vperm.xlu0 %5538, %v2824_v46  }
 0x330   :  { %v6879_v50 = vpop.permute.xlu0 %1872 }
 0x332   :  { %v6881_v0 = vpop.permute.xlu1 %1962 }
 0x334   :  { %v6883_v1 = vpop.permute.xlu0 %1964 }
 0x336   :  { %v6885_v51 = vpop.permute.xlu1 %1970 }
 0x338   :  { %v6887_v52 = vpop.permute.xlu0 %1972 }
 0x33a   :  { %v6889_v53 = vpop.permute.xlu1 %2024 }
 0x33c   :  { %v6891_v54 = vpop.permute.xlu0 %2026 }
 0x33e   :  { %v6893_v55 = vpop.permute.xlu1 %2032 }
 0x340   :  { %v6895_v56 = vpop.permute.xlu0 %2034 }
 0x342   :  { %v6897_v57 = vpop.permute.xlu1 %2086 }
 0x344   :  { %v6899_v58 = vpop.permute.xlu0 %2088 }
 0x346   :  { %v6901_v59 = vpop.permute.xlu1 %2094 }
 0x348   :  { %v6903_v60 = vpop.permute.xlu0 %2096 }
 0x34a   :  { %v6905_v61 = vpop.permute.xlu1 %2148 }
 0x34c   :  { %v6907_v62 = vpop.permute.xlu0 %2150 }
 0x34e   :  { %v6909_v6 = vpop.permute.xlu1 %2156 }
 0x350   :  { %v6911_v7 = vpop.permute.xlu0 %2158 }
 0x352   :  { %v1703_v8 = vpop.permute.xlu1 %1702 }
 0x353   :  { %v1718_v14 = vsel %vm241_vm2, %v6830_v23, %v1703_v8 }
 0x354   :  { %v1705_v16 = vpop.permute.xlu0 %1704  ;;  %v1723_v25 = vmul.f32 %v1718_v14, %v6478_v24  ;;  %v1716_v14 = vsel %vm241_vm2, %v1703_v8, %v6838_v3 }
 0x355   :  { %v1719_v18 = vsel %vm241_vm2, %v6836_v2, %v1705_v16  ;;  %v1717_v28 = vsel %vm241_vm2, %v1705_v16, %v6849_v26 }
 0x356   :  { %v1711_v17 = vpop.permute.xlu1 %1710  ;;  %v1727_v31 = vmul.f32 %v1719_v18, %v6478_v24  ;;  %v1728_v24 = vmul.f32 %v1717_v28, %v6496_v44 }
 0x357   :  { %v1714_v32 = vsel %vm241_vm2, %v6838_v3, %v1711_v17  ;;  %v1720_v34 = vsel %vm241_vm2, %v1711_v17, %v6830_v23 }
 0x358   :  { %v1713_v36 = vpop.permute.xlu0 %1712  ;;  %v6934_v46 = vpack.c.bf16 %v1727_v31, %v1723_v25  ;;  %v1722_v17 = vmul.f32 %v1720_v34, %v6493_v43  ;;  %v1725_v18 = vmul.f32 %v1714_v32, %v6499_v45  ;;  %v1779_v32 = vrot.slane %v5223_v21, %v6463_v13  ;;  %v5224_v34 = vld [vmem:[%s9339_s13 + $0x2] ss:$8 sm:$0xf] }
 0x359   :  { %v1715_v16 = vsel %vm241_vm2, %v6849_v26, %v1713_v36  ;;  %v1721_v23 = vsel %vm241_vm2, %v1713_v36, %v6836_v2  ;;  %v1724_v26 = vmul.f32 %v1716_v14, %v6496_v44 }
 0x35a   :  { %v1743_v40 = vpop.permute.xlu1 %1742  ;;  %v1726_v25 = vmul.f32 %v1721_v23, %v6493_v43  ;;  %v1729_v31 = vmul.f32 %v1715_v16, %v6499_v45  ;;  %2299 = vmatprep.subr.bf16.mxu0 %v6934_v46  ;;  %v1767_v45 = vrot.slane %v5223_v21, %v6459_v11 }
 0x35b   :  { %v1758_v3 = vsel %vm9378_vm0, %v6851_v27, %v1743_v40  ;;  %v6967_v16 = vpack.c.bf16 %v1728_v24, %v1724_v26 }
 0x35c   :  { %v6955_v8 = vpack.c.bf16 %v1726_v25, %v1722_v17  ;;  %v1745_v28 = vpop.permute.xlu0 %1744  ;;  %v6957_v36 = vpack.c.bf16 %v1729_v31, %v1725_v18  ;;  %v1785_v44 = vmul.f32 %v1771_v39, %v1758_v3  ;;  %v1775_v17 = vrot.slane %v5223_v21, %v6461_v12 }
 0x35d   :  { %v1759_v43 = vsel %vm9378_vm0, %v6857_v29, %v1745_v28  ;;  %9513 = vst [vmem:[#allocation31_spill] sm:$0xff] %v6967_v16  ;;  %v1757_v14 = vsel %vm9378_vm0, %v1745_v28, %v6863_v33  ;;  %v1833_v31 = vrot.slane %v5224_v34, %v6457_v10  ;;  %v1756_v21 = vsel %vm9378_vm0, %v1743_v40, %v6859_v30 }
 0x35e   :  { %v1751_v2 = vpop.permute.xlu1 %1750  ;;  %v1789_v23 = vmul.f32 %v1771_v39, %v1759_v43  ;;  %2300 = vmatpush1.bf16.msra.mxu0 %v6955_v8  ;;  %2352 = vmatprep.subr.bf16.mxu1 %v6957_v36  ;;  %v1790_v26 = vmul.f32 %v1775_v17, %v1757_v14 }
 0x35f   :  { %v1754_v18 = vsel %vm9378_vm0, %v6859_v30, %v1751_v2  ;;  %v1760_v25 = vsel %vm9378_vm0, %v1751_v2, %v6851_v27  ;;  %2353 = vmatpush1.bf16.msra.mxu1 %v6967_v16  ;;  %v1786_v30 = vmul.f32 %v1775_v17, %v1756_v21 }
 0x360   :  { %v1753_v24 = vpop.permute.xlu0 %1752  ;;  %v6983_v3 = vpack.c.bf16 %v1789_v23, %v1785_v44  ;;  %v1784_v2 = vmul.f32 %v1767_v45, %v1760_v25  ;;  %v1787_v43 = vmul.f32 %v1779_v32, %v1754_v18  ;;  %v5225_v18 = vld [vmem:[%s9339_s13 + $0x3] ss:$8 sm:$0xf] }
 0x361   :  { %v1755_v28 = vsel %vm9378_vm0, %v6863_v33, %v1753_v24  ;;  %v1761_v27 = vsel %vm9378_vm0, %v1753_v24, %v6857_v29  ;;  %v7010_v25 = vpack.c.bf16 %v1790_v26, %v1786_v30  ;;  %v1837_v24 = vrot.slane %v5224_v34, %v6461_v12 }
 0x362   :  { %v1805_v39 = vpop.permute.xlu1 %1804  ;;  %v1788_v4 = vmul.f32 %v1767_v45, %v1761_v27  ;;  %v1791_v16 = vmul.f32 %v1779_v32, %v1755_v28  ;;  %2301 = vmatprep.subr.bf16.mxu0 %v6983_v3  ;;  %v1829_v45 = vrot.slane %v5224_v34, %v6459_v11  ;;  %v1841_v32 = vrot.slane %v5224_v34, %v6463_v13 }
 0x363   :  { %v1820_v44 = vsel %vm551_vm5, %v6865_v35, %v1805_v39  ;;  %v1895_v27 = vrot.slane %v5225_v18, %v6457_v10  ;;  %v1818_v34 = vsel %vm551_vm5, %v1805_v39, %v6869_v38 }
 0x364   :  { %v6998_v40 = vpack.c.bf16 %v1788_v4, %v1784_v2  ;;  %v1807_v14 = vpop.permute.xlu0 %1806  ;;  %v7000_v33 = vpack.c.bf16 %v1791_v16, %v1787_v43  ;;  %v1847_v4 = vmul.f32 %v1833_v31, %v1820_v44 }
 0x365   :  { %v1821_v29 = vsel %vm551_vm5, %v6867_v37, %v1807_v14  ;;  %v1819_v16 = vsel %vm551_vm5, %v1807_v14, %v6871_v41 }
 0x366   :  { %v1813_v23 = vpop.permute.xlu1 %1812  ;;  %v1851_v17 = vmul.f32 %v1833_v31, %v1821_v29  ;;  %2302 = vmatpush1.bf16.msra.mxu0 %v6998_v40  ;;  %2354 = vmatprep.subr.bf16.mxu1 %v7000_v33  ;;  %v1852_v43 = vmul.f32 %v1837_v24, %v1819_v16 }
 0x367   :  { %v1816_v21 = vsel %vm551_vm5, %v6869_v38, %v1813_v23  ;;  %v1822_v28 = vsel %vm551_vm5, %v1813_v23, %v6865_v35  ;;  %2355 = vmatpush1.bf16.msra.mxu1 %v7010_v25  ;;  %v1848_v38 = vmul.f32 %v1837_v24, %v1818_v34  ;;  %v5227_v24 = vld [vmem:[%s9339_s13 + $0x5] ss:$8 sm:$0xf] }
 0x368   :  { %v1815_v26 = vpop.permute.xlu0 %1814  ;;  %v7026_v2 = vpack.c.bf16 %v1851_v17, %v1847_v4  ;;  %v1846_v30 = vmul.f32 %v1829_v45, %v1822_v28  ;;  %v1849_v14 = vmul.f32 %v1841_v32, %v1816_v21  ;;  %v1903_v21 = vrot.slane %v5225_v18, %v6463_v13 }
 0x369   :  { %v1817_v44 = vsel %vm551_vm5, %v6871_v41, %v1815_v26  ;;  %v1823_v35 = vsel %vm551_vm5, %v1815_v26, %v6867_v37  ;;  %v1933_v37 = vrot.slane %v6724_v47, %v6457_v10  ;;  %v1941_v28 = vrot.slane %v6724_v47, %v6463_v13 }
 0x36a   :  { %v1867_v31 = vpop.permute.xlu1 %1866  ;;  %v1850_v23 = vmul.f32 %v1829_v45, %v1823_v35  ;;  %v1853_v29 = vmul.f32 %v1841_v32, %v1817_v44  ;;  %2303 = vmatprep.subr.bf16.mxu0 %v7026_v2  ;;  %v1891_v32 = vrot.slane %v5225_v18, %v6459_v11  ;;  %v7057_v26 = vpack.c.bf16 %v1852_v43, %v1848_v38 }
 0x36b   :  { %v1882_v4 = vsel %vm712_vm6, %v6873_v42, %v1867_v31  ;;  %v1951_v43 = vmul.f32 %v1933_v37, %v6778_v20  ;;  %v1880_v38 = vsel %vm712_vm6, %v1867_v31, %v6877_v49  ;;  %v1949_v31 = vmul.f32 %v1941_v28, %v6776_v19 }
 0x36c   :  { %v7041_v39 = vpack.c.bf16 %v1850_v23, %v1846_v30  ;;  %v1869_v16 = vpop.permute.xlu0 %1868  ;;  %v7043_v41 = vpack.c.bf16 %v1853_v29, %v1849_v14  ;;  %9514 = vst [vmem:[#allocation32_spill] sm:$0xff] %v7057_v26  ;;  %v1909_v34 = vmul.f32 %v1895_v27, %v1882_v4  ;;  %v1899_v30 = vrot.slane %v5225_v18, %v6461_v12 }
 0x36d   :  { %v1883_v45 = vsel %vm712_vm6, %v6875_v48, %v1869_v16  ;;  %v1881_v44 = vsel %vm712_vm6, %v1869_v16, %v6879_v50  ;;  %v1947_v18 = vmul.f32 %v1933_v37, %v6770_v15  ;;  %v1999_v19 = vrot.slane %v5227_v24, %v6461_v12 }
 0x36e   :  { %v1875_v17 = vpop.permute.xlu1 %1874  ;;  %v1913_v35 = vmul.f32 %v1895_v27, %v1883_v45  ;;  %2304 = vmatpush1.bf16.msra.mxu0 %v7041_v39  ;;  %2356 = vmatprep.subr.bf16.mxu1 %v7043_v41  ;;  %v1995_v27 = vrot.slane %v5227_v24, %v6457_v10  ;;  %v1914_v16 = vmul.f32 %v1899_v30, %v1881_v44 }
 0x36f   :  { %v1878_v14 = vsel %vm712_vm6, %v6877_v49, %v1875_v17  ;;  %v1884_v47 = vsel %vm712_vm6, %v1875_v17, %v6873_v42  ;;  %2357 = vmatpush1.bf16.msra.mxu1 %v7057_v26  ;;  %v7090_v49 = vpack.c.bf16 %v1951_v43, %v1947_v18  ;;  %v1910_v37 = vmul.f32 %v1899_v30, %v1880_v38 }
 0x370   :  { %v1877_v23 = vpop.permute.xlu0 %1876  ;;  %v7074_v4 = vpack.c.bf16 %v1913_v35, %v1909_v34  ;;  %v1908_v17 = vmul.f32 %v1891_v32, %v1884_v47  ;;  %v1911_v45 = vmul.f32 %v1903_v21, %v1878_v14 }
 0x371   :  { %v1879_v42 = vsel %vm712_vm6, %v6879_v50, %v1877_v23  ;;  %v1885_v20 = vsel %vm712_vm6, %v1877_v23, %v6875_v48  ;;  %v1953_v50 = vmul.f32 %v1941_v28, %v6784_v22  ;;  %v1991_v48 = vrot.slane %v5227_v24, %v6459_v11  ;;  %v5228_v28 = vld [vmem:[%s9339_s13 + $0x6] ss:$8 sm:$0xf] }
 0x372   :  { %v1967_v29 = vpop.permute.xlu1 %1966  ;;  %v1912_v26 = vmul.f32 %v1891_v32, %v1885_v20  ;;  %v1915_v34 = vmul.f32 %v1903_v21, %v1879_v42  ;;  %2305 = vmatprep.subr.bf16.mxu0 %v7074_v4  ;;  %v2003_v22 = vrot.slane %v5227_v24, %v6463_v13 }
 0x373   :  { %v1980_v15 = vsel %vm1021_vm7, %v1967_v29, %v6885_v51  ;;  %v1982_v30 = vsel %vm1021_vm7, %v6881_v0, %v1967_v29  ;;  %v7124_v38 = vpack.c.bf16 %v1953_v50, %v1949_v31  ;;  %v2053_v29 = vrot.slane %v5228_v28, %v6459_v11 }
 0x374   :  { %v7094_v44 = vpack.c.bf16 %v1912_v26, %v1908_v17  ;;  %v1969_v35 = vpop.permute.xlu0 %1968  ;;  %v7097_v21 = vpack.c.bf16 %v1915_v34, %v1911_v45  ;;  %v7110_v26 = vpack.c.bf16 %v1914_v16, %v1910_v37  ;;  %v2009_v43 = vmul.f32 %v1995_v27, %v1980_v15 }
 0x375   :  { %v1981_v14 = vsel %vm1021_vm7, %v1969_v35, %v6887_v52  ;;  %v1983_v47 = vsel %vm1021_vm7, %v6883_v1, %v1969_v35  ;;  %v2057_v45 = vrot.slane %v5228_v28, %v6457_v10 }
 0x376   :  { %v1975_v32 = vpop.permute.xlu1 %1974  ;;  %v2013_v23 = vmul.f32 %v1995_v27, %v1981_v14  ;;  %2306 = vmatpush1.bf16.msra.mxu0 %v7094_v44  ;;  %2358 = vmatprep.subr.bf16.mxu1 %v7097_v21  ;;  %v2012_v16 = vmul.f32 %v1991_v48, %v1983_v47 }
 0x377   :  { %v1978_v18 = vsel %vm1021_vm7, %v6885_v51, %v1975_v32  ;;  %v1984_v24 = vsel %vm1021_vm7, %v1975_v32, %v6881_v0  ;;  %2307 = vmatprep.subr.bf16.mxu0 %v7090_v49  ;;  %2359 = vmatpush1.bf16.msra.mxu1 %v7110_v26  ;;  %v2008_v51 = vmul.f32 %v1991_v48, %v1982_v30 }
 0x378   :  { %v1977_v27 = vpop.permute.xlu0 %1976  ;;  %v7128_v20 = vpack.c.bf16 %v2013_v23, %v2009_v43  ;;  %2360 = vmatprep.subr.bf16.mxu1 %v7124_v38  ;;  %v2010_v34 = vmul.f32 %v1999_v19, %v1978_v18  ;;  %v2011_v15 = vmul.f32 %v2003_v22, %v1984_v24  ;;  %v2065_v30 = vrot.slane %v5228_v28, %v6463_v13 }
 0x379   :  { %v1979_v0 = vsel %vm1021_vm7, %v6887_v52, %v1977_v27  ;;  %v1985_v17 = vsel %vm1021_vm7, %v1977_v27, %v6883_v1  ;;  %v7146_v48 = vpack.c.bf16 %v2012_v16, %v2008_v51  ;;  %v5229_v16 = vld [vmem:[%s9339_s13 + $0x7] ss:$8 sm:$0xf] }
 0x37a   :  { %v2029_v42 = vpop.permute.xlu1 %2028  ;;  %v2014_v31 = vmul.f32 %v1999_v19, %v1979_v0  ;;  %v2015_v50 = vmul.f32 %v2003_v22, %v1985_v17  ;;  %2308 = vmatpush1.bf16.msra.mxu0 %v6735_v63  ;;  %v2061_v22 = vrot.slane %v5228_v28, %v6461_v12 }
 0x37b   :  { %v2042_v37 = vsel %vm1182_vm8, %v2029_v42, %v6893_v55  ;;  %v2044_v52 = vsel %vm1182_vm8, %v6889_v53, %v2029_v42  ;;  %2309 = vmatprep.subr.bf16.mxu0 %v7128_v20  ;;  %2361 = vmatpush1.bf16.msra.mxu1 %v6739_v5 }
 0x37c   :  { %v7148_v1 = vpack.c.bf16 %v2014_v31, %v2010_v34  ;;  %v2031_v35 = vpop.permute.xlu0 %2030  ;;  %v7151_v14 = vpack.c.bf16 %v2015_v50, %v2011_v15  ;;  %v2070_v43 = vmul.f32 %v2053_v29, %v2044_v52  ;;  %v2071_v23 = vmul.f32 %v2057_v45, %v2042_v37 }
 0x37d   :  { %v2043_v47 = vsel %vm1182_vm8, %v2031_v35, %v6895_v56  ;;  %v2045_v19 = vsel %vm1182_vm8, %v6891_v54, %v2031_v35 }
 0x37e   :  { %v2037_v32 = vpop.permute.xlu1 %2036  ;;  %v2074_v18 = vmul.f32 %v2053_v29, %v2045_v19  ;;  %v2075_v24 = vmul.f32 %v2057_v45, %v2043_v47  ;;  %2310 = vmatpush1.bf16.msra.mxu0 %v7146_v48  ;;  %2362 = vmatprep.subr.bf16.mxu1 %v7151_v14  ;;  %v2119_v45 = vrot.slane %v5229_v16, %v6457_v10 }
 0x37f   :  { %v2040_v27 = vsel %vm1182_vm8, %v6893_v55, %v2037_v32  ;;  %v2046_v42 = vsel %vm1182_vm8, %v2037_v32, %v6889_v53  ;;  %2363 = vmatpush1.bf16.msra.mxu1 %v7148_v1  ;;  %v2115_v53 = vrot.slane %v5229_v16, %v6459_v11 }
 0x380   :  { %v7172_v28 = vpack.c.bf16 %v2074_v18, %v2070_v43  ;;  %v2039_v29 = vpop.permute.xlu0 %2038  ;;  %v7175_v0 = vpack.c.bf16 %v2075_v24, %v2071_v23  ;;  %v2072_v34 = vmul.f32 %v2061_v22, %v2040_v27  ;;  %v2073_v15 = vmul.f32 %v2065_v30, %v2046_v42  ;;  %v5230_v27 = vld [vmem:[%s9339_s13 + $0x20] ss:$8 sm:$0xf] }
 0x381   :  { %v2041_v17 = vsel %vm1182_vm8, %v6895_v56, %v2039_v29  ;;  %v2047_v55 = vsel %vm1182_vm8, %v2039_v29, %v6891_v54 }
 0x382   :  { %v2091_v51 = vpop.permute.xlu1 %2090  ;;  %v2076_v31 = vmul.f32 %v2061_v22, %v2041_v17  ;;  %v2077_v50 = vmul.f32 %v2065_v30, %v2047_v55  ;;  %2311 = vmatprep.subr.bf16.mxu0 %v7175_v0  ;;  %v2123_v22 = vrot.slane %v5229_v16, %v6461_v12  ;;  %v2127_v30 = vrot.slane %v5229_v16, %v6463_v13 }
 0x383   :  { %v2104_v37 = vsel %vm1343_vm9, %v2091_v51, %v6901_v59  ;;  %v2106_v56 = vsel %vm1343_vm9, %v6897_v57, %v2091_v51  ;;  %2312 = vmatpush1.bf16.msra.mxu0 %v7172_v28 }
 0x384   :  { %v7193_v54 = vpack.c.bf16 %v2076_v31, %v2072_v34  ;;  %v2093_v52 = vpop.permute.xlu0 %2092  ;;  %v7195_v32 = vpack.c.bf16 %v2077_v50, %v2073_v15  ;;  %v2132_v43 = vmul.f32 %v2115_v53, %v2106_v56  ;;  %v2133_v23 = vmul.f32 %v2119_v45, %v2104_v37 }
 0x385   :  { %v2105_v47 = vsel %vm1343_vm9, %v2093_v52, %v6903_v60  ;;  %v2107_v19 = vsel %vm1343_vm9, %v6899_v58, %v2093_v52 }
 0x386   :  { %v2099_v35 = vpop.permute.xlu1 %2098  ;;  %v2136_v18 = vmul.f32 %v2115_v53, %v2107_v19  ;;  %v2137_v24 = vmul.f32 %v2119_v45, %v2105_v47  ;;  %2364 = vmatprep.subr.bf16.mxu1 %v7195_v32  ;;  %v2177_v45 = vrot.slane %v5230_v27, %v6459_v11 }
 0x387   :  { %v2102_v42 = vsel %vm1343_vm9, %v6901_v59, %v2099_v35  ;;  %v2108_v29 = vsel %vm1343_vm9, %v2099_v35, %v6897_v57  ;;  %2365 = vmatpush1.bf16.msra.mxu1 %v7193_v54  ;;  %v2181_v57 = vrot.slane %v5230_v27, %v6457_v10 }
 0x388   :  { %v7216_v16 = vpack.c.bf16 %v2136_v18, %v2132_v43  ;;  %v2101_v51 = vpop.permute.xlu0 %2100  ;;  %v7218_v55 = vpack.c.bf16 %v2137_v24, %v2133_v23  ;;  %v2134_v34 = vmul.f32 %v2123_v22, %v2102_v42  ;;  %v2135_v15 = vmul.f32 %v2127_v30, %v2108_v29 }
 0x389   :  { %v2103_v53 = vsel %vm1343_vm9, %v6903_v60, %v2101_v51  ;;  %v2109_v59 = vsel %vm1343_vm9, %v2101_v51, %v6899_v58 }
 0x38a   :  { %v2153_v17 = vpop.permute.xlu1 %2152  ;;  %v2138_v31 = vmul.f32 %v2123_v22, %v2103_v53  ;;  %v2139_v50 = vmul.f32 %v2127_v30, %v2109_v59  ;;  %2313 = vmatprep.subr.bf16.mxu0 %v7218_v55  ;;  %v2185_v22 = vrot.slane %v5230_v27, %v6461_v12  ;;  %v2189_v30 = vrot.slane %v5230_v27, %v6463_v13  ;;  %v5557_v53 = vld [vmem:[%s9340_s14 + $0x40] sm:$0xff]  }
 0x38b   :  { %v2166_v37 = vsel %vm9377_vm10, %v2153_v17, %v6909_v6  ;;  %v2168_v60 = vsel %vm9377_vm10, %v6905_v61, %v2153_v17  ;;  %2314 = vmatpush1.bf16.msra.mxu0 %v7216_v16 }
 0x38c   :  { %v7236_v58 = vpack.c.bf16 %v2138_v31, %v2134_v34  ;;  %v2155_v56 = vpop.permute.xlu0 %2154  ;;  %v7238_v35 = vpack.c.bf16 %v2139_v50, %v2135_v15  ;;  %v2194_v43 = vmul.f32 %v2177_v45, %v2168_v60  ;;  %v2195_v23 = vmul.f32 %v2181_v57, %v2166_v37  ;;  %v5553_v15 = vld [vmem:[%s9512_s4] ss:$8 sps:$4 sm:$0xff]  }
 0x38d   :  { %v2167_v47 = vsel %vm9377_vm10, %v2155_v56, %v6911_v7  ;;  %v2169_v19 = vsel %vm9377_vm10, %v6907_v62, %v2155_v56  ;;  %v5560_v37 = vld [vmem:[%s9340_s14 + $0xc0] sm:$0xff]   ;;  %v5559_v60 = vld [vmem:[%s9340_s14 + $0x48] sm:$0xff]  }
 0x38e   :  { %v2161_v52 = vpop.permute.xlu1 %2160  ;;  %v2198_v18 = vmul.f32 %v2177_v45, %v2169_v19  ;;  %v2199_v24 = vmul.f32 %v2181_v57, %v2167_v47  ;;  %2366 = vmatprep.subr.bf16.mxu1 %v7238_v35  ;;  %v5562_v56 = vld [vmem:[%s9340_s14 + $0x80] sm:$0xff]   ;;  %v5564_v47 = vld [vmem:[%s9340_s14 + $0xc8] sm:$0xff]   ;;  %v5563_v19 = vld [vmem:[%s9340_s14 + $0x50] sm:$0xff]  }
 0x38f   :  { %v2164_v42 = vsel %vm9377_vm10, %v6909_v6, %v2161_v52  ;;  %v2170_v29 = vsel %vm9377_vm10, %v2161_v52, %v6905_v61  ;;  %2367 = vmatpush1.bf16.msra.mxu1 %v7236_v58  ;;  %v5561_v52 = vld [vmem:[%s9340_s14 + $0x8] sm:$0xff]  }
 0x390   :  { %v7256_v51 = vpack.c.bf16 %v2198_v18, %v2194_v43  ;;  %v2163_v17 = vpop.permute.xlu0 %2162  ;;  %v7258_v27 = vpack.c.bf16 %v2199_v24, %v2195_v23  ;;  %v2196_v61 = vmul.f32 %v2185_v22, %v2164_v42  ;;  %v2197_v45 = vmul.f32 %v2189_v30, %v2170_v29  ;;  %v5565_v43 = vld [vmem:[%s9340_s14 + $0x10] sm:$0xff]   ;;  %v5567_v18 = vld [vmem:[%s9340_s14 + $0x58] sm:$0xff]  }
 0x391   :  { %v2165_v59 = vsel %vm9377_vm10, %v6911_v7, %v2163_v17  ;;  %v2171_v6 = vsel %vm9377_vm10, %v2163_v17, %v6907_v62  ;;  %v5554_v7 = vld [vmem:[%s9512_s4 + $0x14] ss:$8 sps:$4 sm:$0xff]   ;;  %v5558_v62 = vld [vmem:[%s9340_s14] sm:$0xff]  }
 0x392   :  { %v2200_v57 = vmul.f32 %v2185_v22, %v2165_v59  ;;  %v2201_v34 = vmul.f32 %v2189_v30, %v2171_v6  ;;  %2315 = vmatprep.subr.bf16.mxu0 %v7258_v27  ;;  %v5556_v22 = vld [vmem:[%s9512_s4 + $0x10] ss:$8 sps:$4 sm:$0xff]   ;;  %v5566_v30 = vld [vmem:[%s9340_s14 + $0x88] sm:$0xff]   ;;  %v5571_v17 = vld [vmem:[%s9340_s14 + $0x60] sm:$0xff]  }
 0x393   :  { %2316 = vmatpush1.bf16.msra.mxu0 %v7256_v51  ;;  %v5568_v23 = vld [vmem:[%s9340_s14 + $0xd0] sm:$0xff]   ;;  %v5569_v42 = vld [vmem:[%s9340_s14 + $0x18] sm:$0xff]   ;;  %v5573_v59 = vld [vmem:[%s9340_s14 + $0x20] sm:$0xff]  }
 0x394   :  { %v7277_v31 = vpack.c.bf16 %v2200_v57, %v2196_v61  ;;  %v7279_v50 = vpack.c.bf16 %v2201_v34, %v2197_v45  ;;  %5337 = vmatprep.subr.bf16.mxu0 %v5557_v53  ;;  %v5570_v24 = vld [vmem:[%s9340_s14 + $0x90] sm:$0xff]   ;;  %v5572_v29 = vld [vmem:[%s9340_s14 + $0xd8] sm:$0xff]   ;;  %v5575_v6 = vld [vmem:[%s9340_s14 + $0x68] sm:$0xff]  }
 0x395   :  { %v5574_v53 = vld [vmem:[%s9340_s14 + $0x98] sm:$0xff]   ;;  %v5576_v61 = vld [vmem:[%s9340_s14 + $0xe0] sm:$0xff]   ;;  %v5577_v45 = vld [vmem:[%s9340_s14 + $0x28] sm:$0xff]  }
 0x396   :  { %9515 = vst [vmem:[#allocation33_spill] sm:$0xff] %v7277_v31  ;;  %9516 = vst [vmem:[#allocation34_spill] sm:$0xff] %v7279_v50  ;;  %2332 = vmatmul.mubr.bf16.vlgmr.msra.gmra.mrb[4].mxu0 %v5553_v15  ;;  %2368 = vmatprep.subr.bf16.mxu1 %v7279_v50  ;;  %v5578_v57 = vld [vmem:[%s9340_s14 + $0xa0] sm:$0xff]   ;;  %v5579_v34 = vld [vmem:[%s9340_s14 + $0x70] sm:$0xff]  }
 0x397   :  { %2369 = vmatpush1.bf16.msra.mxu1 %v7277_v31  ;;  %5236 = vmatprep.mubr.msk.bf16.mxu0 %vm2292_vm11, %v5554_v7 }
 0x398   :  { %5338 = vmatpush3.bf16.msra.mxu0 %v5558_v62  ;;  %5365 = vmatprep.subr.bf16.mxu1 %v5560_v37  ;;  %v5582_v62 = vld [vmem:[%s9340_s14 + $0xa8] sm:$0xff]   ;;  %v5583_v37 = vld [vmem:[%s9340_s14 + $0x78] sm:$0xff]  }
 0x399   :  { %5339 = vmatprep.subr.bf16.mxu0 %v5559_v60  ;;  %v5584_v60 = vld [vmem:[%s9340_s14 + $0xf0] sm:$0xff]  }
 0x39a   :  { %2385 = vmatmul.mubr.bf16.vlgmr.msra.gmra.mrb[4].mxu1 %v5553_v15  ;;  %v5580_v15 = vld [vmem:[%s9340_s14 + $0xe8] sm:$0xff]  }
 0x39b   :  { %5238 = vmatprep.mubr.msk.bf16.mxu1 %vm2292_vm11, %v5554_v7  ;;  %5366 = vmatpush3.bf16.msra.mxu1 %v5562_v56  ;;  %v5581_v7 = vld [vmem:[%s9340_s14 + $0x30] sm:$0xff]   ;;  %v5585_v56 = vld [vmem:[%s9340_s14 + $0x38] sm:$0xff]  }
 0x39c   :  { %5340 = vmatpush3.bf16.msra.mxu0 %v5561_v52  ;;  %5367 = vmatprep.subr.bf16.mxu1 %v5564_v47  ;;  %v5586_v52 = vld [vmem:[%s9340_s14 + $0xb0] sm:$0xff]   ;;  %v5587_v47 = vld [vmem:[%s9340_s14 + $0xf8] sm:$0xff]  }
 0x39d   :  { %5341 = vmatprep.subr.bf16.mxu0 %v5563_v19  ;;  %v5588_v19 = vld [vmem:[%s9340_s14 + $0xb8] sm:$0xff]  }
 0x39e   :  { %2342 = vmatmul.mubr.bf16.gmra.mrb[8].mxu0 %v5556_v22 }
 0x39f   :  { %5368 = vmatpush3.bf16.msra.mxu1 %v5566_v30 }
 0x3a0   :  { %5342 = vmatpush3.bf16.msra.mxu0 %v5565_v43  ;;  %5369 = vmatprep.subr.bf16.mxu1 %v5568_v23 }
 0x3a1   :  { %5343 = vmatprep.subr.bf16.mxu0 %v5567_v18  ;;  %v2262_v18 = vpop.permute.xlu0 %2261 }
 0x3a2   :  { %2395 = vmatmul.mubr.bf16.gmra.mrb[8].mxu1 %v5556_v22  ;;  %v2257_v22 = vpop.permute.xlu1 %2256 }
 0x3a3   :  { %5370 = vmatpush3.bf16.msra.mxu1 %v5570_v24 }
 0x3a4   :  { %5344 = vmatpush3.bf16.msra.mxu0 %v5569_v42  ;;  %5371 = vmatprep.subr.bf16.mxu1 %v5572_v29 }
 0x3a5   :  { %5345 = vmatprep.subr.bf16.mxu0 %v5571_v17  ;;  %v2272_v12 = vpop.permute.xlu0 %2271 }
 0x3a7   :  { %5372 = vmatpush3.bf16.msra.mxu1 %v5574_v53 }
 0x3a8   :  { %5346 = vmatpush3.bf16.msra.mxu0 %v5573_v59  ;;  %5373 = vmatprep.subr.bf16.mxu1 %v5576_v61 }
 0x3a9   :  { %5347 = vmatprep.subr.bf16.mxu0 %v5575_v6 }
 0x3ab   :  { %5374 = vmatpush3.bf16.msra.mxu1 %v5578_v57 }
 0x3ac   :  { %5348 = vmatpush3.bf16.msra.mxu0 %v5577_v45  ;;  %5375 = vmatprep.subr.bf16.mxu1 %v5580_v15 }
 0x3ad   :  { %5349 = vmatprep.subr.bf16.mxu0 %v5579_v34 }
 0x3af   :  { %5376 = vmatpush3.bf16.msra.mxu1 %v5582_v62 }
 0x3b0   :  { %5350 = vmatpush3.bf16.msra.mxu0 %v5581_v7  ;;  %5377 = vmatprep.subr.bf16.mxu1 %v5584_v60 }
 0x3b1   :  { %5351 = vmatprep.subr.bf16.mxu0 %v5583_v37 }
 0x3b3   :  { %5378 = vmatpush3.bf16.msra.mxu1 %v5586_v52 }
 0x3b4   :  { %5352 = vmatpush3.bf16.msra.mxu0 %v5585_v56  ;;  %5379 = vmatprep.subr.bf16.mxu1 %v5587_v47 }
 0x3b7   :  { %5380 = vmatpush3.bf16.msra.mxu1 %v5588_v19 }
 0x469   :  { %v2333_v30 = vpop.f32.mrb[4].mxu0 }
 0x46a   :  { %v2334_v43 = vadd.f32 %v2333_v30, %v2257_v22  ;;  %v2335_v23 = vpop.f32.mrb[5].mxu0  ;;  %v2267_v30 = vpop.permute.xlu1 %2266 }
 0x46b   :  { %v2336_v24 = vadd.f32 %v2335_v23, %v2257_v22  ;;  %v2337_v42 = vpop.f32.mrb[6].mxu0 }
 0x46c   :  { %vm2405_vm12 = vcmp.ge.f32.partialorder %v2334_v43, 0.0  ;;  %v2421_v29 = vmul.f32 0.1, %v2334_v43  ;;  %v2338_v17 = vadd.f32 %v2337_v42, %v2262_v18  ;;  %v2339_v53 = vpop.f32.mrb[7].mxu0 }
 0x46d   :  { %vm2406_vm13 = vcmp.ge.f32.partialorder %v2336_v24, 0.0  ;;  %v2422_v59 = vmul.f32 0.1, %v2336_v24  ;;  %v2340_v6 = vadd.f32 %v2339_v53, %v2262_v18  ;;  %v2386_v61 = vpop.f32.mrb[4].mxu1 }
 0x46e   :  { %v2437_v45 = vsel %vm2405_vm12, %v2334_v43, %v2421_v29  ;;  %vm2409_vm14 = vcmp.ge.f32.partialorder %v2338_v17, 0.0  ;;  %v2425_v57 = vmul.f32 0.1, %v2338_v17  ;;  %v2387_v34 = vadd.f32 %v2386_v61, %v2257_v22  ;;  %v2388_v15 = vpop.f32.mrb[5].mxu1 }
 0x46f   :  { %vm2410_vm15 = vcmp.ge.f32.partialorder %v2340_v6, 0.0  ;;  %v2426_v7 = vmul.f32 0.1, %v2340_v6  ;;  %v2389_v62 = vadd.f32 %v2388_v15, %v2257_v22  ;;  %v2390_v37 = vpop.f32.mrb[6].mxu1  ;;  %v2438_v60 = vsel %vm2406_vm13, %v2336_v24, %v2422_v59 }
 0x470   :  { %v2441_v56 = vsel %vm2409_vm14, %v2338_v17, %v2425_v57  ;;  %vm2407_vm1 = vcmp.ge.f32.partialorder %v2387_v34, 0.0  ;;  %v2423_v52 = vmul.f32 0.1, %v2387_v34  ;;  %v2391_v47 = vadd.f32 %v2390_v37, %v2262_v18  ;;  %v2392_v19 = vpop.f32.mrb[7].mxu1 }
 0x471   :  { %v2453_v23 = vpack.c.bf16 %v2441_v56, %v2437_v45  ;;  %vm2408_vm3 = vcmp.ge.f32.partialorder %v2389_v62, 0.0  ;;  %v2424_v42 = vmul.f32 0.1, %v2389_v62  ;;  %v2393_v53 = vadd.f32 %v2392_v19, %v2262_v18  ;;  %v2343_v43 = vpop.f32.mrb[8].mxu0 }
 0x472   :  { %v2439_v29 = vsel %vm2407_vm1, %v2387_v34, %v2423_v52  ;;  %vm2411_vm4 = vcmp.ge.f32.partialorder %v2391_v47, 0.0  ;;  %v2427_v61 = vmul.f32 0.1, %v2391_v47  ;;  %v2344_v9 = vadd.f32 %v2343_v43, %v2267_v30  ;;  %v2345_v13 = vpop.f32.mrb[9].mxu0 }
 0x473   :  { %vm2412_vm11 = vcmp.ge.f32.partialorder %v2393_v53, 0.0  ;;  %v2428_v22 = vmul.f32 0.1, %v2393_v53  ;;  %v2346_v24 = vadd.f32 %v2345_v13, %v2267_v30  ;;  %v2347_v17 = vpop.f32.mrb[10].mxu0  ;;  %v2442_v59 = vsel %vm2410_vm15, %v2340_v6, %v2426_v7 }
 0x474   :  { %v2443_v57 = vsel %vm2411_vm4, %v2391_v47, %v2427_v61  ;;  %vm2413_vm12 = vcmp.ge.f32.partialorder %v2344_v9, 0.0  ;;  %v2429_v15 = vmul.f32 0.1, %v2344_v9  ;;  %v2348_v45 = vadd.f32 %v2347_v17, %v2272_v12  ;;  %v2349_v37 = vpop.f32.mrb[11].mxu0 }
 0x475   :  { %v2455_v56 = vpack.c.bf16 %v2443_v57, %v2439_v29  ;;  %vm2414_vm13 = vcmp.ge.f32.partialorder %v2346_v24, 0.0  ;;  %v2430_v18 = vmul.f32 0.1, %v2346_v24  ;;  %v2350_v34 = vadd.f32 %v2349_v37, %v2272_v12  ;;  %v2396_v52 = vpop.f32.mrb[8].mxu1 }
 0x476   :  { %vm2417_vm14 = vcmp.ge.f32.partialorder %v2348_v45, 0.0  ;;  %v2433_v19 = vmul.f32 0.1, %v2348_v45  ;;  %v2454_v43 = vpack.c.bf16 %v2442_v59, %v2438_v60  ;;  %v2397_v10 = vadd.f32 %v2396_v52, %v2267_v30  ;;  %v2398_v11 = vpop.f32.mrb[9].mxu1 }
 0x477   :  { %vm2418_vm1 = vcmp.ge.f32.partialorder %v2350_v34, 0.0  ;;  %v2434_v13 = vmul.f32 0.1, %v2350_v34  ;;  %v2399_v31 = vadd.f32 %v2398_v11, %v2267_v30  ;;  %v2400_v50 = vpop.f32.mrb[10].mxu1  ;;  %v2440_v6 = vsel %vm2408_vm3, %v2389_v62, %v2424_v42 }
 0x478   :  { %2749 = vmatprep.mubr.bf16.mxu0 %v2454_v43  ;;  %vm2415_vm15 = vcmp.ge.f32.partialorder %v2397_v10, 0.0  ;;  %v2431_v7 = vmul.f32 0.1, %v2397_v10  ;;  %v2401_v47 = vadd.f32 %v2400_v50, %v2272_v12  ;;  %v2402_v29 = vpop.f32.mrb[11].mxu1  ;;  %v2444_v61 = vsel %vm2412_vm11, %v2393_v53, %v2428_v22 }
 0x479   :  { %2750 = vmatmul.mubr.bf16.vlgmr.msra.gmra.mrb[12].mxu0 %v2453_v23  ;;  %vm2416_vm4 = vcmp.ge.f32.partialorder %v2399_v31, 0.0  ;;  %v2432_v17 = vmul.f32 0.1, %v2399_v31  ;;  %v2403_v57 = vadd.f32 %v2402_v29, %v2272_v12  ;;  %v2456_v60 = vpack.c.bf16 %v2444_v61, %v2440_v6 }
 0x47a   :  { %vm2419_vm10 = vcmp.ge.f32.partialorder %v2401_v47, 0.0  ;;  %v2435_v59 = vmul.f32 0.1, %v2401_v47  ;;  %v2446_v37 = vsel %vm2414_vm13, %v2346_v24, %v2430_v18  ;;  %v2450_v11 = vsel %vm2418_vm1, %v2350_v34, %v2434_v13 }
 0x47b   :  { %vm2420_vm0 = vcmp.ge.f32.partialorder %v2403_v57, 0.0  ;;  %v2436_v62 = vmul.f32 0.1, %v2403_v57  ;;  %2798 = vmatprep.mubr.bf16.mxu1 %v2456_v60  ;;  %v2458_v30 = vpack.c.bf16 %v2450_v11, %v2446_v37  ;;  %v2445_v50 = vsel %vm2413_vm12, %v2344_v9, %v2429_v15 }
 0x47c   :  { %2799 = vmatmul.mubr.bf16.vlgmr.msra.gmra.mrb[12].mxu1 %v2455_v56  ;;  %v2449_v42 = vsel %vm2417_vm14, %v2348_v45, %v2433_v19  ;;  %v2447_v23 = vsel %vm2415_vm15, %v2397_v10, %v2431_v7  ;;  %v2451_v53 = vsel %vm2419_vm10, %v2401_v47, %v2435_v59  ;;  %v2448_v22 = vsel %vm2416_vm4, %v2399_v31, %v2432_v17  ;;  %v5589_v56 = vld [vmem:[%s9517_s0] sm:$0xff]  }
 0x47d   :  { %2757 = vmatprep.mubr.bf16.mxu0 %v2458_v30  ;;  %v2457_v12 = vpack.c.bf16 %v2449_v42, %v2445_v50  ;;  %v2452_v52 = vsel %vm2420_vm0, %v2403_v57, %v2436_v62  ;;  %v2459_v24 = vpack.c.bf16 %v2451_v53, %v2447_v23  ;;  %vm2855_vm3 = vcmask 261120  }
 0x47e   :  { %v2460_v18 = vpack.c.bf16 %v2452_v52, %v2448_v22 }
 0x480   :  { %2806 = vmatprep.mubr.bf16.mxu1 %v2460_v18  ;;  %v5593_v18 = vld [vmem:[%s9341_s15 + $0x4] ss:$16 sps:$4 sm:$0xff]  }
 0x481   :  { %2758 = vmatmul.mubr.bf16.gmra.mrb[16].mxu0 %v2457_v12 }
 0x482   :  { %5405 = vmatprep.mubr.msk.bf16.mxu0 %vm2855_vm3, %v5589_v56  ;;  %v5590_v56 = vld [vmem:[%s9517_s0 + $0x8] sm:$0xff]  }
 0x484   :  { %2807 = vmatmul.mubr.bf16.gmra.mrb[16].mxu1 %v2459_v24 }
 0x54c   :  { %v5353_v9 = vpop.f32.mrb[12].mxu0 }
 0x54d   :  { %v5354_v10 = vpop.f32.mrb[13].mxu0 }
 0x54e   :  { %v5355_v15 = vadd.f32 %v5354_v10, %v5353_v9  ;;  %v5356_v45 = vpop.f32.mrb[14].mxu0  ;;  %v5591_v9 = vld [vmem:[%s9341_s15] ss:$16 sps:$4 sm:$0xff]   ;;  %v5596_v10 = vld [vmem:[%s9341_s15 + $0x24] ss:$16 sps:$4 sm:$0xff]  }
 0x54f   :  { %v5357_v34 = vpop.f32.mrb[15].mxu0  ;;  %v5381_v19 = vpop.f32.mrb[12].mxu1 }
 0x550   :  { %v5358_v31 = vadd.f32 %v5357_v34, %v5356_v45  ;;  %v5382_v43 = vpop.f32.mrb[13].mxu1  ;;  %v9518_v45 = vmov 0   ;;  %v5599_v34 = vld [vmem:[%s9341_s15 + $0x44] ss:$16 sps:$4 sm:$0xff]  }
 0x551   :  { %v5383_v13 = vadd.f32 %v5382_v43, %v5381_v19  ;;  %v5384_v6 = vpop.f32.mrb[14].mxu1  ;;  %v5597_v19 = vld [vmem:[%s9341_s15 + $0x40] ss:$16 sps:$4 sm:$0xff]  }
 0x552   :  { %v5385_v7 = vpop.f32.mrb[15].mxu1  ;;  %v5600_v43 = vld [vmem:[%s9341_s15 + $0x60] ss:$16 sps:$4 sm:$0xff]  }
 0x553   :  { %v7394_v47 = vadd.f32 %v5383_v13, %v5355_v15  ;;  %v5386_v29 = vadd.f32 %v5385_v7, %v5384_v6  ;;  %v5594_v15 = vld [vmem:[%s9341_s15 + $0x20] ss:$16 sps:$4 sm:$0xff]   ;;  %v5605_v13 = vld [vmem:[%s9341_s15 + $0x84] ss:$16 sps:$4 sm:$0xff]  }
 0x554   :  { %v5359_v61 = vpop.f32.mrb[16].mxu0  ;;  %v5603_v6 = vld [vmem:[%s9341_s15 + $0x80] ss:$16 sps:$4 sm:$0xff]   ;;  %v5608_v7 = vld [vmem:[%s9341_s15 + $0xa4] ss:$16 sps:$4 sm:$0xff]  }
 0x555   :  { %v7396_v17 = vadd.f32 %v5386_v29, %v5358_v31  ;;  %v5360_v57 = vpop.f32.mrb[17].mxu0  ;;  %v5602_v31 = vld [vmem:[%s9341_s15 + $0x64] ss:$16 sps:$4 sm:$0xff]   ;;  %v5606_v29 = vld [vmem:[%s9341_s15 + $0xa0] ss:$16 sps:$4 sm:$0xff]  }
 0x556   :  { %v5361_v60 = vadd.f32 %v5360_v57, %v5359_v61  ;;  %v5362_v59 = vpop.f32.mrb[18].mxu0  ;;  %v5611_v61 = vld [vmem:[%s9341_s15 + $0xc4] ss:$16 sps:$4 sm:$0xff]   ;;  %v5609_v57 = vld [vmem:[%s9341_s15 + $0xc0] ss:$16 sps:$4 sm:$0xff]  }
 0x557   :  { %v5363_v37 = vpop.f32.mrb[19].mxu0  ;;  %v5387_v11 = vpop.f32.mrb[16].mxu1  ;;  %v2815_v62 = vpack.c.bf16 %v7396_v17, %v7394_v47 }
 0x558   :  { %v5364_v30 = vadd.f32 %v5363_v37, %v5362_v59  ;;  %v5388_v50 = vpop.f32.mrb[17].mxu1  ;;  %v5612_v59 = vld [vmem:[%s9341_s15 + $0xe0] ss:$16 sps:$4 sm:$0xff]  }
 0x559   :  { %v5389_v42 = vadd.f32 %v5388_v50, %v5387_v11  ;;  %v5390_v23 = vpop.f32.mrb[18].mxu1  ;;  %5401 = vmatprep.subr.bf16.mxu0 %v2815_v62  ;;  %v5615_v37 = vld [vmem:[#allocation8] sm:$0xff]   ;;  %v2828_v11 = vpop.permute.xlu1 %2827 }
 0x55a   :  { %v5391_v53 = vpop.f32.mrb[19].mxu1  ;;  %5402 = vmatpush3.bf16.msra.mxu0 %v2815_v62  ;;  %5413 = vmatprep.mubr.msk.bf16.mxu1 %vm2855_vm3, %v5615_v37  ;;  %v2833_v62 = vpop.permute.xlu0 %2832 }
 0x55b   :  { %v7400_v12 = vadd.f32 %v5389_v42, %v5361_v60  ;;  %v5392_v22 = vadd.f32 %v5391_v53, %v5390_v23  ;;  %v5614_v60 = vld [vmem:[%s9341_s15 + $0xe4] ss:$16 sps:$4 sm:$0xff]  }
 0x55d   :  { %v7402_v52 = vadd.f32 %v5392_v22, %v5364_v30  ;;  %v2838_v30 = vpop.permute.xlu1 %2837 }
 0x55e   :  { %v2843_v53 = vpop.permute.xlu0 %2842 }
 0x55f   :  { %v2816_v24 = vpack.c.bf16 %v7402_v52, %v7400_v12 }
 0x561   :  { %5403 = vmatprep.subr.bf16.mxu0 %v2816_v24 }
 0x562   :  { %5404 = vmatpush3.bf16.msra.mxu0 %v2816_v24 }
 0x563   :  { %3318 = vmatprep.subr.bf16.mxu0 %v5593_v18 }
 0x565   :  { %5406 = vmatmul.mubr.msk.bf16.vlgmr.msra.gmra.mrb[20].mxu0 %vm2855_vm3, %v5590_v56 }
 0x566   :  { %3319 = vmatpush1.bf16.msra.mxu0 %v5591_v9  ;;  %3350 = vmatprep.mubr.bf16.mxu0 %v9518_v45 }
 0x567   :  { %3320 = vmatprep.subr.bf16.mxu0 %v5596_v10 }
 0x56a   :  { %3321 = vmatpush1.bf16.msra.mxu0 %v5594_v15 }
 0x56b   :  { %3322 = vmatprep.subr.bf16.mxu0 %v5599_v34 }
 0x56e   :  { %3323 = vmatpush1.bf16.msra.mxu0 %v5597_v19 }
 0x56f   :  { %3324 = vmatprep.subr.bf16.mxu0 %v5602_v31 }
 0x572   :  { %3325 = vmatpush1.bf16.msra.mxu0 %v5600_v43 }
 0x573   :  { %3326 = vmatprep.subr.bf16.mxu0 %v5605_v13 }
 0x576   :  { %3327 = vmatpush1.bf16.msra.mxu0 %v5603_v6 }
 0x577   :  { %3328 = vmatprep.subr.bf16.mxu0 %v5608_v7 }
 0x57a   :  { %3329 = vmatpush1.bf16.msra.mxu0 %v5606_v29 }
 0x57b   :  { %3330 = vmatprep.subr.bf16.mxu0 %v5611_v61 }
 0x57e   :  { %3331 = vmatpush1.bf16.msra.mxu0 %v5609_v57 }
 0x57f   :  { %3332 = vmatprep.subr.bf16.mxu0 %v5614_v60 }
 0x582   :  { %3333 = vmatpush1.bf16.msra.mxu0 %v5612_v59 }
 0x583   :  { %4479 = vmatprep.subr.bf16.mxu0 %v6934_v46 }
 0x638   :  { %v5407_v50 = vpop.f32.mrb[20].mxu0 }
 0x639   :  { %v2905_v42 = vadd.f32 %v5407_v50, %v2838_v30  ;;  %v2896_v23 = vpop.f32.mrb[21].mxu0 }
 0x63a   :  { %v2897_v22 = vadd.f32 %v2896_v23, %v2828_v11  ;;  %v5408_v24 = vpop.f32.mrb[22].mxu0 }
 0x63b   :  { %vm2913_vm0 = vcmp.ge.f32.partialorder %v2905_v42, 0.0  ;;  %v2917_v18 = vmul.f32 0.1, %v2905_v42  ;;  %v2908_v56 = vadd.f32 %v5408_v24, %v2843_v53  ;;  %v2899_v9 = vpop.f32.mrb[23].mxu0 }
 0x63c   :  { %vm2911_vm10 = vcmp.ge.f32.partialorder %v2897_v22, 0.0  ;;  %v2915_v10 = vmul.f32 0.1, %v2897_v22  ;;  %v2900_v15 = vadd.f32 %v2899_v9, %v2833_v62 }
 0x63d   :  { %v2921_v46 = vsel %vm2913_vm0, %v2905_v42, %v2917_v18  ;;  %vm2914_vm11 = vcmp.ge.f32.partialorder %v2908_v56, 0.0  ;;  %v2918_v34 = vmul.f32 0.1, %v2908_v56 }
 0x63e   :  { %v2919_v19 = vsel %vm2911_vm10, %v2897_v22, %v2915_v10  ;;  %vm2912_vm12 = vcmp.ge.f32.partialorder %v2900_v15, 0.0  ;;  %v2916_v31 = vmul.f32 0.1, %v2900_v15  ;;  %v2925_v13 = vadd.f32 %v2921_v46, %v7400_v12  ;;  %v5618_v12 = vld [vmem:[%s9341_s15 + $0xc] ss:$16 sps:$4 sm:$0xff]  }
 0x63f   :  { %v2922_v43 = vsel %vm2914_vm11, %v2908_v56, %v2918_v34  ;;  %v2923_v29 = vadd.f32 %v2919_v19, %v7394_v47  ;;  %v5619_v47 = vld [vmem:[#allocation8 + $0x8] sm:$0x3f]   ;;  %v9538_v19 = vld [vmem:[#allocation30_spill] sm:$0xff] }
 0x640   :  { %v2926_v6 = vadd.f32 %v2922_v43, %v7402_v52  ;;  %v2920_v7 = vsel %vm2912_vm12, %v2900_v15, %v2916_v31  ;;  %v9537_v15 = vld [vmem:[#allocation29_spill] sm:$0xff] }
 0x641   :  { %v2924_v61 = vadd.f32 %v2920_v7, %v7396_v17  ;;  %v5626_v17 = vld [vmem:[%s9341_s15 + $0x68] ss:$16 sps:$4 sm:$0xff]  }
 0x642   :  { %v7465_v57 = vpack.c.bf16 %v2926_v6, %v2925_v13 }
 0x643   :  { %v2927_v60 = vpack.c.bf16 %v2924_v61, %v2923_v29 }
 0x645   :  { %5409 = vmatprep.subr.bf16.mxu1 %v2927_v60  ;;  %3351 = vmatmul.mubr.bf16.vlgmr.msra.gmra.mrb[24].mxu0 %v2927_v60 }
 0x646   :  { %4480 = vmatpush1.bf16.msra.mxu0 %v6955_v8  ;;  %5410 = vmatpush3.bf16.msra.mxu1 %v2927_v60  ;;  %v5616_v8 = vld [vmem:[%s9341_s15 + $0x8] ss:$16 sps:$4 sm:$0xff]  }
 0x647   :  { %4481 = vmatprep.subr.bf16.mxu0 %v6983_v3  ;;  %5411 = vmatprep.subr.bf16.mxu1 %v7465_v57  ;;  %v5622_v3 = vld [vmem:[%s9341_s15 + $0x2c] ss:$16 sps:$4 sm:$0xff]  }
 0x648   :  { %3360 = vmatprep.mubr.bf16.mxu0 %v9518_v45 }
 0x64a   :  { %4482 = vmatpush1.bf16.msra.mxu0 %v6998_v40  ;;  %5412 = vmatpush3.bf16.msra.mxu1 %v7465_v57  ;;  %v5620_v40 = vld [vmem:[%s9341_s15 + $0x28] ss:$16 sps:$4 sm:$0xff]  }
 0x64b   :  { %4483 = vmatprep.subr.bf16.mxu0 %v7026_v2  ;;  %3371 = vmatprep.subr.bf16.mxu1 %v5618_v12  ;;  %v5625_v2 = vld [vmem:[%s9341_s15 + $0x4c] ss:$16 sps:$4 sm:$0xff]  }
 0x64d   :  { %3361 = vmatmul.mubr.bf16.gmra.mrb[28].mxu0 %v7465_v57  ;;  %5414 = vmatmul.mubr.msk.bf16.vlgmr.msra.gmra.mrb[20].mxu1 %vm2855_vm3, %v5619_v47 }
 0x64e   :  { %4484 = vmatpush1.bf16.msra.mxu0 %v7041_v39  ;;  %3372 = vmatpush1.bf16.msra.mxu1 %v5616_v8  ;;  %v5623_v39 = vld [vmem:[%s9341_s15 + $0x48] ss:$16 sps:$4 sm:$0xff]  }
 0x64f   :  { %4485 = vmatprep.subr.bf16.mxu0 %v7074_v4  ;;  %3373 = vmatprep.subr.bf16.mxu1 %v5622_v3  ;;  %v5628_v4 = vld [vmem:[%s9341_s15 + $0x6c] ss:$16 sps:$4 sm:$0xff]  }
 0x650   :  { %3403 = vmatprep.mubr.bf16.mxu1 %v9518_v45 }
 0x652   :  { %4486 = vmatpush1.bf16.msra.mxu0 %v7094_v44  ;;  %3374 = vmatpush1.bf16.msra.mxu1 %v5620_v40  ;;  %v5631_v44 = vld [vmem:[%s9341_s15 + $0x8c] ss:$16 sps:$4 sm:$0xff]  }
 0x653   :  { %4487 = vmatprep.subr.bf16.mxu0 %v7090_v49  ;;  %3375 = vmatprep.subr.bf16.mxu1 %v5625_v2  ;;  %v5629_v49 = vld [vmem:[%s9341_s15 + $0x88] ss:$16 sps:$4 sm:$0xff]  }
 0x656   :  { %4488 = vmatpush1.bf16.msra.mxu0 %v6735_v63  ;;  %3376 = vmatpush1.bf16.msra.mxu1 %v5623_v39  ;;  %v5634_v63 = vld [vmem:[%s9341_s15 + $0xac] ss:$16 sps:$4 sm:$0xff]  }
 0x657   :  { %4489 = vmatprep.subr.bf16.mxu0 %v7128_v20  ;;  %3377 = vmatprep.subr.bf16.mxu1 %v5628_v4  ;;  %v5632_v20 = vld [vmem:[%s9341_s15 + $0xa8] ss:$16 sps:$4 sm:$0xff]  }
 0x65a   :  { %4490 = vmatpush1.bf16.msra.mxu0 %v7146_v48  ;;  %3378 = vmatpush1.bf16.msra.mxu1 %v5626_v17  ;;  %v5637_v48 = vld [vmem:[%s9341_s15 + $0xcc] ss:$16 sps:$4 sm:$0xff]  }
 0x65b   :  { %4491 = vmatprep.subr.bf16.mxu0 %v7175_v0  ;;  %3379 = vmatprep.subr.bf16.mxu1 %v5631_v44  ;;  %v5635_v0 = vld [vmem:[%s9341_s15 + $0xc8] ss:$16 sps:$4 sm:$0xff]  }
 0x65e   :  { %4492 = vmatpush1.bf16.msra.mxu0 %v7172_v28  ;;  %3380 = vmatpush1.bf16.msra.mxu1 %v5629_v49  ;;  %v5640_v28 = vld [vmem:[%s9341_s15 + $0xec] ss:$16 sps:$4 sm:$0xff]   ;;  %v9555_v49 = vld [vmem:[#allocation26_spill] sm:$0xff] }
 0x65f   :  { %4493 = vmatprep.subr.bf16.mxu0 %v7218_v55  ;;  %3381 = vmatprep.subr.bf16.mxu1 %v5634_v63  ;;  %v5638_v55 = vld [vmem:[%s9341_s15 + $0xe8] ss:$16 sps:$4 sm:$0xff]   ;;  %vm9626_vm0 = vcmp.lt.s32.totalorder %v9555_v49, 16 }
 0x660   :  { %vm9628_vm10 = vmmov %vm9626_vm0 }
 0x661   :  { %vm9630_vm11 = vmmov %vm9626_vm0 }
 0x662   :  { %4494 = vmatpush1.bf16.msra.mxu0 %v7216_v16  ;;  %3382 = vmatpush1.bf16.msra.mxu1 %v5632_v20  ;;  %v9519_v16 = vld [vmem:[#allocation31_spill] sm:$0xff]  ;;  %vm9634_vm12 = vmmov %vm9626_vm0 }
 0x663   :  { %4495 = vmatprep.subr.bf16.mxu0 %v7258_v27  ;;  %3383 = vmatprep.subr.bf16.mxu1 %v5637_v48 }
 0x666   :  { %4496 = vmatpush1.bf16.msra.mxu0 %v7256_v51  ;;  %3384 = vmatpush1.bf16.msra.mxu1 %v5635_v0  ;;  %v9520_v51 = vld [vmem:[#allocation32_spill] sm:$0xff] }
 0x667   :  { %3385 = vmatprep.subr.bf16.mxu1 %v5640_v28 }
 0x66a   :  { %3386 = vmatpush1.bf16.msra.mxu1 %v5638_v55 }
 0x66b   :  { %4585 = vmatprep.subr.bf16.mxu1 %v6957_v36  ;;  %v9521_v36 = vld [vmem:[#allocation34_spill] sm:$0xff] }
 0x66d   :  { %3404 = vmatmul.mubr.bf16.vlgmr.msra.gmra.mrb[24].mxu1 %v2927_v60 }
 0x66e   :  { %4586 = vmatpush1.bf16.msra.mxu1 %v9519_v16  ;;  %3413 = vmatprep.mubr.bf16.mxu1 %v9518_v45 }
 0x66f   :  { %4587 = vmatprep.subr.bf16.mxu1 %v7000_v33  ;;  %v9522_v33 = vld [vmem:[#allocation33_spill] sm:$0xff] }
 0x672   :  { %4588 = vmatpush1.bf16.msra.mxu1 %v7010_v25  ;;  %v9523_v25 = vld [vmem:[#allocation28_spill] sm:$0xff] }
 0x673   :  { %4589 = vmatprep.subr.bf16.mxu1 %v7043_v41 }
 0x675   :  { %3414 = vmatmul.mubr.bf16.gmra.mrb[28].mxu1 %v7465_v57 }
 0x676   :  { %4590 = vmatpush1.bf16.msra.mxu1 %v9520_v51 }
 0x677   :  { %4591 = vmatprep.subr.bf16.mxu1 %v7097_v21 }
 0x67a   :  { %4592 = vmatpush1.bf16.msra.mxu1 %v7110_v26  ;;  %v9524_v26 = vld [vmem:[#allocation27_spill] sm:$0xff] }
 0x67b   :  { %4593 = vmatprep.subr.bf16.mxu1 %v7124_v38 }
 0x67e   :  { %4594 = vmatpush1.bf16.msra.mxu1 %v6739_v5  ;;  %v5314_v5 = vld [vmem:[%s9339_s13 + $0x4] ss:$8 sm:$0xf] }
 0x67f   :  { %4595 = vmatprep.subr.bf16.mxu1 %v7151_v14  ;;  %v3837_v41 = vrot.slane %v5314_v5, %v9523_v25  ;;  %v3841_v38 = vrot.slane %v5314_v5, %v9524_v26  ;;  %v3845_v46 = vrot.slane %v5314_v5, %v9537_v15  ;;  %v3849_v31 = vrot.slane %v5314_v5, %v9538_v19 }
 0x682   :  { %4596 = vmatpush1.bf16.msra.mxu1 %v7148_v1 }
 0x683   :  { %4597 = vmatprep.subr.bf16.mxu1 %v7195_v32 }
 0x686   :  { %4598 = vmatpush1.bf16.msra.mxu1 %v7193_v54 }
 0x687   :  { %4599 = vmatprep.subr.bf16.mxu1 %v7238_v35 }
 0x68a   :  { %4600 = vmatpush1.bf16.msra.mxu1 %v7236_v58 }
 0x68b   :  { %4601 = vmatprep.subr.bf16.mxu1 %v9521_v36 }
 0x68e   :  { %4602 = vmatpush1.bf16.msra.mxu1 %v9522_v33 }
 0x718   :  { %v7562_v21 = vpop.f32.mrb[24].mxu0 }
 0x719   :  { %3424 = vrot.lane.b32.xlu1 %v7562_v21, %s6046_s30  ;;  %v7567_v1 = vpop.f32.mrb[25].mxu0  ;;  %v7576_v32 = vmul.f32 %v3837_v41, %v7562_v21 }
 0x71a   :  { %v7569_v14 = vpop.f32.mrb[26].mxu0  ;;  %v7582_v35 = vmul.f32 %v3841_v38, %v7567_v1 }
 0x71b   :  { %3426 = vrot.lane.b32.xlu0 %v7569_v14, %s6046_s30  ;;  %v7573_v54 = vpop.f32.mrb[27].mxu0  ;;  %9525 = vst [vmem:[#allocation31_spill] sm:$0xff] %v7576_v32  ;;  %v7579_v58 = vmul.f32 %v3837_v41, %v7569_v14 }
 0x71c   :  { %9527 = vst [vmem:[#allocation34_spill] sm:$0xff] %v7582_v35  ;;  %v7585_v27 = vmul.f32 %v3841_v38, %v7573_v54 }
 0x71d   :  { %9526 = vst [vmem:[#allocation32_spill] sm:$0xff] %v7579_v58  ;;  %3526 = vrot.lane.b32.xlu1 %v7562_v21, %s6044_s18 }
 0x71e   :  { %9528 = vst [vmem:[#allocation33_spill] sm:$0xff] %v7585_v27 }
 0x71f   :  { %3528 = vrot.lane.b32.xlu0 %v7569_v14, %s6044_s18 }
 0x720   :  { %v7595_v37 = vpop.f32.mrb[28].mxu0  ;;  %v7597_v11 = vpop.f32.mrb[20].mxu1 }
 0x721   :  { %9529 = vst [vmem:[#allocation28_spill] sm:$0xff] %v7597_v11  ;;  %3628 = vrot.lane.b32.xlu1 %v7562_v21, %s6047_s3  ;;  %v7601_v62 = vpop.f32.mrb[29].mxu0  ;;  %v7603_v30 = vpop.f32.mrb[21].mxu1  ;;  %v7616_v22 = vmul.f32 %v3837_v41, %v7595_v37 }
 0x722   :  { %9530 = vst [vmem:[#allocation35_spill] sm:$0xff] %v7603_v30  ;;  %v7605_v50 = vpop.f32.mrb[30].mxu0  ;;  %v7607_v42 = vpop.f32.mrb[22].mxu1  ;;  %v7622_v18 = vmul.f32 %v3841_v38, %v7601_v62 }
 0x723   :  { %9531 = vst [vmem:[#allocation36_spill] sm:$0xff] %v7607_v42  ;;  %3630 = vrot.lane.b32.xlu0 %v7569_v14, %s6047_s3  ;;  %v7611_v23 = vpop.f32.mrb[31].mxu0  ;;  %v7613_v53 = vpop.f32.mrb[23].mxu1  ;;  %9533 = vst [vmem:[#allocation38_spill] sm:$0xff] %v7616_v22  ;;  %v7619_v24 = vmul.f32 %v3837_v41, %v7605_v50 }
 0x724   :  { %9532 = vst [vmem:[#allocation37_spill] sm:$0xff] %v7613_v53  ;;  %9535 = vst [vmem:[#allocation40_spill] sm:$0xff] %v7622_v18  ;;  %v7625_v56 = vmul.f32 %v3841_v38, %v7611_v23 }
 0x725   :  { %9534 = vst [vmem:[#allocation39_spill] sm:$0xff] %v7619_v24  ;;  %3730 = vrot.lane.b32.xlu1 %v7562_v21, %s6048_s29 }
 0x726   :  { %9536 = vst [vmem:[#allocation41_spill] sm:$0xff] %v7625_v56 }
 0x727   :  { %3732 = vrot.lane.b32.xlu0 %v7569_v14, %s6048_s29 }
 0x729   :  { %3886 = vrot.lane.b32.xlu1 %v7562_v21, %s6049_s26 }
 0x72b   :  { %3888 = vrot.lane.b32.xlu0 %v7569_v14, %s6049_s26 }
 0x72d   :  { %3988 = vrot.lane.b32.xlu1 %v7562_v21, %s6050_s11 }
 0x72f   :  { %3990 = vrot.lane.b32.xlu0 %v7569_v14, %s6050_s11 }
 0x731   :  { %4090 = vrot.lane.b32.xlu1 %v7562_v21, %s6051_s28 }
 0x733   :  { %4092 = vrot.lane.b32.xlu0 %v7569_v14, %s6051_s28 }
 0x735   :  { %3432 = vrot.lane.b32.xlu1 %v7567_v1, %s6046_s30 }
 0x737   :  { %3434 = vrot.lane.b32.xlu0 %v7573_v54, %s6046_s30 }
 0x739   :  { %3534 = vrot.lane.b32.xlu1 %v7567_v1, %s6044_s18 }
 0x73b   :  { %3536 = vrot.lane.b32.xlu0 %v7573_v54, %s6044_s18 }
 0x73d   :  { %3636 = vrot.lane.b32.xlu1 %v7567_v1, %s6047_s3 }
 0x73f   :  { %3638 = vrot.lane.b32.xlu0 %v7573_v54, %s6047_s3 }
 0x740   :  { %v7660_v34 = vpop.f32.mrb[24].mxu1 }
 0x741   :  { %3738 = vrot.lane.b32.xlu1 %v7567_v1, %s6048_s29  ;;  %v7665_v43 = vpop.f32.mrb[25].mxu1  ;;  %v7674_v7 = vmul.f32 %v3845_v46, %v7660_v34 }
 0x742   :  { %v7667_v13 = vpop.f32.mrb[26].mxu1  ;;  %v7680_v61 = vmul.f32 %v3849_v31, %v7665_v43 }
 0x743   :  { %3740 = vrot.lane.b32.xlu0 %v7573_v54, %s6048_s29  ;;  %v7671_v6 = vpop.f32.mrb[27].mxu1  ;;  %9539 = vst [vmem:[#allocation42_spill] sm:$0xff] %v7674_v7  ;;  %v7677_v29 = vmul.f32 %v3845_v46, %v7667_v13 }
 0x744   :  { %9541 = vst [vmem:[#allocation44_spill] sm:$0xff] %v7680_v61  ;;  %v7683_v57 = vmul.f32 %v3849_v31, %v7671_v6 }
 0x745   :  { %9540 = vst [vmem:[#allocation43_spill] sm:$0xff] %v7677_v29  ;;  %3894 = vrot.lane.b32.xlu1 %v7567_v1, %s6049_s26 }
 0x746   :  { %9542 = vst [vmem:[#allocation45_spill] sm:$0xff] %v7683_v57 }
 0x747   :  { %3896 = vrot.lane.b32.xlu0 %v7573_v54, %s6049_s26 }
 0x748   :  { %v7693_v47 = vpop.f32.mrb[28].mxu1 }
 0x749   :  { %3996 = vrot.lane.b32.xlu1 %v7567_v1, %s6050_s11  ;;  %v7697_v8 = vpop.f32.mrb[29].mxu1  ;;  %v7706_v2 = vmul.f32 %v3845_v46, %v7693_v47 }
 0x74a   :  { %v7699_v3 = vpop.f32.mrb[30].mxu1  ;;  %v7712_v4 = vmul.f32 %v3849_v31, %v7697_v8 }
 0x74b   :  { %3998 = vrot.lane.b32.xlu0 %v7573_v54, %s6050_s11  ;;  %v7703_v40 = vpop.f32.mrb[31].mxu1  ;;  %9543 = vst [vmem:[#allocation46_spill] sm:$0xff] %v7706_v2  ;;  %v7709_v39 = vmul.f32 %v3845_v46, %v7699_v3  ;;  %v7838_v46 = vld [vmem:[%s9339_s13] ss:$8 sm:$0xf] }
 0x74c   :  { %9545 = vst [vmem:[#allocation48_spill] sm:$0xff] %v7712_v4  ;;  %v7715_v17 = vmul.f32 %v3849_v31, %v7703_v40  ;;  %v7846_v44 = vrot.slane %v7838_v46, %v9524_v26 }
 0x74d   :  { %9544 = vst [vmem:[#allocation47_spill] sm:$0xff] %v7709_v39  ;;  %4098 = vrot.lane.b32.xlu1 %v7567_v1, %s6051_s28 }
 0x74e   :  { %9546 = vst [vmem:[#allocation49_spill] sm:$0xff] %v7715_v17 }
 0x74f   :  { %4100 = vrot.lane.b32.xlu0 %v7573_v54, %s6051_s28 }
 0x751   :  { %3428 = vrot.lane.b32.xlu1 %v7595_v37, %s6046_s30 }
 0x753   :  { %3430 = vrot.lane.b32.xlu0 %v7605_v50, %s6046_s30 }
 0x755   :  { %3530 = vrot.lane.b32.xlu1 %v7595_v37, %s6044_s18 }
 0x757   :  { %3532 = vrot.lane.b32.xlu0 %v7605_v50, %s6044_s18 }
 0x759   :  { %3632 = vrot.lane.b32.xlu1 %v7595_v37, %s6047_s3 }
 0x75b   :  { %3634 = vrot.lane.b32.xlu0 %v7605_v50, %s6047_s3 }
 0x75d   :  { %3734 = vrot.lane.b32.xlu1 %v7595_v37, %s6048_s29 }
 0x75f   :  { %3736 = vrot.lane.b32.xlu0 %v7605_v50, %s6048_s29 }
 0x761   :  { %3890 = vrot.lane.b32.xlu1 %v7595_v37, %s6049_s26 }
 0x763   :  { %3892 = vrot.lane.b32.xlu0 %v7605_v50, %s6049_s26 }
 0x765   :  { %3992 = vrot.lane.b32.xlu1 %v7595_v37, %s6050_s11 }
 0x767   :  { %3994 = vrot.lane.b32.xlu0 %v7605_v50, %s6050_s11 }
 0x769   :  { %4094 = vrot.lane.b32.xlu1 %v7595_v37, %s6051_s28 }
 0x76b   :  { %4096 = vrot.lane.b32.xlu0 %v7605_v50, %s6051_s28 }
 0x76d   :  { %3436 = vrot.lane.b32.xlu1 %v7601_v62, %s6046_s30 }
 0x76f   :  { %3438 = vrot.lane.b32.xlu0 %v7611_v23, %s6046_s30 }
 0x771   :  { %3538 = vrot.lane.b32.xlu1 %v7601_v62, %s6044_s18 }
 0x773   :  { %3540 = vrot.lane.b32.xlu0 %v7611_v23, %s6044_s18 }
 0x775   :  { %3640 = vrot.lane.b32.xlu1 %v7601_v62, %s6047_s3 }
 0x777   :  { %3642 = vrot.lane.b32.xlu0 %v7611_v23, %s6047_s3 }
 0x779   :  { %3742 = vrot.lane.b32.xlu1 %v7601_v62, %s6048_s29 }
 0x77b   :  { %3744 = vrot.lane.b32.xlu0 %v7611_v23, %s6048_s29 }
 0x77d   :  { %3898 = vrot.lane.b32.xlu1 %v7601_v62, %s6049_s26 }
 0x77f   :  { %3900 = vrot.lane.b32.xlu0 %v7611_v23, %s6049_s26 }
 0x781   :  { %4000 = vrot.lane.b32.xlu1 %v7601_v62, %s6050_s11 }
 0x783   :  { %4002 = vrot.lane.b32.xlu0 %v7611_v23, %s6050_s11 }
 0x785   :  { %3440 = vrot.lane.b32.xlu1 %v7660_v34, %s6046_s30 }
 0x787   :  { %3442 = vrot.lane.b32.xlu0 %v7667_v13, %s6046_s30 }
 0x789   :  { %3542 = vrot.lane.b32.xlu1 %v7660_v34, %s6044_s18 }
 0x78b   :  { %v7783_v63 = vpop.permute.xlu1 %3424  ;;  %3544 = vrot.lane.b32.xlu0 %v7667_v13, %s6044_s18 }
 0x78d   :  { %v7787_v20 = vpop.permute.xlu0 %3426  ;;  %3644 = vrot.lane.b32.xlu1 %v7660_v34, %s6047_s3 }
 0x78f   :  { %v7791_v48 = vpop.permute.xlu1 %3526  ;;  %3646 = vrot.lane.b32.xlu0 %v7667_v13, %s6047_s3 }
 0x791   :  { %v7795_v0 = vpop.permute.xlu0 %3528  ;;  %3746 = vrot.lane.b32.xlu1 %v7660_v34, %s6048_s29 }
 0x793   :  { %v7799_v28 = vpop.permute.xlu1 %3628  ;;  %3748 = vrot.lane.b32.xlu0 %v7667_v13, %s6048_s29 }
 0x795   :  { %v7803_v55 = vpop.permute.xlu0 %3630  ;;  %3902 = vrot.lane.b32.xlu1 %v7660_v34, %s6049_s26 }
 0x797   :  { %v7807_v16 = vpop.permute.xlu1 %3730  ;;  %3904 = vrot.lane.b32.xlu0 %v7667_v13, %s6049_s26 }
 0x798   :  { %9547 = vst [vmem:[#allocation50_spill] sm:$0xff] %v7807_v16 }
 0x799   :  { %v7811_v51 = vpop.permute.xlu0 %3732  ;;  %4004 = vrot.lane.b32.xlu1 %v7660_v34, %s6050_s11 }
 0x79a   :  { %9548 = vst [vmem:[#allocation51_spill] sm:$0xff] %v7811_v51 }
 0x79b   :  { %v7815_v36 = vpop.permute.xlu1 %3886  ;;  %4006 = vrot.lane.b32.xlu0 %v7667_v13, %s6050_s11 }
 0x79c   :  { %9549 = vst [vmem:[#allocation52_spill] sm:$0xff] %v7815_v36 }
 0x79d   :  { %v7819_v33 = vpop.permute.xlu0 %3888  ;;  %4106 = vrot.lane.b32.xlu1 %v7660_v34, %s6051_s28 }
 0x79e   :  { %9550 = vst [vmem:[#allocation53_spill] sm:$0xff] %v7819_v33 }
 0x79f   :  { %v7823_v5 = vpop.permute.xlu1 %3988  ;;  %4108 = vrot.lane.b32.xlu0 %v7667_v13, %s6051_s28 }
 0x7a0   :  { %9551 = vst [vmem:[#allocation54_spill] sm:$0xff] %v7823_v5 }
 0x7a1   :  { %v7827_v41 = vpop.permute.xlu0 %3990  ;;  %3448 = vrot.lane.b32.xlu1 %v7665_v43, %s6046_s30 }
 0x7a2   :  { %9552 = vst [vmem:[#allocation55_spill] sm:$0xff] %v7827_v41 }
 0x7a3   :  { %v7831_v38 = vpop.permute.xlu1 %4090  ;;  %3450 = vrot.lane.b32.xlu0 %v7671_v6, %s6046_s30 }
 0x7a4   :  { %9553 = vst [vmem:[#allocation56_spill] sm:$0xff] %v7831_v38 }
 0x7a5   :  { %v7840_v31 = vpop.permute.xlu0 %4092  ;;  %3550 = vrot.lane.b32.xlu1 %v7665_v43, %s6044_s18 }
 0x7a6   :  { %9554 = vst [vmem:[#allocation57_spill] sm:$0xff] %v7840_v31 }
 0x7a7   :  { %v7848_v9 = vpop.permute.xlu1 %3432  ;;  %3552 = vrot.lane.b32.xlu0 %v7671_v6, %s6044_s18 }
 0x7a8   :  { %v3464_v60 = vsel %vm241_vm2, %v7783_v63, %v7848_v9 }
 0x7a9   :  { %v7856_v10 = vpop.permute.xlu0 %3434  ;;  %3652 = vrot.lane.b32.xlu1 %v7665_v43, %s6047_s3  ;;  %v3495_v12 = vmul.f32 %v7846_v44, %v3464_v60 }
 0x7aa   :  { %v3465_v52 = vsel %vm241_vm2, %v7787_v20, %v7856_v10 }
 0x7ab   :  { %v3499_v59 = vmul.f32 %v7846_v44, %v3465_v52  ;;  %v7866_v42 = vpop.permute.xlu1 %3534  ;;  %3654 = vrot.lane.b32.xlu0 %v7671_v6, %s6047_s3 }
 0x7ad   :  { %v7870_v11 = vpop.permute.xlu0 %3536  ;;  %3754 = vrot.lane.b32.xlu1 %v7665_v43, %s6048_s29  ;;  %v3511_v53 = vpack.c.bf16 %v3499_v59, %v3495_v12 }
 0x7af   :  { %v7874_v30 = vpop.permute.xlu1 %3636  ;;  %4497 = vmatprep.subr.bf16.mxu0 %v3511_v53  ;;  %3756 = vrot.lane.b32.xlu0 %v7671_v6, %s6048_s29 }
 0x7b1   :  { %v7878_v60 = vpop.permute.xlu0 %3638  ;;  %3910 = vrot.lane.b32.xlu1 %v7665_v43, %s6049_s26 }
 0x7b3   :  { %v7882_v52 = vpop.permute.xlu1 %3738  ;;  %3912 = vrot.lane.b32.xlu0 %v7671_v6, %s6049_s26 }
 0x7b4   :  { %9556 = vst [vmem:[#allocation26_spill] sm:$0xff] %v7882_v52 }
 0x7b5   :  { %v7886_v2 = vpop.permute.xlu0 %3740  ;;  %4012 = vrot.lane.b32.xlu1 %v7665_v43, %s6050_s11 }
 0x7b6   :  { %9557 = vst [vmem:[#allocation58_spill] sm:$0xff] %v7886_v2 }
 0x7b7   :  { %v7890_v59 = vpop.permute.xlu1 %3894  ;;  %4014 = vrot.lane.b32.xlu0 %v7671_v6, %s6050_s11 }
 0x7b8   :  { %9558 = vst [vmem:[#allocation59_spill] sm:$0xff] %v7890_v59 }
 0x7b9   :  { %v7894_v53 = vpop.permute.xlu0 %3896  ;;  %4114 = vrot.lane.b32.xlu1 %v7665_v43, %s6051_s28 }
 0x7ba   :  { %9559 = vst [vmem:[#allocation60_spill] sm:$0xff] %v7894_v53 }
 0x7bb   :  { %v7898_v12 = vpop.permute.xlu1 %3996  ;;  %4116 = vrot.lane.b32.xlu0 %v7671_v6, %s6051_s28 }
 0x7bc   :  { %9560 = vst [vmem:[#allocation61_spill] sm:$0xff] %v7898_v12 }
 0x7bd   :  { %v7902_v39 = vpop.permute.xlu0 %3998  ;;  %3444 = vrot.lane.b32.xlu1 %v7693_v47, %s6046_s30 }
 0x7be   :  { %9561 = vst [vmem:[#allocation62_spill] sm:$0xff] %v7902_v39 }
 0x7bf   :  { %v7906_v22 = vpop.permute.xlu1 %4098  ;;  %3446 = vrot.lane.b32.xlu0 %v7699_v3, %s6046_s30 }
 0x7c0   :  { %9562 = vst [vmem:[#allocation63_spill] sm:$0xff] %v7906_v22 }
 0x7c1   :  { %v7910_v24 = vpop.permute.xlu0 %4100  ;;  %3546 = vrot.lane.b32.xlu1 %v7693_v47, %s6044_s18 }
 0x7c2   :  { %9563 = vst [vmem:[#allocation64_spill] sm:$0xff] %v7910_v24 }
 0x7c3   :  { %v7914_v4 = vpop.permute.xlu1 %3428  ;;  %3548 = vrot.lane.b32.xlu0 %v7699_v3, %s6044_s18 }
 0x7c5   :  { %v7918_v17 = vpop.permute.xlu0 %3430  ;;  %3648 = vrot.lane.b32.xlu1 %v7693_v47, %s6047_s3 }
 0x7c6   :  { %9564 = vst [vmem:[#allocation65_spill] sm:$0xff] %v7918_v17 }
 0x7c7   :  { %v7922_v7 = vpop.permute.xlu1 %3530  ;;  %3650 = vrot.lane.b32.xlu0 %v7699_v3, %s6047_s3 }
 0x7c8   :  { %9565 = vst [vmem:[#allocation66_spill] sm:$0xff] %v7922_v7 }
 0x7c9   :  { %v7926_v29 = vpop.permute.xlu0 %3532  ;;  %3750 = vrot.lane.b32.xlu1 %v7693_v47, %s6048_s29 }
 0x7cb   :  { %v7930_v18 = vpop.permute.xlu1 %3632  ;;  %3752 = vrot.lane.b32.xlu0 %v7699_v3, %s6048_s29 }
 0x7cc   :  { %9566 = vst [vmem:[#allocation67_spill] sm:$0xff] %v7930_v18 }
 0x7cd   :  { %v7934_v56 = vpop.permute.xlu0 %3634  ;;  %3906 = vrot.lane.b32.xlu1 %v7693_v47, %s6049_s26 }
 0x7ce   :  { %9567 = vst [vmem:[#allocation68_spill] sm:$0xff] %v7934_v56 }
 0x7cf   :  { %v7938_v32 = vpop.permute.xlu1 %3734  ;;  %3908 = vrot.lane.b32.xlu0 %v7699_v3, %s6049_s26 }
 0x7d0   :  { %9568 = vst [vmem:[#allocation69_spill] sm:$0xff] %v7938_v32 }
 0x7d1   :  { %v7942_v58 = vpop.permute.xlu0 %3736  ;;  %4008 = vrot.lane.b32.xlu1 %v7693_v47, %s6050_s11 }
 0x7d2   :  { %9569 = vst [vmem:[#allocation70_spill] sm:$0xff] %v7942_v58 }
 0x7d3   :  { %v7946_v61 = vpop.permute.xlu1 %3890  ;;  %4010 = vrot.lane.b32.xlu0 %v7699_v3, %s6050_s11 }
 0x7d4   :  { %9570 = vst [vmem:[#allocation71_spill] sm:$0xff] %v7946_v61 }
 0x7d5   :  { %v7950_v57 = vpop.permute.xlu0 %3892  ;;  %3452 = vrot.lane.b32.xlu1 %v7697_v8, %s6046_s30 }
 0x7d6   :  { %9571 = vst [vmem:[#allocation72_spill] sm:$0xff] %v7950_v57 }
 0x7d7   :  { %v7954_v35 = vpop.permute.xlu1 %3992  ;;  %3454 = vrot.lane.b32.xlu0 %v7703_v40, %s6046_s30 }
 0x7d8   :  { %9572 = vst [vmem:[#allocation73_spill] sm:$0xff] %v7954_v35 }
 0x7d9   :  { %v7958_v27 = vpop.permute.xlu0 %3994  ;;  %4102 = vrot.lane.b32.xlu1 %v7601_v62, %s6051_s28 }
 0x7da   :  { %9573 = vst [vmem:[#allocation74_spill] sm:$0xff] %v7958_v27 }
 0x7db   :  { %v7962_v58 = vpop.permute.xlu1 %4094  ;;  %4104 = vrot.lane.b32.xlu0 %v7611_v23, %s6051_s28 }
 0x7dc   :  { %9574 = vst [vmem:[#allocation75_spill] sm:$0xff] %v7962_v58 }
 0x7dd   :  { %v7966_v61 = vpop.permute.xlu0 %4096  ;;  %3554 = vrot.lane.b32.xlu1 %v7697_v8, %s6044_s18 }
 0x7de   :  { %9575 = vst [vmem:[#allocation76_spill] sm:$0xff] %v7966_v61  ;;  %v5643_v61 = vld [vmem:[%s9335_s9 + $0x4] ss:$16 sps:$4 sm:$0xff]  }
 0x7df   :  { %v7970_v57 = vpop.permute.xlu1 %3436  ;;  %3556 = vrot.lane.b32.xlu0 %v7703_v40, %s6044_s18  ;;  %4511 = vmatprep.mubr.bf16.mxu0 %v5643_v61 }
 0x7e0   :  { %9576 = vst [vmem:[#allocation77_spill] sm:$0xff] %v7970_v57  ;;  %4617 = vmatprep.mubr.bf16.mxu1 %v5643_v61 }
 0x7e1   :  { %v7974_v35 = vpop.permute.xlu0 %3438  ;;  %3656 = vrot.lane.b32.xlu1 %v7697_v8, %s6047_s3 }
 0x7e3   :  { %v7978_v27 = vpop.permute.xlu1 %3538  ;;  %4112 = vrot.lane.b32.xlu0 %v7699_v3, %s6051_s28 }
 0x7e4   :  { %9577 = vst [vmem:[#allocation78_spill] sm:$0xff] %v7978_v27 }
 0x7e5   :  { %v7982_v58 = vpop.permute.xlu0 %3540  ;;  %3758 = vrot.lane.b32.xlu1 %v7697_v8, %s6048_s29 }
 0x7e7   :  { %v7989_v32 = vpop.permute.xlu1 %3640  ;;  %3658 = vrot.lane.b32.xlu0 %v7703_v40, %s6047_s3 }
 0x7e8   :  { %9578 = vst [vmem:[#allocation79_spill] sm:$0xff] %v7989_v32 }
 0x7e9   :  { %v7993_v16 = vpop.permute.xlu0 %3642  ;;  %3914 = vrot.lane.b32.xlu1 %v7697_v8, %s6049_s26 }
 0x7ea   :  { %9579 = vst [vmem:[#allocation80_spill] sm:$0xff] %v7993_v16 }
 0x7eb   :  { %v7997_v51 = vpop.permute.xlu1 %3742  ;;  %4194 = vrot.lane.b32.xlu0 %v7569_v14, %s6052_s23 }
 0x7ec   :  { %9580 = vst [vmem:[#allocation81_spill] sm:$0xff] %v7997_v51 }
 0x7ed   :  { %v8001_v56 = vpop.permute.xlu0 %3744  ;;  %4016 = vrot.lane.b32.xlu1 %v7697_v8, %s6050_s11 }
 0x7ee   :  { %9581 = vst [vmem:[#allocation82_spill] sm:$0xff] %v8001_v56 }
 0x7ef   :  { %v8005_v18 = vpop.permute.xlu1 %3898  ;;  %3760 = vrot.lane.b32.xlu0 %v7703_v40, %s6048_s29 }
 0x7f0   :  { %9582 = vst [vmem:[#allocation83_spill] sm:$0xff] %v8005_v18 }
 0x7f1   :  { %v8009_v61 = vpop.permute.xlu0 %3900  ;;  %4110 = vrot.lane.b32.xlu1 %v7693_v47, %s6051_s28 }
 0x7f2   :  { %9583 = vst [vmem:[#allocation84_spill] sm:$0xff] %v8009_v61 }
 0x7f3   :  { %v8013_v16 = vpop.permute.xlu1 %4000  ;;  %4202 = vrot.lane.b32.xlu0 %v7573_v54, %s6052_s23 }
 0x7f4   :  { %9584 = vst [vmem:[#allocation85_spill] sm:$0xff] %v8013_v16  ;;  %v8040_v16 = vld [vmem:[%s9339_s13 + $0x2] ss:$8 sm:$0xf] }
 0x7f5   :  { %v8017_v14 = vpop.permute.xlu0 %4002  ;;  %4118 = vrot.lane.b32.xlu1 %v7697_v8, %s6051_s28 }
 0x7f6   :  { %9585 = vst [vmem:[#allocation86_spill] sm:$0xff] %v8017_v14  ;;  %v8061_v14 = vld [vmem:[%s9339_s13 + $0x3] ss:$8 sm:$0xf] }
 0x7f7   :  { %v8021_v56 = vpop.permute.xlu1 %3440  ;;  %4210 = vrot.lane.b32.xlu0 %v7667_v13, %s6052_s23  ;;  %v8044_v13 = vrot.slane %v8040_v16, %v9537_v15 }
 0x7f9   :  { %v8025_v18 = vpop.permute.xlu0 %3442  ;;  %4192 = vrot.lane.b32.xlu1 %v7562_v21, %s6052_s23  ;;  %9588 = vst [vmem:[#allocation89_spill] sm:$0xff] %v8044_v13 }
 0x7fb   :  { %v8029_v61 = vpop.permute.xlu1 %3542  ;;  %4218 = vrot.lane.b32.xlu0 %v7671_v6, %s6052_s23 }
 0x7fc   :  { %9586 = vst [vmem:[#allocation87_spill] sm:$0xff] %v8029_v61  ;;  %v8075_v61 = vrot.slane %v8061_v14, %v9537_v15 }
 0x7fd   :  { %v8033_v54 = vpop.permute.xlu0 %3544  ;;  %4200 = vrot.lane.b32.xlu1 %v7567_v1, %s6052_s23 }
 0x7fe   :  { %9587 = vst [vmem:[#allocation88_spill] sm:$0xff] %v8033_v54  ;;  %9591 = vst [vmem:[#allocation92_spill] sm:$0xff] %v8075_v61 }
 0x7ff   :  { %v8046_v21 = vpop.permute.xlu1 %3644  ;;  %3916 = vrot.lane.b32.xlu0 %v7703_v40, %s6049_s26 }
 0x800   :  { %v3664_v6 = vsel %vm551_vm5, %v7874_v30, %v8046_v21 }
 0x801   :  { %v8054_v1 = vpop.permute.xlu0 %3646  ;;  %4208 = vrot.lane.b32.xlu1 %v7660_v34, %s6052_s23  ;;  %v8068_v32 = vmul.f32 %v8044_v13, %v3664_v6 }
 0x802   :  { %v3665_v51 = vsel %vm551_vm5, %v7878_v60, %v8054_v1 }
 0x803   :  { %9589 = vst [vmem:[#allocation90_spill] sm:$0xff] %v8068_v32  ;;  %v8071_v54 = vmul.f32 %v8044_v13, %v3665_v51  ;;  %v8077_v34 = vpop.permute.xlu1 %3746  ;;  %4198 = vrot.lane.b32.xlu0 %v7605_v50, %s6052_s23  ;;  %v8094_v51 = vld [vmem:[%s9339_s13 + $0x5] ss:$8 sm:$0xf] }
 0x804   :  { %v3766_v7 = vsel %vm712_vm6, %v7882_v52, %v8077_v34  ;;  %9592 = vst [vmem:[#allocation93_spill] sm:$0xff] %v8094_v51  ;;  %v8108_v32 = vrot.slane %v8094_v51, %v9524_v26 }
 0x805   :  { %9590 = vst [vmem:[#allocation91_spill] sm:$0xff] %v8071_v54  ;;  %v8087_v27 = vpop.permute.xlu0 %3748  ;;  %4216 = vrot.lane.b32.xlu1 %v7665_v43, %s6052_s23  ;;  %v8101_v13 = vmul.f32 %v8075_v61, %v3766_v7 }
 0x806   :  { %v3767_v50 = vsel %vm712_vm6, %v7886_v2, %v8087_v27  ;;  %9595 = vst [vmem:[#allocation96_spill] sm:$0xff] %v8108_v32  ;;  %v3460_v2 = vsel %vm241_vm2, %v7848_v9, %v8021_v56 }
 0x807   :  { %9593 = vst [vmem:[#allocation94_spill] sm:$0xff] %v8101_v13  ;;  %v8104_v6 = vmul.f32 %v8075_v61, %v3767_v50  ;;  %v8110_v43 = vpop.permute.xlu1 %3902  ;;  %4018 = vrot.lane.b32.xlu0 %v7703_v40, %s6050_s11  ;;  %v8127_v50 = vld [vmem:[%s9339_s13 + $0x6] ss:$8 sm:$0xf] }
 0x808   :  { %v3922_v54 = vsel %vm1021_vm7, %v7890_v59, %v8110_v43  ;;  %9596 = vst [vmem:[#allocation97_spill] sm:$0xff] %v8127_v50  ;;  %v8141_v13 = vrot.slane %v8127_v50, %v9524_v26 }
 0x809   :  { %9594 = vst [vmem:[#allocation95_spill] sm:$0xff] %v8104_v6  ;;  %v8120_v52 = vpop.permute.xlu0 %3904  ;;  %4196 = vrot.lane.b32.xlu1 %v7595_v37, %s6052_s23  ;;  %v8134_v59 = vmul.f32 %v8108_v32, %v3922_v54  ;;  %v8160_v54 = vld [vmem:[%s9339_s13 + $0x7] ss:$8 sm:$0xf] }
 0x80a   :  { %v3923_v61 = vsel %vm1021_vm7, %v7894_v53, %v8120_v52  ;;  %9599 = vst [vmem:[#allocation100_spill] sm:$0xff] %v8141_v13  ;;  %9600 = vst [vmem:[#allocation101_spill] sm:$0xff] %v8160_v54 }
 0x80b   :  { %9597 = vst [vmem:[#allocation98_spill] sm:$0xff] %v8134_v59  ;;  %v8137_v7 = vmul.f32 %v8108_v32, %v3923_v61  ;;  %v8143_v37 = vpop.permute.xlu1 %4004  ;;  %4206 = vrot.lane.b32.xlu0 %v7611_v23, %s6052_s23 }
 0x80c   :  { %v4024_v53 = vsel %vm1182_vm8, %v7898_v12, %v8143_v37 }
 0x80d   :  { %9598 = vst [vmem:[#allocation99_spill] sm:$0xff] %v8137_v7  ;;  %v8151_v6 = vpop.permute.xlu0 %4006  ;;  %4204 = vrot.lane.b32.xlu1 %v7601_v62, %s6052_s23  ;;  %v8167_v32 = vmul.f32 %v8141_v13, %v4024_v53  ;;  %v8174_v62 = vrot.slane %v8160_v54, %v9524_v26 }
 0x80e   :  { %v4025_v23 = vsel %vm1182_vm8, %v7902_v39, %v8151_v6  ;;  %v8220_v39 = vrot.slane %v7838_v46, %v9537_v15 }
 0x80f   :  { %9601 = vst [vmem:[#allocation102_spill] sm:$0xff] %v8167_v32  ;;  %v8170_v12 = vmul.f32 %v8141_v13, %v4025_v23  ;;  %9603 = vst [vmem:[#allocation104_spill] sm:$0xff] %v8174_v62  ;;  %v8176_v61 = vpop.permute.xlu1 %4106  ;;  %4120 = vrot.lane.b32.xlu0 %v7703_v40, %s6051_s28  ;;  %v3467_v23 = vsel %vm241_vm2, %v7918_v17, %v7974_v35  ;;  %v4410_v17 = vld [vmem:[#allocation11] sm:$0xff] }
 0x810   :  { %v4126_v59 = vsel %vm1343_vm9, %v7906_v22, %v8176_v61  ;;  %v8200_v22 = vrot.slane %v7838_v46, %v9523_v25  ;;  %v3496_v9 = vmul.f32 %v8220_v39, %v3460_v2  ;;  %v4413_v2 = vld [vmem:[#allocation11 + $0x18] sm:$0xff] }
 0x811   :  { %9602 = vst [vmem:[#allocation103_spill] sm:$0xff] %v8170_v12  ;;  %v8184_v7 = vpop.permute.xlu0 %4108  ;;  %4212 = vrot.lane.b32.xlu1 %v7693_v47, %s6052_s23  ;;  %v3461_v47 = vsel %vm241_vm2, %v7856_v10, %v8025_v18  ;;  %v8207_v53 = vmul.f32 %v8174_v62, %v4126_v59  ;;  %v8214_v12 = vrot.slane %v7838_v46, %v9538_v19 }
 0x812   :  { %v4127_v13 = vsel %vm1343_vm9, %v7910_v24, %v8184_v7 }
 0x813   :  { %9604 = vst [vmem:[#allocation105_spill] sm:$0xff] %v8207_v53  ;;  %v8210_v32 = vmul.f32 %v8174_v62, %v4127_v13  ;;  %9606 = vst [vmem:[#allocation107_spill] sm:$0xff] %v8214_v12  ;;  %v3449_v24 = vpop.permute.xlu1 %3448  ;;  %4214 = vrot.lane.b32.xlu0 %v7699_v3, %s6052_s23  ;;  %v3466_v13 = vsel %vm241_vm2, %v7914_v4, %v7970_v57  ;;  %v3507_v62 = vmul.f32 %v7846_v44, %v3467_v23  ;;  %v4412_v57 = vld [vmem:[#allocation11 + $0x10] sm:$0xff] }
 0x814   :  { %v3456_v10 = vsel %vm241_vm2, %v8021_v56, %v3449_v24  ;;  %v3468_v59 = vsel %vm241_vm2, %v3449_v24, %v7783_v63  ;;  %v3500_v24 = vmul.f32 %v8220_v39, %v3461_v47 }
 0x815   :  { %9605 = vst [vmem:[#allocation106_spill] sm:$0xff] %v8210_v32  ;;  %v3451_v3 = vpop.permute.xlu0 %3450  ;;  %4220 = vrot.lane.b32.xlu1 %v7697_v8, %s6052_s23  ;;  %v3494_v8 = vmul.f32 %v8200_v22, %v3468_v59  ;;  %v3497_v46 = vmul.f32 %v8214_v12, %v3456_v10 }
 0x816   :  { %v3457_v63 = vsel %vm241_vm2, %v8025_v18, %v3451_v3  ;;  %v3469_v23 = vsel %vm241_vm2, %v3451_v3, %v7787_v20  ;;  %v3503_v18 = vmul.f32 %v7846_v44, %v3466_v13  ;;  %v4411_v3 = vld [vmem:[#allocation11 + $0x8] sm:$0xff]  ;;  %v2933_v44 = vld [vmem:[#allocation10] sm:$0xff] }
 0x817   :  { %v3498_v53 = vmul.f32 %v8200_v22, %v3469_v23  ;;  %v3501_v32 = vmul.f32 %v8214_v12, %v3457_v63  ;;  %v8252_v56 = vpop.permute.xlu1 %3550  ;;  %4222 = vrot.lane.b32.xlu0 %v7703_v40, %s6052_s23  ;;  %v3512_v23 = vpack.c.bf16 %v3500_v24, %v3496_v9  ;;  %v8262_v63 = vrot.slane %v8040_v16, %v9538_v19 }
 0x818   :  { %v3515_v10 = vpack.c.bf16 %v3507_v62, %v3503_v18  ;;  %v2935_v18 = vld [vmem:[#allocation10 + $0x10] sm:$0xff] }
 0x819   :  { %v3510_v47 = vpack.c.bf16 %v3498_v53, %v3494_v8  ;;  %v8258_v20 = vpop.permute.xlu0 %3552  ;;  %4416 = vperm.xlu1 %5539, %v4410_v17   ;;  %v3513_v59 = vpack.c.bf16 %v3501_v32, %v3497_v46  ;;  %v2934_v46 = vld [vmem:[#allocation10 + $0x8] sm:$0xff] }
 0x81b   :  { %v8264_v12 = vpop.permute.xlu1 %3652  ;;  %4498 = vmatpush1.bf16.msra.mxu0 %v3510_v47  ;;  %4603 = vmatprep.subr.bf16.mxu1 %v3513_v59  ;;  %v8312_v59 = vrot.slane %v8094_v51, %v9538_v19 }
 0x81c   :  { %v3660_v40 = vsel %vm551_vm5, %v8046_v21, %v8264_v12  ;;  %4421 = vperm.xlu0 %5538, %v4411_v3   ;;  %4499 = vmatprep.subr.bf16.mxu0 %v3515_v10  ;;  %v8284_v21 = vrot.slane %v8061_v14, %v9538_v19 }
 0x81d   :  { %4604 = vmatpush1.bf16.msra.mxu1 %v3512_v23  ;;  %v8270_v32 = vpop.permute.xlu0 %3654  ;;  %4426 = vperm.xlu1 %5539, %v4412_v57   ;;  %v8277_v62 = vmul.f32 %v8262_v63, %v3660_v40  ;;  %9608 = vst [vmem:[#allocation109_spill] sm:$0xff] %v8312_v59  ;;  %v2936_v40 = vld [vmem:[#allocation10 + $0x18] sm:$0x7] }
 0x81e   :  { %v3661_v17 = vsel %vm551_vm5, %v8054_v1, %v8270_v32 }
 0x81f   :  { %v8280_v53 = vmul.f32 %v8262_v63, %v3661_v17  ;;  %v8286_v13 = vpop.permute.xlu1 %3754 }
 0x820   :  { %v3762_v57 = vsel %vm712_vm6, %v8077_v34, %v8286_v13  ;;  %4431 = vperm.xlu0 %5538, %v4413_v2   ;;  %v8308_v34 = vrot.slane %v8094_v51, %v9537_v15  ;;  %v3046_v2 = vld [vmem:[#allocation16] sm:$0xff] }
 0x821   :  { %v8292_v1 = vpop.permute.xlu0 %3756  ;;  %2939 = vperm.xlu1 %5539, %v2933_v44   ;;  %v8301_v9 = vmul.f32 %v8284_v21, %v3762_v57  ;;  %v8334_v57 = vrot.slane %v8127_v50, %v9538_v19  ;;  %vm3050_vm13 = vcmp.gt.f32.partialorder %v3046_v2, 0.5 }
 0x822   :  { %v3763_v8 = vsel %vm712_vm6, %v8087_v27, %v8292_v1  ;;  %9607 = vst [vmem:[#allocation108_spill] sm:$0xff] %v8308_v34 }
 0x823   :  { %v8304_v47 = vmul.f32 %v8284_v21, %v3763_v8  ;;  %v3911_v3 = vpop.permute.xlu1 %3910  ;;  %9610 = vst [vmem:[#allocation111_spill] sm:$0xff] %v8334_v57 }
 0x824   :  { %v3918_v27 = vsel %vm1021_vm7, %v8110_v43, %v3911_v3  ;;  %v3930_v10 = vsel %vm1021_vm7, %v3911_v3, %v7815_v36  ;;  %2944 = vperm.xlu0 %5538, %v2934_v46   ;;  %v8330_v43 = vrot.slane %v8127_v50, %v9537_v15  ;;  %v4751_v46 = vld [vmem:[#allocation14] sm:$0xff]  ;;  %v9644_v36 = vld [vmem:[#allocation107_spill] sm:$0xff] }
 0x825   :  { %v3913_v23 = vpop.permute.xlu0 %3912  ;;  %2949 = vperm.xlu1 %5539, %v2935_v18   ;;  %v8337_v8 = vmul.f32 %v8308_v34, %v3918_v27  ;;  %v8340_v18 = vmul.f32 %v8312_v59, %v3930_v10 }
 0x826   :  { %v3919_v17 = vsel %vm1021_vm7, %v8120_v52, %v3913_v23  ;;  %v3931_v44 = vsel %vm1021_vm7, %v3913_v23, %v7819_v33  ;;  %9609 = vst [vmem:[#allocation110_spill] sm:$0xff] %v8330_v43 }
 0x827   :  { %9611 = vst [vmem:[#allocation112_spill] sm:$0xff] %v8337_v8  ;;  %9612 = vst [vmem:[#allocation113_spill] sm:$0xff] %v8340_v18  ;;  %v8343_v52 = vmul.f32 %v8308_v34, %v3919_v17  ;;  %v8346_v3 = vmul.f32 %v8312_v59, %v3931_v44  ;;  %v4013_v23 = vpop.permute.xlu1 %4012  ;;  %v8358_v17 = vrot.slane %v8160_v54, %v9537_v15  ;;  %v4752_v44 = vld [vmem:[#allocation14 + $0x8] sm:$0xff]  ;;  %v3048_v34 = vld [vmem:[#allocation16 + $0x10] sm:$0xff] }
 0x828   :  { %v4020_v24 = vsel %vm1182_vm8, %v8143_v37, %v4013_v23  ;;  %v4032_v27 = vsel %vm1182_vm8, %v4013_v23, %v7823_v5  ;;  %2954 = vperm.xlu0 %5538, %v2936_v40   ;;  %v8370_v23 = vrot.slane %v8160_v54, %v9538_v19  ;;  %vm3052_vm1 = vcmp.gt.f32.partialorder %v3048_v34, 0.5 }
 0x829   :  { %9613 = vst [vmem:[#allocation114_spill] sm:$0xff] %v8343_v52  ;;  %9614 = vst [vmem:[#allocation115_spill] sm:$0xff] %v8346_v3  ;;  %v4015_v50 = vpop.permute.xlu0 %4014  ;;  %4757 = vperm.xlu1 %5539, %v4751_v46   ;;  %v4753_v46 = vld [vmem:[#allocation14 + $0x10] sm:$0xff]  ;;  %v8373_v10 = vmul.f32 %v8330_v43, %v4020_v24  ;;  %v8376_v8 = vmul.f32 %v8334_v57, %v4032_v27  ;;  %v9632_v3 = vld [vmem:[#allocation78_spill] sm:$0xff] }
 0x82a   :  { %9615 = vst [vmem:[#allocation116_spill] sm:$0xff] %v8358_v17  ;;  %v4021_v37 = vsel %vm1182_vm8, %v8151_v6, %v4015_v50  ;;  %v4033_v40 = vsel %vm1182_vm8, %v4015_v50, %v7827_v41  ;;  %9616 = vst [vmem:[#allocation117_spill] sm:$0xff] %v8370_v23  ;;  %v3047_v50 = vld [vmem:[#allocation16 + $0x8] sm:$0xff] }
 0x82b   :  { %9617 = vst [vmem:[#allocation118_spill] sm:$0xff] %v8373_v10  ;;  %9618 = vst [vmem:[#allocation119_spill] sm:$0xff] %v8376_v8  ;;  %v8379_v59 = vmul.f32 %v8330_v43, %v4021_v37  ;;  %v8382_v6 = vmul.f32 %v8334_v57, %v4033_v40  ;;  %v4115_v52 = vpop.permute.xlu1 %4114  ;;  %v4754_v37 = vld [vmem:[#allocation14 + $0x18] sm:$0x7]  ;;  %v3062_v40 = vsel %vm3050_vm13, 1, %v9518_v45  ;;  %vm3051_vm14 = vcmp.gt.f32.partialorder %v3047_v50, 0.5 }
 0x82c   :  { %v4122_v18 = vsel %vm1343_vm9, %v8176_v61, %v4115_v52  ;;  %v4134_v24 = vsel %vm1343_vm9, %v4115_v52, %v7831_v38  ;;  %4762 = vperm.xlu0 %5538, %v4752_v44   ;;  %v8459_v8 = vrot.slane %v8040_v16, %v9524_v26  ;;  %v3089_v38 = vld [vmem:[#allocation17 + $0x18] sm:$0x7]  ;;  %vm9636_vm13 = vmmov %vm9626_vm0 }
 0x82d   :  { %9619 = vst [vmem:[#allocation120_spill] sm:$0xff] %v8379_v59  ;;  %9620 = vst [vmem:[#allocation121_spill] sm:$0xff] %v8382_v6  ;;  %v4117_v27 = vpop.permute.xlu0 %4116  ;;  %4767 = vperm.xlu1 %5539, %v4753_v46   ;;  %v8402_v44 = vmul.f32 %v8358_v17, %v4122_v18  ;;  %v8405_v46 = vmul.f32 %v8370_v23, %v4134_v24  ;;  %v3063_v18 = vsel %vm3051_vm14, 1, %v9518_v45 }
 0x82e   :  { %v4123_v61 = vsel %vm1343_vm9, %v8184_v7, %v4117_v27  ;;  %v4135_v52 = vsel %vm1343_vm9, %v4117_v27, %v7840_v31  ;;  %v3049_v7 = vld [vmem:[#allocation16 + $0x18] sm:$0x7]  ;;  %v3064_v27 = vsel %vm3052_vm1, 1, %v9518_v45  ;;  %v8469_v6 = vrot.slane %v8061_v14, %v9524_v26  ;;  %vm9638_vm14 = vmmov %vm9626_vm0 }
 0x82f   :  { %9621 = vst [vmem:[#allocation122_spill] sm:$0xff] %v8402_v44  ;;  %9622 = vst [vmem:[#allocation123_spill] sm:$0xff] %v8405_v46  ;;  %v8408_v2 = vmul.f32 %v8358_v17, %v4123_v61  ;;  %v8411_v57 = vmul.f32 %v8370_v23, %v4135_v52  ;;  %v8413_v10 = vpop.permute.xlu1 %3444  ;;  %vm3053_vm15 = vcmp.gt.f32.partialorder %v3049_v7, 0.5  ;;  %v4996_v44 = vld [vmem:[#allocation16 + $0x18] sm:$0x7] }
 0x830   :  { %4772 = vperm.xlu0 %5538, %v4754_v37   ;;  %v3065_v37 = vsel %vm3053_vm15, 1, %v9518_v45  ;;  %vm5000_vm4 = vcmp.gt.f32.partialorder %v4996_v44, 0.5  ;;  %v5311_v46 = vld [vmem:[%s9339_s13 + $0x1] ss:$8 sm:$0xf]  ;;  %vm9639_vm1 = vmmov %vm9626_vm0 }
 0x831   :  { %9623 = vst [vmem:[#allocation124_spill] sm:$0xff] %v8408_v2  ;;  %9624 = vst [vmem:[#allocation125_spill] sm:$0xff] %v8411_v57  ;;  %3067 = vperm.xlu1 %5539, %v3062_v40   ;;  %v8417_v34 = vpop.permute.xlu0 %3446  ;;  %v5036_v23 = vsel %vm5000_vm4, 1, %v9518_v45  ;;  %v3086_v57 = vld [vmem:[#allocation17] sm:$0xff]  ;;  %v3583_v44 = vrot.slane %v5311_v46, %v9524_v26  ;;  %v3088_v45 = vld [vmem:[#allocation17 + $0x10] sm:$0xff] }
 0x832   :  { %vm9640_vm15 = vmmov %vm9626_vm0 }
 0x833   :  { %v8423_v61 = vpop.permute.xlu1 %3546  ;;  %vm9641_vm4 = vmmov %vm9626_vm0 }
 0x834   :  { %3070 = vperm.xlu0 %5538, %v3063_v18  }
 0x835   :  { %3073 = vperm.xlu1 %5539, %v3064_v27   ;;  %v8425_v52 = vpop.permute.xlu0 %3548 }
 0x837   :  { %v8428_v50 = vpop.permute.xlu1 %3648 }
 0x838   :  { %3076 = vperm.xlu0 %5538, %v3065_v37   ;;  %v3566_v37 = vsel %vm9628_vm10, %v7791_v48, %v7866_v42  ;;  %vm9648_vm10 = vmmov %vm9626_vm0 }
 0x839   :  { %5038 = vperm.xlu1 %5539, %v3062_v40   ;;  %v8430_v2 = vpop.permute.xlu0 %3650  ;;  %v3567_v40 = vsel %vm9626_vm0, %v7795_v0, %v7870_v11 }
 0x83a   :  { %v8453_v59 = vmul.f32 %v3583_v44, %v3567_v40  ;;  %v3569_v40 = vsel %vm9630_vm11, %v7926_v29, %v7982_v58  ;;  %vm9649_vm11 = vmmov %vm9626_vm0 }
 0x83b   :  { %v8432_v24 = vpop.permute.xlu1 %3750  ;;  %v8512_v54 = vmul.f32 %v3583_v44, %v3569_v40 }
 0x83c   :  { %5041 = vperm.xlu0 %5538, %v3063_v18  }
 0x83d   :  { %5044 = vperm.xlu1 %5539, %v3064_v27   ;;  %v8434_v7 = vpop.permute.xlu0 %3752  ;;  %v3087_v27 = vld [vmem:[#allocation17 + $0x8] sm:$0xff] }
 0x83f   :  { %v8440_v17 = vpop.permute.xlu1 %3906 }
 0x840   :  { %9625 = vst [vmem:[#allocation126_spill] sm:$0xff] %v8440_v17  ;;  %5047 = vperm.xlu0 %5538, %v5036_v23   ;;  %v8465_v23 = vmul.f32 %v3583_v44, %v3566_v37  ;;  %v8490_v37 = vrot.slane %v5311_v46, %v9538_v19  ;;  %v9635_v17 = vld [vmem:[#allocation87_spill] sm:$0xff] }
 0x841   :  { %3092 = vperm.xlu1 %5539, %v3086_v57   ;;  %v8447_v18 = vpop.permute.xlu0 %3908  ;;  %v3669_v57 = vsel %vm551_vm5, %v7803_v55, %v7878_v60  ;;  %v8484_v60 = vsel %vm551_vm5, %v7799_v28, %v7874_v30  ;;  %v9633_v30 = vld [vmem:[#allocation66_spill] sm:$0xff] }
 0x842   :  { %9627 = vst [vmem:[#allocation127_spill] sm:$0xff] %v8447_v18  ;;  %v8500_v26 = vmul.f32 %v8459_v8, %v3669_v57  ;;  %v3562_v57 = vsel %vm9636_vm13, %v7866_v42, %v9635_v17  ;;  %v9643_v18 = vld [vmem:[#allocation65_spill] sm:$0xff]  ;;  %vm9653_vm13 = vmmov %vm9626_vm0 }
 0x843   :  { %v8455_v43 = vpop.permute.xlu1 %4008 }
 0x844   :  { %9629 = vst [vmem:[#allocation128_spill] sm:$0xff] %v8455_v43  ;;  %3097 = vperm.xlu0 %5538, %v3087_v27   ;;  %v8476_v43 = vrot.slane %v5311_v46, %v9537_v15  ;;  %v8487_v27 = vrot.slane %v5311_v46, %v9523_v25  ;;  %v8494_v15 = vrot.slane %v8040_v16, %v9523_v25 }
 0x845   :  { %3102 = vperm.xlu1 %5539, %v3088_v45   ;;  %v8478_v31 = vpop.permute.xlu0 %4010  ;;  %v5069_v45 = vld [vmem:[%s9345_s19] sm:$0xff]  ;;  %v3463_v46 = vsel %vm241_vm2, %v7974_v35, %v8417_v34  ;;  %v3613_v16 = vpack.c.bf16 %v8453_v59, %v8465_v23  ;;  %v3558_v23 = vsel %vm9639_vm1, %v9635_v17, %v8252_v56 }
 0x846   :  { %9631 = vst [vmem:[#allocation129_spill] sm:$0xff] %v8478_v31  ;;  %v3568_v31 = vsel %vm9634_vm12, %v9633_v30, %v9632_v3  ;;  %v9637_v35 = vld [vmem:[#allocation88_spill] sm:$0xff]  ;;  %v3508_v40 = vmul.f32 %v8220_v39, %v3463_v46  ;;  %vm9652_vm12 = vmmov %vm9626_vm0 }
 0x847   :  { %v3453_v19 = vpop.permute.xlu1 %3452  ;;  %v3563_v59 = vsel %vm9638_vm14, %v7870_v11, %v9637_v35  ;;  %v3559_v42 = vsel %vm9640_vm15, %v9637_v35, %v8258_v20  ;;  %v5070_v11 = vld [vmem:[%s9345_s19 + $0x8] sm:$0xff]  ;;  %v3605_v33 = vmul.f32 %v3583_v44, %v3568_v31  ;;  %v5072_v31 = vld [vmem:[%s9345_s19 + $0x18] sm:$0x7]  ;;  %vm9654_vm14 = vmmov %vm9626_vm0 }
 0x848   :  { %v3458_v41 = vsel %vm241_vm2, %v8413_v10, %v3453_v19  ;;  %v3470_v5 = vsel %vm241_vm2, %v3453_v19, %v7914_v4  ;;  %3107 = vperm.xlu0 %5538, %v3089_v38   ;;  %v3571_v19 = vsel %vm9641_vm4, %v8258_v20, %v7795_v0  ;;  %v9642_v38 = vld [vmem:[#allocation77_spill] sm:$0xff]  ;;  %v5071_v20 = vld [vmem:[%s9345_s19 + $0x10] sm:$0xff] }
 0x849   :  { %5075 = vperm.xlu1 %5539, %v5069_v45   ;;  %v3455_v4 = vpop.permute.xlu0 %3454  ;;  %v3462_v17 = vsel %vm241_vm2, %v9642_v38, %v8413_v10  ;;  %v3502_v45 = vmul.f32 %v8200_v22, %v3470_v5  ;;  %v3505_v51 = vmul.f32 %v9644_v36, %v3458_v41  ;;  %v3600_v5 = vmul.f32 %v8487_v27, %v3571_v19 }
 0x84a   :  { %v3459_v35 = vsel %vm241_vm2, %v8417_v34, %v3455_v4  ;;  %v3471_v0 = vsel %vm241_vm2, %v3455_v4, %v9643_v18  ;;  %v3602_v34 = vmul.f32 %v8476_v43, %v3563_v59  ;;  %vm9645_vm2 = vmmov %vm9626_vm0  ;;  %v3603_v4 = vmul.f32 %v8490_v37, %v3559_v42  ;;  %v9646_v59 = vld [vmem:[#allocation79_spill] sm:$0xff] }
 0x84b   :  { %v3506_v10 = vmul.f32 %v8200_v22, %v3471_v0  ;;  %v3509_v46 = vmul.f32 %v9644_v36, %v3459_v35  ;;  %v8561_v38 = vpop.permute.xlu1 %4102  ;;  %v3570_v18 = vsel %vm9645_vm2, %v8252_v56, %v7791_v48  ;;  %v3504_v41 = vmul.f32 %v8220_v39, %v3462_v17  ;;  %v9647_v35 = vld [vmem:[#allocation67_spill] sm:$0xff] }
 0x84c   :  { %5080 = vperm.xlu0 %5538, %v5070_v11   ;;  %v3670_v48 = vsel %vm551_vm5, %v9647_v35, %v9646_v59  ;;  %v3598_v56 = vmul.f32 %v8476_v43, %v3562_v57  ;;  %v3599_v42 = vmul.f32 %v8490_v37, %v3558_v23  ;;  %v3617_v39 = vpack.c.bf16 %v8512_v54, %v3605_v33  ;;  %v9650_v54 = vld [vmem:[#allocation80_spill] sm:$0xff] }
 0x84d   :  { %v3514_v22 = vpack.c.bf16 %v3506_v10, %v3502_v45  ;;  %5085 = vperm.xlu1 %5539, %v5071_v20   ;;  %v8571_v36 = vpop.permute.xlu0 %4104  ;;  %v3517_v44 = vpack.c.bf16 %v3509_v46, %v3505_v51  ;;  %v3596_v19 = vmul.f32 %v8487_v27, %v3570_v18  ;;  %v3516_v11 = vpack.c.bf16 %v3508_v40, %v3504_v41  ;;  %v9651_v23 = vld [vmem:[#allocation68_spill] sm:$0xff]  ;;  %v9656_v41 = vld [vmem:[#allocation51_spill] sm:$0xff] }
 0x84e   :  { %v3565_v17 = vsel %vm9626_vm0, %v7982_v58, %v8425_v52  ;;  %v3615_v33 = vpack.c.bf16 %v3603_v4, %v3599_v42  ;;  %v3671_v40 = vsel %vm551_vm5, %v9651_v23, %v9650_v54  ;;  %v3614_v58 = vpack.c.bf16 %v3602_v34, %v3598_v56  ;;  %v9657_v56 = vld [vmem:[#allocation26_spill] sm:$0xff] }
 0x84f   :  { %v3555_v51 = vpop.permute.xlu1 %3554  ;;  %4500 = vmatpush1.bf16.msra.mxu0 %v3514_v22  ;;  %4605 = vmatprep.subr.bf16.mxu1 %v3517_v44  ;;  %v3612_v20 = vpack.c.bf16 %v3600_v5, %v3596_v19  ;;  %v3673_v45 = vsel %vm551_vm5, %v8270_v32, %v7803_v55  ;;  %v9655_v5 = vld [vmem:[#allocation58_spill] sm:$0xff]  ;;  %v3672_v22 = vsel %vm551_vm5, %v8264_v12, %v7799_v28 }
 0x850   :  { %v3560_v0 = vsel %vm9648_vm10, %v8423_v61, %v3555_v51  ;;  %v3572_v57 = vsel %vm9649_vm11, %v3555_v51, %v9633_v30  ;;  %5090 = vperm.xlu0 %5538, %v5072_v31   ;;  %4501 = vmatprep.subr.bf16.mxu0 %v3613_v16  ;;  %v3564_v30 = vsel %vm9652_vm12, %v9632_v3, %v8423_v61  ;;  %v9658_v42 = vld [vmem:[#allocation50_spill] sm:$0xff] }
 0x851   :  { %4606 = vmatpush1.bf16.msra.mxu1 %v3516_v11  ;;  %v3557_v10 = vpop.permute.xlu0 %3556  ;;  %v3610_v16 = vmul.f32 %v8476_v43, %v3565_v17  ;;  %v3604_v55 = vmul.f32 %v8487_v27, %v3572_v57  ;;  %v3607_v32 = vmul.f32 %v8490_v37, %v3560_v0  ;;  %v3699_v61 = vmul.f32 %v8459_v8, %v8484_v60 }
 0x852   :  { %4607 = vmatprep.subr.bf16.mxu1 %v3615_v33  ;;  %v3561_v46 = vsel %vm9653_vm13, %v8425_v52, %v3557_v10  ;;  %v3573_v34 = vsel %vm9654_vm14, %v3557_v10, %v7926_v29  ;;  %v3771_v52 = vsel %vm712_vm6, %v9656_v41, %v9655_v5  ;;  %v3711_v29 = vmul.f32 %v8459_v8, %v3671_v40  ;;  %v9661_v33 = vld [vmem:[#allocation82_spill] sm:$0xff] }
 0x853   :  { %v3608_v18 = vmul.f32 %v8487_v27, %v3573_v34  ;;  %v3611_v4 = vmul.f32 %v8490_v37, %v3561_v46  ;;  %v3657_v3 = vpop.permute.xlu1 %3656  ;;  %4502 = vmatpush1.bf16.msra.mxu0 %v3612_v20  ;;  %v3702_v27 = vmul.f32 %v8494_v15, %v3673_v45  ;;  %v3606_v37 = vmul.f32 %v8476_v43, %v3564_v30  ;;  %v9663_v30 = vld [vmem:[#allocation89_spill] sm:$0xff] }
 0x854   :  { %4503 = vmatprep.subr.bf16.mxu0 %v3617_v39  ;;  %v3770_v19 = vsel %vm712_vm6, %v9658_v42, %v9657_v56  ;;  %v3707_v11 = vmul.f32 %v8459_v8, %v3670_v48  ;;  %v8639_v28 = vrot.slane %v8061_v14, %v9523_v25  ;;  %v3715_v12 = vpack.c.bf16 %v8500_v26, %v3699_v61  ;;  %v9659_v8 = vld [vmem:[#allocation81_spill] sm:$0xff] }
 0x855   :  { %v3616_v31 = vpack.c.bf16 %v3608_v18, %v3604_v55  ;;  %4608 = vmatpush1.bf16.msra.mxu1 %v3614_v58  ;;  %v8630_v60 = vpop.permute.xlu0 %4112  ;;  %v3619_v44 = vpack.c.bf16 %v3611_v4, %v3607_v32  ;;  %v3698_v43 = vmul.f32 %v8494_v15, %v3672_v22  ;;  %v3618_v39 = vpack.c.bf16 %v3610_v16, %v3606_v37  ;;  %v9660_v48 = vld [vmem:[#allocation69_spill] sm:$0xff] }
 0x856   :  { %v3667_v17 = vsel %vm551_vm5, %v9650_v54, %v8430_v2  ;;  %v3805_v0 = vmul.f32 %v8469_v6, %v3771_v52  ;;  %v3772_v14 = vsel %vm712_vm6, %v9660_v48, %v9659_v8  ;;  %v3662_v26 = vsel %vm551_vm5, %v8428_v50, %v3657_v3  ;;  %v9662_v54 = vld [vmem:[#allocation70_spill] sm:$0xff] }
 0x857   :  { %v3759_v51 = vpop.permute.xlu1 %3758  ;;  %4504 = vmatpush1.bf16.msra.mxu0 %v3616_v31  ;;  %4609 = vmatprep.subr.bf16.mxu1 %v3619_v44  ;;  %v3674_v57 = vsel %vm551_vm5, %v3657_v3, %v9647_v35  ;;  %v3773_v40 = vsel %vm712_vm6, %v9662_v54, %v9661_v33  ;;  %v3714_v58 = vpack.c.bf16 %v3702_v27, %v3698_v43  ;;  %v9665_v3 = vld [vmem:[#allocation91_spill] sm:$0xff] }
 0x858   :  { %4505 = vmatprep.subr.bf16.mxu0 %v3715_v12  ;;  %v3775_v20 = vsel %vm712_vm6, %v8292_v1, %v9656_v41  ;;  %v3719_v10 = vpack.c.bf16 %v3711_v29, %v3707_v11  ;;  %v3666_v35 = vsel %vm551_vm5, %v9646_v59, %v8428_v50  ;;  %v3712_v16 = vmul.f32 %v9663_v30, %v3667_v17  ;;  %v9668_v11 = vld [vmem:[#allocation92_spill] sm:$0xff] }
 0x859   :  { %4610 = vmatpush1.bf16.msra.mxu1 %v3618_v39  ;;  %v3659_v45 = vpop.permute.xlu0 %3658  ;;  %v9664_v46 = vpack.c.bf16 %v8280_v53, %v8277_v62  ;;  %v3706_v55 = vmul.f32 %v8494_v15, %v3674_v57  ;;  %v3709_v32 = vmul.f32 %v8262_v63, %v3662_v26  ;;  %v3801_v62 = vmul.f32 %v8469_v6, %v3770_v19  ;;  %v9671_v26 = vld [vmem:[#allocation94_spill] sm:$0xff] }
 0x85a   :  { %v3663_v34 = vsel %vm551_vm5, %v8430_v2, %v3659_v45  ;;  %v3675_v1 = vsel %vm551_vm5, %v3659_v45, %v9651_v23  ;;  %v3813_v53 = vmul.f32 %v8469_v6, %v3773_v40  ;;  %v3774_v2 = vsel %vm712_vm6, %v8286_v13, %v9658_v42 }
 0x85b   :  { %4611 = vmatprep.subr.bf16.mxu1 %v9664_v46  ;;  %v3710_v50 = vmul.f32 %v8494_v15, %v3675_v1  ;;  %v3713_v59 = vmul.f32 %v8262_v63, %v3663_v34  ;;  %v8684_v18 = vpop.permute.xlu1 %3914  ;;  %4506 = vmatpush1.bf16.msra.mxu0 %v3714_v58  ;;  %v3804_v23 = vmul.f32 %v8639_v28, %v3775_v20  ;;  %v9666_v63 = vld [vmem:[#allocation90_spill] sm:$0xff]  ;;  %v9673_v58 = vld [vmem:[#allocation60_spill] sm:$0xff]  ;;  %v9674_v20 = vld [vmem:[#allocation53_spill] sm:$0xff]  ;;  %vm4472_vm5 = vcmask 392192  }
 0x85c   :  { %4507 = vmatprep.subr.bf16.mxu0 %v3719_v10  ;;  %v3708_v4 = vmul.f32 %v9663_v30, %v3666_v35  ;;  %v9667_v61 = vpack.c.bf16 %v9665_v3, %v9666_v63  ;;  %v3809_v52 = vmul.f32 %v8469_v6, %v3772_v14  ;;  %v3817_v29 = vpack.c.bf16 %v3805_v0, %v3801_v62  ;;  %v9670_v14 = vld [vmem:[#allocation95_spill] sm:$0xff]  ;;  %v9675_v10 = vld [vmem:[#allocation33_spill] sm:$0xff]  ;;  %v9676_v35 = vld [vmem:[#allocation34_spill] sm:$0xff] }
 0x85d   :  { %v3718_v15 = vpack.c.bf16 %v3710_v50, %v3706_v55  ;;  %v8697_v5 = vpop.permute.xlu0 %4194  ;;  %v3721_v41 = vpack.c.bf16 %v3713_v59, %v3709_v32  ;;  %v3800_v22 = vmul.f32 %v8639_v28, %v3774_v2  ;;  %v3769_v13 = vsel %vm712_vm6, %v9661_v33, %v8434_v7  ;;  %v9679_v1 = vld [vmem:[#allocation59_spill] sm:$0xff]  ;;  %v9680_v55 = vld [vmem:[#allocation52_spill] sm:$0xff]  ;;  %v9681_v50 = vld [vmem:[#allocation45_spill] sm:$0xff] }
 0x85e   :  { %4612 = vmatpush1.bf16.msra.mxu1 %v9667_v61  ;;  %v3720_v27 = vpack.c.bf16 %v3712_v16, %v3708_v4  ;;  %v3764_v31 = vsel %vm712_vm6, %v8432_v24, %v3759_v51  ;;  %v3776_v6 = vsel %vm712_vm6, %v3759_v51, %v9660_v48  ;;  %v3821_v42 = vpack.c.bf16 %v3813_v53, %v3809_v52  ;;  %v5641_v51 = vld [vmem:[%s9335_s9] ss:$16 sps:$4 sm:$0xff]   ;;  %v9678_v16 = vld [vmem:[#allocation93_spill] sm:$0xff]  ;;  %v9688_v52 = vld [vmem:[#allocation31_spill] sm:$0xff] }
 0x85f   :  { %v8705_v37 = vpop.permute.xlu1 %4016  ;;  %4508 = vmatpush1.bf16.msra.mxu0 %v3718_v15  ;;  %4613 = vmatprep.subr.bf16.mxu1 %v3721_v41  ;;  %v3816_v44 = vpack.c.bf16 %v3804_v23, %v3800_v22  ;;  %v3768_v19 = vsel %vm712_vm6, %v9659_v8, %v8432_v24  ;;  %v3814_v12 = vmul.f32 %v9668_v11, %v3769_v13  ;;  %v9682_v59 = vld [vmem:[#allocation44_spill] sm:$0xff]  ;;  %v9684_v23 = vld [vmem:[#allocation97_spill] sm:$0xff]  ;;  %v9685_v15 = vld [vmem:[#allocation127_spill] sm:$0xff] }
 0x860   :  { %4509 = vmatprep.subr.bf16.mxu0 %v3817_v29  ;;  %v9669_v43 = vpack.c.bf16 %v8304_v47, %v8301_v9  ;;  %v3808_v24 = vmul.f32 %v8639_v28, %v3776_v6  ;;  %v3811_v0 = vmul.f32 %v8284_v21, %v3764_v31  ;;  %v9672_v57 = vpack.c.bf16 %v9670_v14, %v9671_v26  ;;  %v5646_v53 = vld [vmem:[%s9335_s9 + $0x20] ss:$16 sps:$4 sm:$0xff]   ;;  %v5649_v22 = vld [vmem:[%s9335_s9 + $0xc] ss:$16 sps:$4 sm:$0xff]  }
 0x861   :  { %v3761_v56 = vpop.permute.xlu0 %3760  ;;  %v3927_v45 = vsel %vm1021_vm7, %v9674_v20, %v9673_v58  ;;  %v9677_v30 = vpack.c.bf16 %v9675_v10, %v9676_v35  ;;  %v3939_v46 = vrot.slane %v9678_v16, %v9523_v25  ;;  %v3926_v32 = vsel %vm1021_vm7, %v9680_v55, %v9679_v1  ;;  %v9686_v3 = vld [vmem:[#allocation84_spill] sm:$0xff]  ;;  %v9691_v13 = vld [vmem:[#allocation54_spill] sm:$0xff]  ;;  %v9692_v6 = vld [vmem:[#allocation41_spill] sm:$0xff] }
 0x862   :  { %4614 = vmatpush1.bf16.msra.mxu1 %v3720_v27  ;;  %v3765_v39 = vsel %vm712_vm6, %v8434_v7, %v3761_v56  ;;  %v3777_v17 = vsel %vm712_vm6, %v3761_v56, %v9662_v54  ;;  %v3810_v7 = vmul.f32 %v9668_v11, %v3768_v19  ;;  %v9683_v62 = vpack.c.bf16 %v9681_v50, %v9682_v59  ;;  %v9687_v41 = vld [vmem:[#allocation32_spill] sm:$0xff]  ;;  %v9690_v27 = vld [vmem:[#allocation61_spill] sm:$0xff]  ;;  %v9695_v19 = vld [vmem:[#allocation62_spill] sm:$0xff] }
 0x863   :  { %4615 = vmatprep.subr.bf16.mxu1 %v9669_v43  ;;  %v3812_v8 = vmul.f32 %v8639_v28, %v3777_v17  ;;  %v3815_v9 = vmul.f32 %v8284_v21, %v3765_v39  ;;  %v8734_v47 = vpop.permute.xlu1 %4110  ;;  %4510 = vmatpush1.bf16.msra.mxu0 %v3816_v44  ;;  %v5644_v28 = vld [vmem:[%s9335_s9 + $0x24] ss:$16 sps:$4 sm:$0xff]   ;;  %v3960_v2 = vmul.f32 %v3939_v46, %v3927_v45  ;;  %v9696_v11 = vld [vmem:[#allocation55_spill] sm:$0xff]  ;;  %v9708_v45 = vld [vmem:[#allocation101_spill] sm:$0xff]  ;;  %vm9748_vm6 = vcmp.lt.s32.totalorder %v9555_v49, 111 }
 0x864   :  { %4532 = vmatprep.subr.bf16.mxu0 %v3821_v42  ;;  %v3822_v21 = vpack.c.bf16 %v3814_v12, %v3810_v7  ;;  %v8770_v4 = vrot.slane %v9684_v23, %v9523_v25  ;;  %v3925_v63 = vsel %vm1021_vm7, %v9686_v3, %v9685_v15  ;;  %v9689_v29 = vpack.c.bf16 %v9687_v41, %v9688_v52  ;;  %v9693_v44 = vld [vmem:[#allocation40_spill] sm:$0xff]  ;;  %v9697_v43 = vld [vmem:[#allocation126_spill] sm:$0xff]  ;;  %v9698_v39 = vld [vmem:[#allocation83_spill] sm:$0xff] }
 0x865   :  { %v3820_v48 = vpack.c.bf16 %v3812_v8, %v3808_v24  ;;  %v8740_v33 = vpop.permute.xlu0 %4202  ;;  %v3823_v54 = vpack.c.bf16 %v3815_v9, %v3811_v0  ;;  %v4028_v31 = vsel %vm1182_vm8, %v9691_v13, %v9690_v27  ;;  %v9694_v56 = vpack.c.bf16 %v9692_v6, %v9693_v44  ;;  %v9700_v24 = vld [vmem:[#allocation42_spill] sm:$0xff]  ;;  %v9702_v9 = vld [vmem:[#allocation71_spill] sm:$0xff]  ;;  %v9704_v26 = vld [vmem:[#allocation96_spill] sm:$0xff] }
 0x866   :  { %4616 = vmatpush1.bf16.msra.mxu1 %v9672_v57  ;;  %4512 = vmatmul.mubr.bf16.vlgmr.msra.gmra.mrb[32].mxu0 %v5641_v51  ;;  %v3956_v42 = vmul.f32 %v3939_v46, %v3926_v32  ;;  %v4029_v12 = vsel %vm1182_vm8, %v9696_v11, %v9695_v19  ;;  %v3924_v17 = vsel %vm1021_vm7, %v9698_v39, %v9697_v43  ;;  %v9710_v16 = vld [vmem:[#allocation38_spill] sm:$0xff]  ;;  %v9712_v59 = vld [vmem:[#allocation99_spill] sm:$0xff]  ;;  %v9718_v13 = vld [vmem:[#allocation129_spill] sm:$0xff] }
 0x867   :  { %v8745_v40 = vpop.permute.xlu1 %4118  ;;  %4533 = vmatpush1.bf16.msra.mxu0 %v3820_v48  ;;  %4638 = vmatprep.subr.bf16.mxu1 %v3823_v54  ;;  %v3928_v7 = vsel %vm1021_vm7, %v9702_v9, %v9698_v39  ;;  %v9703_v48 = vld [vmem:[#allocation72_spill] sm:$0xff]  ;;  %v3969_v57 = vmul.f32 %v9704_v26, %v3925_v63  ;;  %v9705_v54 = vld [vmem:[#allocation49_spill] sm:$0xff]  ;;  %v8817_v20 = vmul.f32 %v8770_v4, %v4028_v31  ;;  %v9715_v41 = vld [vmem:[#allocation47_spill] sm:$0xff] }
 0x868   :  { %4534 = vmatprep.subr.bf16.mxu0 %v9677_v30  ;;  %4521 = vmatprep.mubr.bf16.mxu0 %v5644_v28  ;;  %v3929_v14 = vsel %vm1021_vm7, %v9703_v48, %v9686_v3  ;;  %v3972_v58 = vpack.c.bf16 %v3960_v2, %v3956_v42  ;;  %v8821_v10 = vrot.slane %v9708_v45, %v9523_v25  ;;  %v9709_v30 = vld [vmem:[#allocation39_spill] sm:$0xff]  ;;  %v9716_v52 = vld [vmem:[#allocation46_spill] sm:$0xff]  ;;  %v9721_v44 = vld [vmem:[#allocation113_spill] sm:$0xff] }
 0x869   :  { %4618 = vmatmul.mubr.bf16.vlgmr.msra.gmra.mrb[32].mxu1 %v5641_v51  ;;  %v8756_v34 = vpop.permute.xlu0 %4210  ;;  %v9699_v51 = vld [vmem:[#allocation43_spill] sm:$0xff]  ;;  %v9711_v1 = vpack.c.bf16 %v9709_v30, %v9710_v16  ;;  %v3965_v55 = vmul.f32 %v9704_v26, %v3924_v17  ;;  %v3920_v32 = vsel %vm1021_vm7, %v9697_v43, %v8684_v18  ;;  %v3932_v50 = vsel %vm1021_vm7, %v8684_v18, %v9702_v9  ;;  %v9719_v31 = vld [vmem:[#allocation86_spill] sm:$0xff]  ;;  %v9723_v19 = vld [vmem:[#allocation108_spill] sm:$0xff] }
 0x86a   :  { %4639 = vmatpush1.bf16.msra.mxu1 %v3822_v21  ;;  %4627 = vmatprep.mubr.bf16.mxu1 %v5644_v28  ;;  %v9701_v0 = vpack.c.bf16 %v9699_v51, %v9700_v24  ;;  %v9706_v28 = vld [vmem:[#allocation48_spill] sm:$0xff]  ;;  %v4062_v23 = vmul.f32 %v8770_v4, %v4029_v12  ;;  %v3964_v3 = vmul.f32 %v3939_v46, %v3928_v7  ;;  %v9720_v6 = vld [vmem:[#allocation115_spill] sm:$0xff]  ;;  %v9724_v11 = vld [vmem:[#allocation109_spill] sm:$0xff] }
 0x86b   :  { %4640 = vmatprep.subr.bf16.mxu1 %v9683_v62  ;;  %v8776_v61 = vpop.permute.xlu1 %4192  ;;  %4535 = vmatpush1.bf16.msra.mxu0 %v9689_v29  ;;  %v9707_v21 = vpack.c.bf16 %v9705_v54, %v9706_v28  ;;  %v9713_v62 = vld [vmem:[#allocation98_spill] sm:$0xff]  ;;  %v3968_v63 = vmul.f32 %v3939_v46, %v3929_v14  ;;  %v9717_v29 = vpack.c.bf16 %v9715_v41, %v9716_v52  ;;  %v9726_v51 = vld [vmem:[#allocation56_spill] sm:$0xff]  ;;  %v9728_v9 = vld [vmem:[#allocation57_spill] sm:$0xff] }
 0x86c   :  { %4536 = vmatprep.subr.bf16.mxu0 %v9694_v56  ;;  %v9714_v2 = vpack.c.bf16 %v9712_v59, %v9713_v62  ;;  %v4027_v18 = vsel %vm1182_vm8, %v9719_v31, %v9718_v13  ;;  %v9722_v56 = vpack.c.bf16 %v9720_v6, %v9721_v44  ;;  %v3977_v42 = vpack.c.bf16 %v3969_v57, %v3965_v55  ;;  %v9730_v14 = vld [vmem:[#allocation73_spill] sm:$0xff]  ;;  %v9731_v57 = vld [vmem:[#allocation128_spill] sm:$0xff]  ;;  %v9733_v30 = vld [vmem:[#allocation114_spill] sm:$0xff] }
 0x86d   :  { %v8802_v8 = vpop.permute.xlu0 %4218  ;;  %v3967_v12 = vmul.f32 %v9724_v11, %v3932_v50  ;;  %v3976_v28 = vpack.c.bf16 %v3968_v63, %v3964_v3  ;;  %v9734_v16 = vld [vmem:[#allocation112_spill] sm:$0xff]  ;;  %v9736_v50 = vld [vmem:[#allocation74_spill] sm:$0xff]  ;;  %v4074_v62 = vpack.c.bf16 %v4062_v23, %v8817_v20  ;;  %v4034_v20 = vsel %vm1182_vm8, %v8705_v37, %v9730_v14  ;;  %v9737_v23 = vld [vmem:[#allocation103_spill] sm:$0xff] }
 0x86e   :  { %4641 = vmatpush1.bf16.msra.mxu1 %v9701_v0  ;;  %4522 = vmatmul.mubr.bf16.gmra.mrb[36].mxu0 %v5646_v53  ;;  %v9727_v0 = vld [vmem:[#allocation64_spill] sm:$0xff]  ;;  %v4031_v59 = vsel %vm1182_vm8, %v9736_v50, %v9719_v31  ;;  %v4128_v6 = vsel %vm1343_vm9, %v8561_v38, %v8734_v47  ;;  %vm9761_vm1 = vmmov %vm9748_vm6  ;;  %v5647_v49 = vld [vmem:[%s9335_s9 + $0x8] ss:$16 sps:$4 sm:$0xff]  }
 0x86f   :  { %4642 = vmatprep.subr.bf16.mxu1 %v9707_v21  ;;  %v8823_v35 = vpop.permute.xlu1 %4200  ;;  %4537 = vmatpush1.bf16.msra.mxu0 %v9711_v1  ;;  %v4131_v7 = vsel %vm1343_vm9, %v9728_v9, %v9727_v0  ;;  %v9732_v21 = vld [vmem:[#allocation100_spill] sm:$0xff]  ;;  %v9735_v1 = vpack.c.bf16 %v9733_v30, %v9734_v16  ;;  %vm9762_vm15 = vmmov %vm9761_vm1 }
 0x870   :  { %5327 = vmatprep.mubr.msk.bf16.mxu0 %vm4472_vm5, %v5649_v22  ;;  %4538 = vmatprep.subr.bf16.mxu0 %v9714_v2  ;;  %v8899_v41 = vmul.f32 %v8821_v10, %v4131_v7  ;;  %vm9763_vm4 = vmmov %vm9761_vm1 }
 0x871   :  { %4628 = vmatmul.mubr.bf16.gmra.mrb[36].mxu1 %v5646_v53  ;;  %v3917_v27 = vpop.permute.xlu0 %3916  ;;  %vm9768_vm2 = vmmov %vm9761_vm1 }
 0x872   :  { %4643 = vmatpush1.bf16.msra.mxu1 %v9717_v29  ;;  %5329 = vmatprep.mubr.msk.bf16.mxu1 %vm4472_vm5, %v5649_v22  ;;  %v3921_v53 = vsel %vm1021_vm7, %v9685_v15, %v3917_v27  ;;  %v3933_v46 = vsel %vm1021_vm7, %v3917_v27, %v9703_v48  ;;  %v3966_v22 = vmul.f32 %v9723_v19, %v3920_v32  ;;  %v9725_v15 = vld [vmem:[#allocation63_spill] sm:$0xff]  ;;  %v9729_v48 = vld [vmem:[#allocation85_spill] sm:$0xff]  ;;  %v9738_v27 = vld [vmem:[#allocation102_spill] sm:$0xff] }
 0x873   :  { %4644 = vmatprep.subr.bf16.mxu1 %v9722_v56  ;;  %v3970_v43 = vmul.f32 %v9723_v19, %v3921_v53  ;;  %v3971_v39 = vmul.f32 %v9724_v11, %v3933_v46  ;;  %v8863_v17 = vpop.permute.xlu1 %4208  ;;  %4539 = vmatpush1.bf16.msra.mxu0 %v3972_v58  ;;  %v4130_v24 = vsel %vm1343_vm9, %v9726_v51, %v9725_v15  ;;  %v9740_v53 = vld [vmem:[#allocation76_spill] sm:$0xff]  ;;  %v9745_v15 = vld [vmem:[#allocation110_spill] sm:$0xff]  ;;  %vm9755_vm7 = vmmov %vm9748_vm6 }
 0x874   :  { %v4030_v26 = vsel %vm1182_vm8, %v9730_v14, %v9729_v48  ;;  %v4026_v54 = vsel %vm1182_vm8, %v9729_v48, %v9731_v57  ;;  %4540 = vmatprep.subr.bf16.mxu0 %v3977_v42  ;;  %v4071_v58 = vmul.f32 %v9732_v21, %v4027_v18  ;;  %v8893_v2 = vmul.f32 %v8821_v10, %v4130_v24  ;;  %v9741_v42 = vld [vmem:[#allocation75_spill] sm:$0xff]  ;;  %v9747_v48 = vld [vmem:[#allocation104_spill] sm:$0xff]  ;;  %vm9770_vm0 = vmmov %vm9761_vm1 }
 0x875   :  { %v3978_v45 = vpack.c.bf16 %v3970_v43, %v3966_v22  ;;  %v8885_v55 = vpop.permute.xlu0 %4198  ;;  %v3979_v32 = vpack.c.bf16 %v3971_v39, %v3967_v12  ;;  %v4067_v3 = vmul.f32 %v9732_v21, %v4026_v54  ;;  %v4066_v52 = vmul.f32 %v8770_v4, %v4030_v26  ;;  %v9742_v12 = vld [vmem:[#allocation121_spill] sm:$0xff]  ;;  %v9743_v43 = vld [vmem:[#allocation119_spill] sm:$0xff]  ;;  %v9749_v21 = vld [vmem:[#allocation120_spill] sm:$0xff] }
 0x876   :  { %4645 = vmatpush1.bf16.msra.mxu1 %v9735_v1  ;;  %v4022_v29 = vsel %vm1182_vm8, %v9731_v57, %v8705_v37  ;;  %v9739_v31 = vpack.c.bf16 %v9737_v23, %v9738_v27  ;;  %v4070_v18 = vmul.f32 %v8770_v4, %v4031_v59  ;;  %v4133_v46 = vsel %vm1343_vm9, %v9740_v53, %v8571_v36  ;;  %v5318_v37 = vld [vmem:[%s9339_s13 + $0x20] ss:$8 sm:$0xf]  ;;  %vm9774_vm10 = vmmov %vm9770_vm0 }
 0x877   :  { %v8896_v63 = vpop.permute.xlu1 %4216  ;;  %4541 = vmatpush1.bf16.msra.mxu0 %v3976_v28  ;;  %4646 = vmatprep.subr.bf16.mxu1 %v3979_v32  ;;  %v4079_v56 = vpack.c.bf16 %v4071_v58, %v4067_v3  ;;  %v4132_v4 = vsel %vm1343_vm9, %v9741_v42, %v8561_v38  ;;  %v4129_v19 = vsel %vm1343_vm9, %v8571_v36, %v8630_v60  ;;  %v9746_v38 = vld [vmem:[#allocation111_spill] sm:$0xff]  ;;  %v9750_v58 = vld [vmem:[#allocation118_spill] sm:$0xff]  ;;  %v9757_v27 = vld [vmem:[#allocation105_spill] sm:$0xff] }
 0x878   :  { %4542 = vmatprep.subr.bf16.mxu0 %v9739_v31  ;;  %v9744_v39 = vpack.c.bf16 %v9742_v12, %v9743_v43  ;;  %v4068_v51 = vmul.f32 %v9745_v15, %v4022_v29  ;;  %v4069_v24 = vmul.f32 %v9746_v38, %v4034_v20  ;;  %v4172_v7 = vmul.f32 %v8821_v10, %v4133_v46  ;;  %v9754_v3 = vld [vmem:[#allocation30_spill] sm:$0xff]  ;;  %v9759_v46 = vld [vmem:[#allocation116_spill] sm:$0xff]  ;;  %v9767_v12 = vld [vmem:[#allocation117_spill] sm:$0xff] }
 0x879   :  { %v4019_v44 = vpop.permute.xlu0 %4018  ;;  %v4169_v14 = vmul.f32 %v9747_v48, %v4128_v6  ;;  %v8953_v26 = vrot.slane %v5318_v37, %v9523_v25  ;;  %v4078_v57 = vpack.c.bf16 %v4070_v18, %v4066_v52  ;;  %v4233_v54 = vsel %vm9748_vm6, %v8697_v5, %v8740_v33  ;;  %v9756_v23 = vld [vmem:[#allocation106_spill] sm:$0xff]  ;;  %vm9775_vm11 = vmmov %vm9770_vm0 }
 0x87a   :  { %4647 = vmatpush1.bf16.msra.mxu1 %v3978_v45  ;;  %v4023_v22 = vsel %vm1182_vm8, %v9718_v13, %v4019_v44  ;;  %v4035_v11 = vsel %vm1182_vm8, %v4019_v44, %v9736_v50  ;;  %v4176_v13 = vpack.c.bf16 %v8899_v41, %v8893_v2  ;;  %v9751_v45 = vpack.c.bf16 %v9749_v21, %v9750_v58  ;;  %v9752_v50 = vld [vmem:[#allocation27_spill] sm:$0xff]  ;;  %vm9760_vm8 = vmmov %vm9748_vm6 }
 0x87b   :  { %4648 = vmatprep.subr.bf16.mxu1 %v9744_v39  ;;  %v4072_v0 = vmul.f32 %v9745_v15, %v4023_v22  ;;  %v4073_v36 = vmul.f32 %v9746_v38, %v4035_v11  ;;  %v8946_v9 = vpop.permute.xlu1 %4196  ;;  %4543 = vmatpush1.bf16.msra.mxu0 %v4074_v62  ;;  %v4168_v1 = vmul.f32 %v8821_v10, %v4132_v4  ;;  %v9753_v62 = vld [vmem:[#allocation29_spill] sm:$0xff]  ;;  %v9765_v22 = vld [vmem:[#allocation123_spill] sm:$0xff]  ;;  %vm9776_vm12 = vmmov %vm9770_vm0 }
 0x87c   :  { %4544 = vmatprep.subr.bf16.mxu0 %v4079_v56  ;;  %v4173_v32 = vmul.f32 %v9747_v48, %v4129_v19  ;;  %v4124_v25 = vsel %vm1343_vm9, %v8734_v47, %v8745_v40  ;;  %v4249_v59 = vrot.slane %v5318_v37, %v9752_v50  ;;  %v8970_v2 = vrot.slane %v5318_v37, %v9753_v62  ;;  %v9764_v19 = vld [vmem:[#allocation125_spill] sm:$0xff]  ;;  %vm9777_vm13 = vmmov %vm9770_vm0 }
 0x87d   :  { %v4080_v28 = vpack.c.bf16 %v4072_v0, %v4068_v51  ;;  %v4207_v30 = vpop.permute.xlu0 %4206  ;;  %v4081_v16 = vpack.c.bf16 %v4073_v36, %v4069_v24  ;;  %v8973_v41 = vrot.slane %v5318_v37, %v9754_v3  ;;  %v4228_v10 = vsel %vm9755_vm7, %v8823_v35, %v8863_v17  ;;  %v9771_v0 = vld [vmem:[#allocation124_spill] sm:$0xff]  ;;  %v9772_v36 = vld [vmem:[#allocation122_spill] sm:$0xff]  ;;  %vm9778_vm14 = vmmov %vm9770_vm0 }
 0x87e   :  { %4649 = vmatpush1.bf16.msra.mxu1 %v9751_v45  ;;  %v4180_v29 = vpack.c.bf16 %v4172_v7, %v4168_v1  ;;  %v4266_v20 = vmul.f32 %v8953_v26, %v4233_v54  ;;  %v4136_v47 = vsel %vm1343_vm9, %v8745_v40, %v9741_v42  ;;  %v9758_v31 = vpack.c.bf16 %v9756_v23, %v9757_v27  ;;  %vm9779_vm6 = vmmov %vm9770_vm0 }
 0x87f   :  { %v4205_v52 = vpop.permute.xlu1 %4204  ;;  %4545 = vmatpush1.bf16.msra.mxu0 %v4078_v57  ;;  %4650 = vmatprep.subr.bf16.mxu1 %v4081_v16  ;;  %v4181_v18 = vpack.c.bf16 %v4173_v32, %v4169_v14  ;;  %v4170_v6 = vmul.f32 %v9759_v46, %v4124_v25  ;;  %v4229_v37 = vsel %vm9760_vm8, %v8740_v33, %v8756_v34  ;;  %vm9780_vm7 = vmmov %vm9770_vm0 }
 0x880   :  { %4546 = vmatprep.subr.bf16.mxu0 %v9758_v31  ;;  %v4237_v44 = vsel %vm9761_vm1, %v8802_v8, %v8697_v5  ;;  %v4236_v40 = vsel %vm9762_vm15, %v8896_v63, %v8776_v61  ;;  %v4232_v42 = vsel %vm9763_vm4, %v8776_v61, %v8823_v35  ;;  %v4263_v4 = vmul.f32 %v4249_v59, %v4228_v10 }
 0x881   :  { %v4121_v56 = vpop.permute.xlu0 %4120  ;;  %v9766_v11 = vpack.c.bf16 %v9764_v19, %v9765_v22  ;;  %v4171_v43 = vmul.f32 %v9767_v12, %v4136_v47  ;;  %v4224_v61 = vsel %vm9768_vm2, %v8863_v17, %v8896_v63  ;;  %v4267_v15 = vmul.f32 %v4249_v59, %v4229_v37  ;;  %v9784_v22 = vld [vmem:[#allocation28_spill] sm:$0xff] }
 0x882   :  { %4651 = vmatpush1.bf16.msra.mxu1 %v4080_v28  ;;  %v4125_v33 = vsel %vm1343_vm9, %v8630_v60, %v4121_v56  ;;  %v4137_v5 = vsel %vm1343_vm9, %v4121_v56, %v9740_v53  ;;  %vm9769_vm9 = vmmov %vm9761_vm1  ;;  %v4265_v51 = vmul.f32 %v8973_v41, %v4236_v40  ;;  %v4269_v17 = vmul.f32 %v8973_v41, %v4237_v44  ;;  %v9782_v44 = vld [vmem:[#allocation35_spill] sm:$0xff] }
 0x883   :  { %4652 = vmatprep.subr.bf16.mxu1 %v9766_v11  ;;  %v4174_v35 = vmul.f32 %v9759_v46, %v4125_v33  ;;  %v4175_v39 = vmul.f32 %v9767_v12, %v4137_v5  ;;  %v4213_v60 = vpop.permute.xlu1 %4212  ;;  %4547 = vmatpush1.bf16.msra.mxu0 %v4176_v13  ;;  %v4225_v53 = vsel %vm9769_vm9, %v8756_v34, %v8802_v8 }
 0x884   :  { %v4230_v38 = vsel %vm9770_vm0, %v4205_v52, %v4213_v60  ;;  %4548 = vmatprep.subr.bf16.mxu0 %v4181_v18  ;;  %v4262_v63 = vmul.f32 %v8953_v26, %v4232_v42  ;;  %v9773_v13 = vpack.c.bf16 %v9771_v0, %v9772_v36  ;;  %v4264_v14 = vmul.f32 %v8970_v2, %v4224_v61 }
 0x885   :  { %v4182_v24 = vpack.c.bf16 %v4174_v35, %v4170_v6  ;;  %v4215_v7 = vpop.permute.xlu0 %4214  ;;  %v4183_v48 = vpack.c.bf16 %v4175_v39, %v4171_v43  ;;  %v4234_v34 = vsel %vm9774_vm10, %v8946_v9, %v4205_v52  ;;  %v4279_v57 = vpack.c.bf16 %v4267_v15, %v4263_v4  ;;  %v9783_v4 = vld [vmem:[#allocation37_spill] sm:$0xff]  ;;  %v9785_v39 = vld [vmem:[#allocation36_spill] sm:$0xff] }
 0x886   :  { %4653 = vmatpush1.bf16.msra.mxu1 %v9773_v13  ;;  %v4231_v8 = vsel %vm9775_vm11, %v4207_v30, %v4215_v7  ;;  %v4235_v54 = vsel %vm9776_vm12, %v8885_v55, %v4207_v30  ;;  %v4271_v28 = vmul.f32 %v4249_v59, %v4230_v38  ;;  %v4268_v45 = vmul.f32 %v8970_v2, %v4225_v53 }
 0x887   :  { %v4275_v21 = vmul.f32 %v4249_v59, %v4231_v8  ;;  %v4221_v58 = vpop.permute.xlu1 %4220  ;;  %4549 = vmatpush1.bf16.msra.mxu0 %v4180_v29  ;;  %4654 = vmatprep.subr.bf16.mxu1 %v4183_v48  ;;  %v4281_v32 = vpack.c.bf16 %v4269_v17, %v4265_v51  ;;  %v4278_v25 = vpack.c.bf16 %v4266_v20, %v4262_v63  ;;  %v9781_v18 = vmov 0  }
 0x888   :  { %v4226_v16 = vsel %vm9777_vm13, %v4213_v60, %v4221_v58  ;;  %v4238_v1 = vsel %vm9778_vm14, %v4221_v58, %v8946_v9  ;;  %4550 = vmatprep.subr.bf16.mxu0 %v4279_v57  ;;  %v4270_v50 = vmul.f32 %v8953_v26, %v4234_v34  ;;  %v4280_v62 = vpack.c.bf16 %v4268_v45, %v4264_v14 }
 0x889   :  { %v4223_v30 = vpop.permute.xlu0 %4222  ;;  %v4283_v59 = vpack.c.bf16 %v4275_v21, %v4271_v28  ;;  %v4274_v3 = vmul.f32 %v8953_v26, %v4235_v54  ;;  %v4272_v9 = vmul.f32 %v8970_v2, %v4226_v16  ;;  %v4273_v29 = vmul.f32 %v8973_v41, %v4238_v1 }
 0x88a   :  { %4655 = vmatpush1.bf16.msra.mxu1 %v4182_v24  ;;  %v4227_v10 = vsel %vm9779_vm6, %v4215_v7, %v4223_v30  ;;  %v4239_v52 = vsel %vm9780_vm7, %v4223_v30, %v8885_v55  ;;  %v5650_v55 = vld [vmem:[%s9335_s9 + $0x2c] ss:$16 sps:$4 sm:$0xff]  }
 0x88b   :  { %4656 = vmatprep.subr.bf16.mxu1 %v4281_v32  ;;  %v4276_v20 = vmul.f32 %v8970_v2, %v4227_v10  ;;  %v4277_v47 = vmul.f32 %v8973_v41, %v4239_v52  ;;  %4551 = vmatpush1.bf16.msra.mxu0 %v4278_v25  ;;  %v4282_v23 = vpack.c.bf16 %v4274_v3, %v4270_v50  ;;  %v5652_v2 = vld [vmem:[%s9335_s9 + $0x28] ss:$16 sps:$4 sm:$0xff]  }
 0x88c   :  { %4552 = vmatprep.subr.bf16.mxu0 %v4283_v59 }
 0x88d   :  { %v4284_v26 = vpack.c.bf16 %v4276_v20, %v4272_v9  ;;  %v4285_v27 = vpack.c.bf16 %v4277_v47, %v4273_v29  ;;  %v3114_v9 = vld [vmem:[#allocation19] sm:$0xff] }
 0x88e   :  { %4657 = vmatpush1.bf16.msra.mxu1 %v4280_v62 }
 0x88f   :  { %4553 = vmatpush1.bf16.msra.mxu0 %v4282_v23  ;;  %4658 = vmatprep.subr.bf16.mxu1 %v4285_v27 }
 0x892   :  { %4659 = vmatpush1.bf16.msra.mxu1 %v4284_v26  ;;  %4565 = vmatmul.mubr.bf16.vlgmr.msra.gmra.mrb[32].mxu0 %v5647_v49 }
 0x893   :  { %5328 = vmatprep.mubr.msk.bf16.mxu0 %vm4472_vm5, %v5650_v55 }
 0x895   :  { %4671 = vmatmul.mubr.bf16.vlgmr.msra.gmra.mrb[32].mxu1 %v5647_v49  ;;  %v3115_v49 = vld [vmem:[#allocation19 + $0x8] sm:$0xff] }
 0x896   :  { %5330 = vmatprep.mubr.msk.bf16.mxu1 %vm4472_vm5, %v5650_v55 }
 0x898   :  { %v9069_v41 = vpop.permute.xlu1 %4416 }
 0x89a   :  { %4575 = vmatmul.mubr.bf16.gmra.mrb[36].mxu0 %v5652_v2 }
 0x89b   :  { %v9071_v31 = vpop.permute.xlu0 %4421  ;;  %4823 = vmatprep.mubr.bf16.mxu0 %v9781_v18 }
 0x89c   :  { %v9074_v46 = vpop.permute.xlu1 %4426 }
 0x89d   :  { %4681 = vmatmul.mubr.bf16.gmra.mrb[36].mxu1 %v5652_v2 }
 0x89e   :  { %4876 = vmatprep.mubr.bf16.mxu1 %v9781_v18 }
 0x89f   :  { %v9077_v6 = vpop.permute.xlu0 %4431 }
 0x8a0   :  { %v2940_v37 = vpop.permute.xlu1 %2939 }
 0x8a1   :  { %v3008_v40 = vadd.f32 %v9782_v44, %v2940_v37 }
 0x8a3   :  { %v3022_v56 = vsub.f32 0.0, %v3008_v40  ;;  %v2945_v42 = vpop.permute.xlu0 %2944  ;;  %v3054_v24 = vmul.f32 1.442695, %v3008_v40  ;;  %v3116_v40 = vld [vmem:[#allocation19 + $0x10] sm:$0xff] }
 0x8a4   :  { %v3011_v33 = vadd.f32 %v9783_v4, %v2945_v42  ;;  %v2950_v5 = vpop.permute.xlu1 %2949 }
 0x8a5   :  { %v3026_v19 = vmul.f32 1.442695, %v3022_v56  ;;  %v3016_v11 = vadd.f32 %v9784_v22, %v2950_v5  ;;  %v3117_v22 = vld [vmem:[#allocation19 + $0x18] sm:$0x7] }
 0x8a6   :  { %v3023_v12 = vsub.f32 0.0, %v3011_v33  ;;  %v3056_v7 = vmul.f32 1.442695, %v3011_v33 }
 0x8a7   :  { %5655 = vpow2.f32 %v3026_v19  ;;  %v3024_v43 = vsub.f32 0.0, %v3016_v11  ;;  %v2955_v61 = vpop.permute.xlu0 %2954  ;;  %v3058_v14 = vmul.f32 1.442695, %v3016_v11 }
 0x8a8   :  { %v3028_v35 = vmul.f32 1.442695, %v3023_v12  ;;  %v3019_v60 = vadd.f32 %v9785_v39, %v2955_v61  ;;  %v9083_v15 = vpop.permute.xlu1 %4757 }
 0x8a9   :  { %v3030_v53 = vmul.f32 1.442695, %v3024_v43 }
 0x8aa   :  { %5657 = vpow2.f32 %v3028_v35  ;;  %v3025_v51 = vsub.f32 0.0, %v3019_v60  ;;  %v3060_v58 = vmul.f32 1.442695, %v3019_v60 }
 0x8ab   :  { %5659 = vpow2.f32 %v3030_v53  ;;  %v9085_v38 = vpop.permute.xlu0 %4762 }
 0x8ac   :  { %v3032_v17 = vmul.f32 1.442695, %v3025_v51  ;;  %v9087_v63 = vpop.permute.xlu1 %4767 }
 0x8ae   :  { %5661 = vpow2.f32 %v3032_v17 }
 0x8af   :  { %v9089_v0 = vpop.permute.xlu0 %4772  ;;  %5663 = vpow2.f32 %v3054_v24 }
 0x8b0   :  { %v3068_v36 = vpop.permute.xlu1 %3067 }
 0x8b1   :  { %v5656_v13 = vpop.eup %5655  ;;  %vm3078_vm5 = vcmp.eq.s32.totalorder %v3068_v36, 1 }
 0x8b2   :  { %v3034_v48 = vadd.f32 1.0, %v5656_v13 }
 0x8b3   :  { %v3071_v34 = vpop.permute.xlu0 %3070 }
 0x8b4   :  { %v5658_v8 = vpop.eup %5657  ;;  %5665 = vrcp.f32 %v3034_v48  ;;  %v3074_v57 = vpop.permute.xlu1 %3073  ;;  %vm3079_vm8 = vcmp.eq.s32.totalorder %v3071_v34, 1 }
 0x8b5   :  { %v5660_v54 = vpop.eup %5659  ;;  %v3035_v28 = vadd.f32 1.0, %v5658_v8  ;;  %5667 = vpow2.f32 %v3056_v7  ;;  %vm3080_vm1 = vcmp.eq.s32.totalorder %v3074_v57, 1 }
 0x8b6   :  { %v3036_v21 = vadd.f32 1.0, %v5660_v54  ;;  %5669 = vpow2.f32 %v3058_v14 }
 0x8b7   :  { %5671 = vrcp.f32 %v3035_v28  ;;  %v3077_v45 = vpop.permute.xlu0 %3076 }
 0x8b8   :  { %v5662_v16 = vpop.eup %5661  ;;  %5673 = vrcp.f32 %v3036_v21  ;;  %v9091_v1 = vpop.permute.xlu1 %5038  ;;  %vm3081_vm15 = vcmp.eq.s32.totalorder %v3077_v45, 1 }
 0x8b9   :  { %v3037_v32 = vadd.f32 1.0, %v5662_v16  ;;  %5675 = vpow2.f32 %v3060_v58  ;;  %v5664_v30 = vpop.eup %5663 }
 0x8bb   :  { %5677 = vrcp.f32 %v3037_v32  ;;  %v9093_v25 = vpop.permute.xlu0 %5041 }
 0x8bc   :  { %v9095_v50 = vpop.permute.xlu1 %5044 }
 0x8be   :  { %v5666_v59 = vpop.eup %5665 }
 0x8bf   :  { %v5668_v62 = vpop.eup %5667  ;;  %v9097_v3 = vpop.permute.xlu0 %5047  ;;  %v3082_v10 = vsel %vm3078_vm5, %v5664_v30, %v5666_v59 }
 0x8c0   :  { %v5670_v52 = vpop.eup %5669  ;;  %v3093_v29 = vpop.permute.xlu1 %3092 }
 0x8c1   :  { %v5672_v20 = vpop.eup %5671  ;;  %v3110_v47 = vmul.f32 %v3093_v29, %v3082_v10 }
 0x8c2   :  { %v5674_v23 = vpop.eup %5673  ;;  %v3083_v26 = vsel %vm3079_vm8, %v5668_v62, %v5672_v20 }
 0x8c3   :  { %v3118_v27 = vadd.f32 %v3114_v9, %v3110_v47  ;;  %v3098_v55 = vpop.permute.xlu0 %3097  ;;  %v3084_v2 = vsel %vm3080_vm1, %v5670_v52, %v5674_v23  ;;  %v5676_v37 = vpop.eup %5675 }
 0x8c4   :  { %v3111_v44 = vmul.f32 %v3098_v55, %v3083_v26  ;;  %v3103_v56 = vpop.permute.xlu1 %3102 }
 0x8c5   :  { %v5678_v42 = vpop.eup %5677  ;;  %3122 = vst [vmem:[%s9347_s21] sm:$0xff] %v3118_v27  ;;  %v3112_v4 = vmul.f32 %v3103_v56, %v3084_v2 }
 0x8c6   :  { %v3119_v33 = vadd.f32 %v3115_v49, %v3111_v44  ;;  %v3085_v5 = vsel %vm3081_vm15, %v5676_v37, %v5678_v42 }
 0x8c7   :  { %v3120_v19 = vadd.f32 %v3116_v40, %v3112_v4  ;;  %v3108_v11 = vpop.permute.xlu0 %3107 }
 0x8c8   :  { %3123 = vst [vmem:[%s9347_s21 + $0x8] sm:$0xff] %v3119_v33  ;;  %v3113_v12 = vmul.f32 %v3108_v11, %v3085_v5 }
 0x8c9   :  { %3124 = vst [vmem:[%s9347_s21 + $0x10] sm:$0xff] %v3120_v19 }
 0x8ca   :  { %v3121_v43 = vadd.f32 %v3117_v22, %v3113_v12 }
 0x8cc   :  { %3125 = vst [vmem:[%s9347_s21 + $0x18] sm:$0x7] %v3121_v43 }
 0x965   :  { %v4566_v61 = vpop.f32.mrb[32].mxu0 }
 0x966   :  { %v5417_v35 = vadd.f32 %v4566_v61, %v9069_v41  ;;  %v4568_v39 = vpop.f32.mrb[33].mxu0 }
 0x967   :  { %v5418_v60 = vadd.f32 %v4568_v39, %v9069_v41  ;;  %v4570_v51 = vpop.f32.mrb[34].mxu0 }
 0x968   :  { %v4672_v53 = vpop.f32.mrb[32].mxu1  ;;  %vm4691_vm4 = vcmp.ge.f32.partialorder %v5417_v35, 0.0  ;;  %v5419_v24 = vadd.f32 %v4570_v51, %v9071_v31  ;;  %v4572_v13 = vpop.f32.mrb[35].mxu0  ;;  %v4707_v7 = vmul.f32 0.1, %v5417_v35 }
 0x969   :  { %v5425_v17 = vadd.f32 %v4672_v53, %v9069_v41  ;;  %v4674_v36 = vpop.f32.mrb[33].mxu1  ;;  %v4708_v48 = vmul.f32 0.1, %v5418_v60  ;;  %v5420_v34 = vadd.f32 %v4572_v13, %v9071_v31  ;;  %vm4692_vm2 = vcmp.ge.f32.partialorder %v5418_v60, 0.0 }
 0x96a   :  { %v5426_v14 = vadd.f32 %v4674_v36, %v9069_v41  ;;  %v4676_v8 = vpop.f32.mrb[34].mxu1  ;;  %vm4695_vm0 = vcmp.ge.f32.partialorder %v5419_v24, 0.0  ;;  %v4711_v28 = vmul.f32 0.1, %v5419_v24  ;;  %v4723_v32 = vsel %vm4691_vm4, %v5417_v35, %v4707_v7 }
 0x96b   :  { %vm4693_vm9 = vcmp.ge.f32.partialorder %v5425_v17, 0.0  ;;  %v4709_v57 = vmul.f32 0.1, %v5425_v17  ;;  %v4678_v54 = vpop.f32.mrb[35].mxu1  ;;  %vm4696_vm11 = vcmp.ge.f32.partialorder %v5420_v34, 0.0  ;;  %v5427_v45 = vadd.f32 %v4676_v8, %v9071_v31 }
 0x96c   :  { %vm4694_vm10 = vcmp.ge.f32.partialorder %v5426_v14, 0.0  ;;  %v4710_v21 = vmul.f32 0.1, %v5426_v14  ;;  %v4712_v58 = vmul.f32 0.1, %v5420_v34  ;;  %v5428_v16 = vadd.f32 %v4678_v54, %v9071_v31 }
 0x96d   :  { %v4725_v41 = vsel %vm4693_vm9, %v5425_v17, %v4709_v57  ;;  %v4727_v30 = vsel %vm4695_vm0, %v5419_v24, %v4711_v28  ;;  %v4576_v59 = vpop.f32.mrb[36].mxu0  ;;  %v4724_v62 = vsel %vm4692_vm2, %v5418_v60, %v4708_v48  ;;  %vm4697_vm12 = vcmp.ge.f32.partialorder %v5427_v45, 0.0  ;;  %v5653_v28 = vld [vmem:[#allocation13] sm:$0xff]  }
 0x96e   :  { %v4739_v10 = vpack.c.bf16 %v4727_v30, %v4723_v32  ;;  %v4713_v52 = vmul.f32 0.1, %v5427_v45  ;;  %v4578_v9 = vpop.f32.mrb[37].mxu0  ;;  %v4726_v29 = vsel %vm4694_vm10, %v5426_v14, %v4710_v21  ;;  %v4714_v20 = vmul.f32 0.1, %v5428_v16 }
 0x96f   :  { %v5421_v47 = vadd.f32 %v4576_v59, %v9074_v46  ;;  %v5422_v23 = vadd.f32 %v4578_v9, %v9074_v46  ;;  %v4580_v27 = vpop.f32.mrb[38].mxu0  ;;  %v4728_v31 = vsel %vm4696_vm11, %v5420_v34, %v4712_v58  ;;  %vm4698_vm13 = vcmp.ge.f32.partialorder %v5428_v16, 0.0  ;;  %v5654_v21 = vld [vmem:[#allocation13 + $0x8] sm:$0x3f]  }
 0x970   :  { %v4682_v26 = vpop.f32.mrb[36].mxu1  ;;  %v4729_v49 = vsel %vm4697_vm12, %v5427_v45, %v4713_v52  ;;  %v5423_v2 = vadd.f32 %v4580_v27, %v9077_v6  ;;  %v4582_v44 = vpop.f32.mrb[39].mxu0  ;;  %v4740_v40 = vpack.c.bf16 %v4728_v31, %v4724_v62  ;;  %v4730_v39 = vsel %vm4698_vm13, %v5428_v16, %v4714_v20 }
 0x971   :  { %v5429_v55 = vadd.f32 %v4682_v26, %v9074_v46  ;;  %v4684_v37 = vpop.f32.mrb[37].mxu1  ;;  %v4741_v56 = vpack.c.bf16 %v4729_v49, %v4725_v41  ;;  %vm4699_vm14 = vcmp.ge.f32.partialorder %v5421_v47, 0.0  ;;  %v4715_v42 = vmul.f32 0.1, %v5421_v47 }
 0x972   :  { %v4686_v4 = vpop.f32.mrb[38].mxu1  ;;  %vm4700_vm6 = vcmp.ge.f32.partialorder %v5422_v23, 0.0  ;;  %v4716_v33 = vmul.f32 0.1, %v5422_v23  ;;  %vm4703_vm5 = vcmp.ge.f32.partialorder %v5423_v2, 0.0  ;;  %4791 = vmatprep.subr.bf16.mxu0 %v4740_v40  ;;  %v5430_v22 = vadd.f32 %v4684_v37, %v9074_v46 }
 0x973   :  { %vm4701_vm7 = vcmp.ge.f32.partialorder %v5429_v55, 0.0  ;;  %v4717_v5 = vmul.f32 0.1, %v5429_v55  ;;  %v4719_v19 = vmul.f32 0.1, %v5423_v2  ;;  %v5424_v11 = vadd.f32 %v4582_v44, %v9077_v6  ;;  %v4688_v12 = vpop.f32.mrb[39].mxu1  ;;  %4792 = vmatpush1.bf16.msra.mxu0 %v4739_v10 }
 0x974   :  { %v4731_v43 = vsel %vm4699_vm14, %v5421_v47, %v4715_v42  ;;  %v5431_v61 = vadd.f32 %v4686_v4, %v9077_v6  ;;  %v5432_v35 = vadd.f32 %v4688_v12, %v9077_v6  ;;  %vm4702_vm8 = vcmp.ge.f32.partialorder %v5430_v22, 0.0 }
 0x975   :  { %v4735_v60 = vsel %vm4703_vm5, %v5423_v2, %v4719_v19  ;;  %v4718_v53 = vmul.f32 0.1, %v5430_v22  ;;  %vm4704_vm1 = vcmp.ge.f32.partialorder %v5424_v11, 0.0  ;;  %v4720_v17 = vmul.f32 0.1, %v5424_v11 }
 0x976   :  { %v4743_v51 = vpack.c.bf16 %v4735_v60, %v4731_v43  ;;  %vm4705_vm15 = vcmp.ge.f32.partialorder %v5431_v61, 0.0  ;;  %v4721_v24 = vmul.f32 0.1, %v5431_v61  ;;  %vm4706_vm4 = vcmp.ge.f32.partialorder %v5432_v35, 0.0 }
 0x977   :  { %v4722_v46 = vmul.f32 0.1, %v5432_v35  ;;  %v4742_v36 = vpack.c.bf16 %v4730_v39, %v4726_v29  ;;  %v4733_v13 = vsel %vm4701_vm7, %v5429_v55, %v4717_v5  ;;  %v4732_v48 = vsel %vm4700_vm6, %v5422_v23, %v4716_v33 }
 0x978   :  { %v4737_v7 = vsel %vm4705_vm15, %v5431_v61, %v4721_v24  ;;  %v4736_v14 = vsel %vm4704_vm1, %v5424_v11, %v4720_v17  ;;  %v4734_v8 = vsel %vm4702_vm8, %v5430_v22, %v4718_v53  ;;  %vm5050_vm2 = vcmp.eq.s32.totalorder %v9093_v25, 1 }
 0x979   :  { %v4745_v6 = vpack.c.bf16 %v4737_v7, %v4733_v13  ;;  %4844 = vmatprep.subr.bf16.mxu1 %v4742_v36  ;;  %v4744_v34 = vpack.c.bf16 %v4736_v14, %v4732_v48  ;;  %v4738_v57 = vsel %vm4706_vm4, %v5432_v35, %v4722_v46  ;;  %vm5051_vm9 = vcmp.eq.s32.totalorder %v9095_v50, 1 }
 0x97a   :  { %4845 = vmatpush1.bf16.msra.mxu1 %v4741_v56  ;;  %v4746_v54 = vpack.c.bf16 %v4738_v57, %v4734_v8  ;;  %vm5052_vm0 = vcmp.eq.s32.totalorder %v9097_v3, 1 }
 0x97b   :  { %4793 = vmatprep.subr.bf16.mxu0 %v4744_v34 }
 0x97c   :  { %4794 = vmatpush1.bf16.msra.mxu0 %v4743_v51  ;;  %4846 = vmatprep.subr.bf16.mxu1 %v4746_v54 }
 0x97e   :  { %4847 = vmatpush1.bf16.msra.mxu1 %v4745_v6 }
 0x97f   :  { %5333 = vmatmul.mubr.msk.bf16.vlgmr.msra.gmra.mrb[40].mxu0 %vm2855_vm3, %v5653_v28 }
 0x980   :  { %4833 = vmatprep.mubr.bf16.mxu0 %v9781_v18 }
 0x981   :  { %5335 = vmatmul.mubr.msk.bf16.vlgmr.msra.gmra.mrb[40].mxu1 %vm2855_vm3, %v5653_v28 }
 0x982   :  { %4886 = vmatprep.mubr.bf16.mxu1 %v9781_v18 }
 0x987   :  { %5334 = vmatmul.mubr.msk.bf16.gmra.mrb[44].mxu0 %vm2855_vm3, %v5654_v21 }
 0x989   :  { %5336 = vmatmul.mubr.msk.bf16.gmra.mrb[44].mxu1 %vm2855_vm3, %v5654_v21  ;;  %vm5049_vm3 = vcmp.eq.s32.totalorder %v9091_v1, 1 }
 0xa52   :  { %v4825_v58 = vpop.f32.mrb[40].mxu0 }
 0xa53   :  { %v4826_v45 = vadd.f32 %v4825_v58, %v9083_v15  ;;  %v4827_v16 = vpop.f32.mrb[41].mxu0 }
 0xa54   :  { %v4828_v32 = vadd.f32 %v4827_v16, %v9083_v15  ;;  %v4878_v41 = vpop.f32.mrb[40].mxu1  ;;  %v4829_v30 = vpop.f32.mrb[42].mxu0 }
 0xa55   :  { %v4897_v59 = vsub.f32 0.0, %v4826_v45  ;;  %v4879_v62 = vadd.f32 %v4878_v41, %v9083_v15  ;;  %v4830_v10 = vadd.f32 %v4829_v30, %v9085_v38  ;;  %v4880_v52 = vpop.f32.mrb[41].mxu1  ;;  %v4831_v18 = vpop.f32.mrb[43].mxu0  ;;  %v5001_v31 = vmul.f32 1.442695, %v4826_v45 }
 0xa56   :  { %v4898_v9 = vsub.f32 0.0, %v4828_v32  ;;  %v4881_v29 = vadd.f32 %v4880_v52, %v9083_v15  ;;  %v4832_v20 = vadd.f32 %v4831_v18, %v9085_v38  ;;  %v4882_v47 = vpop.f32.mrb[42].mxu1  ;;  %v5003_v44 = vmul.f32 1.442695, %v4828_v32 }
 0xa57   :  { %v4913_v23 = vmul.f32 1.442695, %v4897_v59  ;;  %v4899_v26 = vsub.f32 0.0, %v4879_v62  ;;  %v4884_v27 = vpop.f32.mrb[43].mxu1  ;;  %v4901_v55 = vsub.f32 0.0, %v4830_v10  ;;  %v4883_v15 = vadd.f32 %v4882_v47, %v9085_v38 }
 0xa58   :  { %v4915_v49 = vmul.f32 1.442695, %v4898_v9  ;;  %v4900_v37 = vsub.f32 0.0, %v4881_v29  ;;  %v4902_v56 = vsub.f32 0.0, %v4832_v20  ;;  %v9148_v33 = vadd.f32 %v4884_v27, %v9085_v38 }
 0xa59   :  { %5679 = vpow2.f32 %v4913_v23  ;;  %v4917_v2 = vmul.f32 1.442695, %v4899_v26  ;;  %v4921_v40 = vmul.f32 1.442695, %v4901_v55  ;;  %v5005_v19 = vmul.f32 1.442695, %v4879_v62 }
 0xa5a   :  { %5681 = vpow2.f32 %v4915_v49  ;;  %v4835_v42 = vpop.f32.mrb[44].mxu0  ;;  %v4919_v4 = vmul.f32 1.442695, %v4900_v37  ;;  %v4923_v12 = vmul.f32 1.442695, %v4902_v56  ;;  %v4903_v43 = vsub.f32 0.0, %v4883_v15 }
 0xa5b   :  { %5683 = vpow2.f32 %v4917_v2  ;;  %v4837_v5 = vpop.f32.mrb[45].mxu0  ;;  %v4904_v61 = vsub.f32 0.0, %v9148_v33  ;;  %v5009_v60 = vmul.f32 1.442695, %v4830_v10  ;;  %v4836_v38 = vadd.f32 %v4835_v42, %v9087_v63 }
 0xa5c   :  { %5685 = vpow2.f32 %v5001_v31  ;;  %v4888_v22 = vpop.f32.mrb[44].mxu1  ;;  %v4839_v11 = vpop.f32.mrb[46].mxu0  ;;  %v4925_v51 = vmul.f32 1.442695, %v4903_v43  ;;  %v5007_v24 = vmul.f32 1.442695, %v4881_v29  ;;  %v9157_v7 = vadd.f32 %v4837_v5, %v9087_v63 }
 0xa5d   :  { %5687 = vpow2.f32 %v4921_v40  ;;  %v4890_v35 = vpop.f32.mrb[45].mxu1  ;;  %v4841_v39 = vpop.f32.mrb[47].mxu0  ;;  %v4927_v46 = vmul.f32 1.442695, %v4904_v61  ;;  %v4905_v13 = vsub.f32 0.0, %v4836_v38  ;;  %v9161_v45 = vadd.f32 %v4888_v22, %v9087_v63  ;;  %v5109_v5 = vld [vmem:[%s9346_s20] sm:$0xff] }
 0xa5e   :  { %5689 = vpow2.f32 %v5003_v44  ;;  %v9151_v53 = vpop.f32.mrb[46].mxu1  ;;  %v5011_v8 = vmul.f32 1.442695, %v4832_v20  ;;  %v4906_v58 = vsub.f32 0.0, %v9157_v7  ;;  %v5013_v30 = vmul.f32 1.442695, %v4883_v15  ;;  %v5076_v15 = vpop.permute.xlu1 %5075 }
 0xa5f   :  { %5691 = vpow2.f32 %v4919_v4  ;;  %v9154_v17 = vpop.f32.mrb[47].mxu1  ;;  %v4929_v21 = vmul.f32 1.442695, %v4905_v13  ;;  %v9164_v59 = vadd.f32 %v4839_v11, %v9089_v0  ;;  %v9167_v52 = vadd.f32 %v4890_v35, %v9087_v63  ;;  %v5110_v61 = vld [vmem:[%s9346_s20 + $0x8] sm:$0xff] }
 0xa60   :  { %5693 = vpow2.f32 %v5005_v19  ;;  %v4931_v9 = vmul.f32 1.442695, %v4906_v58  ;;  %v4907_v29 = vsub.f32 0.0, %v9161_v45  ;;  %v9171_v23 = vadd.f32 %v4841_v39, %v9089_v0 }
 0xa61   :  { %5695 = vpow2.f32 %v4923_v12  ;;  %v5015_v27 = vmul.f32 1.442695, %v9148_v33  ;;  %v4909_v31 = vsub.f32 0.0, %v9164_v59  ;;  %v4908_v55 = vsub.f32 0.0, %v9167_v52 }
 0xa62   :  { %5697 = vpow2.f32 %v5009_v60  ;;  %v4933_v37 = vmul.f32 1.442695, %v4907_v29  ;;  %v5017_v56 = vmul.f32 1.442695, %v4836_v38  ;;  %v4910_v42 = vsub.f32 0.0, %v9171_v23 }
 0xa63   :  { %v5680_v36 = vpop.eup %5679  ;;  %5699 = vpow2.f32 %v4925_v51  ;;  %v4937_v19 = vmul.f32 1.442695, %v4909_v31  ;;  %v9185_v22 = vadd.f32 %v9151_v53, %v9089_v0  ;;  %v4935_v35 = vmul.f32 1.442695, %v4908_v55  ;;  %v5111_v53 = vld [vmem:[%s9346_s20 + $0x10] sm:$0xff] }
 0xa64   :  { %v5682_v48 = vpop.eup %5681  ;;  %v4945_v14 = vadd.f32 1.0, %v5680_v36  ;;  %5701 = vpow2.f32 %v5007_v24  ;;  %v9199_v38 = vadd.f32 %v9154_v17, %v9089_v0  ;;  %v4939_v13 = vmul.f32 1.442695, %v4910_v42 }
 0xa65   :  { %v5684_v6 = vpop.eup %5683  ;;  %v4946_v34 = vadd.f32 1.0, %v5682_v48  ;;  %5703 = vpow2.f32 %v4927_v46  ;;  %v4911_v0 = vsub.f32 0.0, %v9185_v22  ;;  %v5025_v42 = vmul.f32 1.442695, %v9164_v59 }
 0xa66   :  { %v5686_v57 = vpop.eup %5685  ;;  %5705 = vrcp.f32 %v4945_v14  ;;  %v4947_v54 = vadd.f32 1.0, %v5684_v6  ;;  %v5081_v14 = vpop.permute.xlu0 %5080 }
 0xa67   :  { %v5688_v28 = vpop.eup %5687  ;;  %5707 = vrcp.f32 %v4946_v34  ;;  %v4941_v29 = vmul.f32 1.442695, %v4911_v0 }
 0xa68   :  { %v5690_v16 = vpop.eup %5689  ;;  %5709 = vrcp.f32 %v4947_v54  ;;  %v4949_v32 = vadd.f32 1.0, %v5688_v28 }
 0xa69   :  { %v5692_v41 = vpop.eup %5691  ;;  %5711 = vpow2.f32 %v5011_v8  ;;  %v5113_v8 = vld [vmem:[%s9346_s20 + $0x20] sm:$0xff] }
 0xa6a   :  { %v5694_v62 = vpop.eup %5693  ;;  %5713 = vrcp.f32 %v4949_v32  ;;  %v4948_v10 = vadd.f32 1.0, %v5692_v41  ;;  %v5019_v32 = vmul.f32 1.442695, %v9157_v7  ;;  %v4912_v41 = vsub.f32 0.0, %v9199_v38 }
 0xa6b   :  { %v5696_v18 = vpop.eup %5695  ;;  %5715 = vpow2.f32 %v4929_v21  ;;  %v5021_v7 = vmul.f32 1.442695, %v9161_v45 }
 0xa6c   :  { %v5698_v20 = vpop.eup %5697  ;;  %5717 = vrcp.f32 %v4948_v10  ;;  %v4950_v47 = vadd.f32 1.0, %v5696_v18  ;;  %v4943_v45 = vmul.f32 1.442695, %v4912_v41 }
 0xa6d   :  { %v5700_v26 = vpop.eup %5699  ;;  %5719 = vpow2.f32 %v5013_v30 }
 0xa6e   :  { %v5702_v49 = vpop.eup %5701  ;;  %5721 = vrcp.f32 %v4950_v47  ;;  %v4951_v63 = vadd.f32 1.0, %v5700_v26 }
 0xa6f   :  { %v5704_v2 = vpop.eup %5703  ;;  %5723 = vpow2.f32 %v4931_v9  ;;  %v5114_v9 = vld [vmem:[%s9346_s20 + $0x28] sm:$0xff] }
 0xa70   :  { %v5706_v44 = vpop.eup %5705  ;;  %5725 = vrcp.f32 %v4951_v63  ;;  %v4952_v40 = vadd.f32 1.0, %v5704_v2  ;;  %v5115_v63 = vld [vmem:[%s9346_s20 + $0x30] sm:$0xff] }
 0xa71   :  { %v5708_v4 = vpop.eup %5707  ;;  %v5053_v33 = vsel %vm5049_vm3, %v5686_v57, %v5706_v44  ;;  %5727 = vpow2.f32 %v5015_v27 }
 0xa72   :  { %v5710_v11 = vpop.eup %5709  ;;  %v5093_v12 = vmul.f32 %v5076_v15, %v5053_v33  ;;  %v5054_v43 = vsel %vm5049_vm3, %v5690_v16, %v5708_v4  ;;  %5729 = vrcp.f32 %v4952_v40  ;;  %v5112_v16 = vld [vmem:[%s9346_s20 + $0x18] sm:$0xff] }
 0xa73   :  { %v5712_v39 = vpop.eup %5711  ;;  %v5094_v60 = vmul.f32 %v5076_v15, %v5054_v43  ;;  %v5055_v51 = vsel %vm5049_vm3, %v5694_v62, %v5710_v11  ;;  %5731 = vpow2.f32 %v4933_v37 }
 0xa74   :  { %v5714_v24 = vpop.eup %5713  ;;  %v5125_v46 = vadd.f32 %v5109_v5, %v5093_v12  ;;  %v5095_v36 = vmul.f32 %v5076_v15, %v5055_v51  ;;  %5733 = vpow2.f32 %v4937_v19  ;;  %v5023_v19 = vmul.f32 1.442695, %v9167_v52 }
 0xa75   :  { %v5716_v48 = vpop.eup %5715  ;;  %v5126_v6 = vadd.f32 %v5110_v61, %v5094_v60  ;;  %v5057_v34 = vsel %vm5050_vm2, %v5698_v20, %v5714_v24  ;;  %5735 = vpow2.f32 %v5017_v56  ;;  %v5116_v56 = vld [vmem:[%s9346_s20 + $0x38] sm:$0xff]  ;;  %v5027_v61 = vmul.f32 1.442695, %v9171_v23  ;;  %v5117_v60 = vld [vmem:[%s9346_s20 + $0x40] sm:$0xff] }
 0xa76   :  { %v5718_v17 = vpop.eup %5717  ;;  %5141 = vst [vmem:[%s9786_s7] sm:$0xff] %v5125_v46  ;;  %v5127_v57 = vadd.f32 %v5111_v53, %v5095_v36  ;;  %v5097_v54 = vmul.f32 %v5081_v14, %v5057_v34  ;;  %v4953_v28 = vadd.f32 1.0, %v5716_v48  ;;  %5737 = vpow2.f32 %v4935_v35  ;;  %v5086_v35 = vpop.permute.xlu1 %5085 }
 0xa77   :  { %v5720_v21 = vpop.eup %5719  ;;  %5142 = vst [vmem:[%s9786_s7 + $0x8] sm:$0xff] %v5126_v6  ;;  %v5056_v58 = vsel %vm5049_vm3, %v5702_v49, %v5718_v17  ;;  %v5029_v36 = vmul.f32 1.442695, %v9185_v22  ;;  %v5118_v6 = vld [vmem:[%s9346_s20 + $0x48] sm:$0xff]  ;;  %v5031_v34 = vmul.f32 1.442695, %v9199_v38 }
 0xa78   :  { %v5722_v30 = vpop.eup %5721  ;;  %5143 = vst [vmem:[%s9786_s7 + $0x10] sm:$0xff] %v5127_v57  ;;  %v5129_v62 = vadd.f32 %v5113_v8, %v5097_v54  ;;  %v5096_v10 = vmul.f32 %v5076_v15, %v5056_v58  ;;  %5739 = vrcp.f32 %v4953_v28  ;;  %v5119_v38 = vld [vmem:[%s9346_s20 + $0x50] sm:$0xff] }
 0xa79   :  { %v5724_v18 = vpop.eup %5723  ;;  %v5058_v1 = vsel %vm5050_vm2, %v5712_v39, %v5722_v30  ;;  %5741 = vpow2.f32 %v4939_v13  ;;  %v5091_v30 = vpop.permute.xlu0 %5090 }
 0xa7a   :  { %v5726_v20 = vpop.eup %5725  ;;  %5145 = vst [vmem:[%s9786_s7 + $0x20] sm:$0xff] %v5129_v62  ;;  %v5128_v47 = vadd.f32 %v5112_v16, %v5096_v10  ;;  %v5098_v26 = vmul.f32 %v5081_v14, %v5058_v1  ;;  %v4954_v27 = vadd.f32 1.0, %v5724_v18  ;;  %5743 = vpow2.f32 %v5019_v32  ;;  %v5121_v10 = vld [vmem:[%s9346_s20 + $0x60] sm:$0x7] }
 0xa7b   :  { %v5728_v31 = vpop.eup %5727  ;;  %v5059_v49 = vsel %vm5050_vm2, %v5720_v21, %v5726_v20 }
 0xa7c   :  { %v5730_v55 = vpop.eup %5729  ;;  %5144 = vst [vmem:[%s9786_s7 + $0x18] sm:$0xff] %v5128_v47  ;;  %v5130_v2 = vadd.f32 %v5114_v9, %v5098_v26  ;;  %v5099_v37 = vmul.f32 %v5081_v14, %v5059_v49  ;;  %5745 = vrcp.f32 %v4954_v27  ;;  %v5122_v49 = vld [vmem:[%s9346_s20 + $0x68] sm:$0x7] }
 0xa7d   :  { %v5732_v44 = vpop.eup %5731  ;;  %v5060_v40 = vsel %vm5050_vm2, %v5728_v31, %v5730_v55  ;;  %5747 = vpow2.f32 %v4941_v29  ;;  %v5120_v29 = vld [vmem:[%s9346_s20 + $0x58] sm:$0xff] }
 0xa7e   :  { %5146 = vst [vmem:[%s9786_s7 + $0x28] sm:$0xff] %v5130_v2  ;;  %v5131_v4 = vadd.f32 %v5115_v63, %v5099_v37  ;;  %v5100_v15 = vmul.f32 %v5081_v14, %v5060_v40  ;;  %v4955_v33 = vadd.f32 1.0, %v5732_v44  ;;  %5749 = vpow2.f32 %v5021_v7  ;;  %v5734_v5 = vpop.eup %5733  ;;  %v5123_v40 = vld [vmem:[%s9346_s20 + $0x70] sm:$0x7] }
 0xa7f   :  { %5751 = vpow2.f32 %v4943_v45  ;;  %v5736_v25 = vpop.eup %5735  ;;  %v4957_v59 = vadd.f32 1.0, %v5734_v5 }
 0xa80   :  { %5147 = vst [vmem:[%s9786_s7 + $0x30] sm:$0xff] %v5131_v4  ;;  %v5132_v11 = vadd.f32 %v5116_v56, %v5100_v15  ;;  %5753 = vrcp.f32 %v4955_v33  ;;  %v5738_v12 = vpop.eup %5737  ;;  %v5124_v15 = vld [vmem:[%s9346_s20 + $0x78] sm:$0x7] }
 0xa81   :  { %5755 = vpow2.f32 %v5025_v42  ;;  %v4956_v52 = vadd.f32 1.0, %v5738_v12 }
 0xa82   :  { %v5740_v43 = vpop.eup %5739  ;;  %5148 = vst [vmem:[%s9786_s7 + $0x38] sm:$0xff] %v5132_v11  ;;  %5757 = vrcp.f32 %v4957_v59 }
 0xa83   :  { %v5061_v39 = vsel %vm5051_vm9, %v5736_v25, %v5740_v43  ;;  %5759 = vpow2.f32 %v5023_v19  ;;  %v5742_v51 = vpop.eup %5741 }
 0xa84   :  { %v5101_v53 = vmul.f32 %v5086_v35, %v5061_v39  ;;  %5761 = vrcp.f32 %v4956_v52  ;;  %v5744_v24 = vpop.eup %5743  ;;  %v4958_v46 = vadd.f32 1.0, %v5742_v51 }
 0xa85   :  { %5763 = vpow2.f32 %v5027_v61 }
 0xa86   :  { %v5746_v13 = vpop.eup %5745  ;;  %v5133_v48 = vadd.f32 %v5117_v60, %v5101_v53  ;;  %5765 = vrcp.f32 %v4958_v46 }
 0xa87   :  { %v5748_v23 = vpop.eup %5747  ;;  %v5062_v14 = vsel %vm5051_vm9, %v5744_v24, %v5746_v13  ;;  %5767 = vpow2.f32 %v5029_v36 }
 0xa88   :  { %v5750_v8 = vpop.eup %5749  ;;  %5149 = vst [vmem:[%s9786_s7 + $0x40] sm:$0xff] %v5133_v48  ;;  %v5102_v22 = vmul.f32 %v5086_v35, %v5062_v14  ;;  %v4959_v0 = vadd.f32 1.0, %v5748_v23 }
 0xa89   :  { %v5752_v17 = vpop.eup %5751 }
 0xa8a   :  { %v5754_v57 = vpop.eup %5753  ;;  %v5134_v54 = vadd.f32 %v5118_v6, %v5102_v22  ;;  %5769 = vrcp.f32 %v4959_v0  ;;  %v4960_v28 = vadd.f32 1.0, %v5752_v17 }
 0xa8b   :  { %v5756_v21 = vpop.eup %5755  ;;  %v5063_v58 = vsel %vm5051_vm9, %v5750_v8, %v5754_v57  ;;  %5771 = vpow2.f32 %v5031_v34 }
 0xa8c   :  { %v5758_v16 = vpop.eup %5757  ;;  %5150 = vst [vmem:[%s9786_s7 + $0x48] sm:$0xff] %v5134_v54  ;;  %v5103_v32 = vmul.f32 %v5086_v35, %v5063_v58  ;;  %5773 = vrcp.f32 %v4960_v28 }
 0xa8d   :  { %v5760_v41 = vpop.eup %5759  ;;  %v5065_v62 = vsel %vm5052_vm0, %v5756_v21, %v5758_v16 }
 0xa8e   :  { %v5762_v18 = vpop.eup %5761  ;;  %v5135_v1 = vadd.f32 %v5119_v38, %v5103_v32  ;;  %v5105_v9 = vmul.f32 %v5091_v30, %v5065_v62 }
 0xa8f   :  { %v5064_v7 = vsel %vm5051_vm9, %v5760_v41, %v5762_v18  ;;  %v5764_v20 = vpop.eup %5763 }
 0xa90   :  { %5151 = vst [vmem:[%s9786_s7 + $0x50] sm:$0xff] %v5135_v1  ;;  %v5137_v47 = vadd.f32 %v5121_v10, %v5105_v9  ;;  %v5104_v26 = vmul.f32 %v5086_v35, %v5064_v7  ;;  %v5766_v27 = vpop.eup %5765 }
 0xa91   :  { %v5066_v50 = vsel %vm5052_vm0, %v5764_v20, %v5766_v27  ;;  %v5768_v63 = vpop.eup %5767 }
 0xa92   :  { %5153 = vst [vmem:[%s9786_s7 + $0x60] sm:$0x7] %v5137_v47  ;;  %v5136_v31 = vadd.f32 %v5120_v29, %v5104_v26  ;;  %v5106_v45 = vmul.f32 %v5091_v30, %v5066_v50 }
 0xa94   :  { %v5770_v55 = vpop.eup %5769  ;;  %5152 = vst [vmem:[%s9786_s7 + $0x58] sm:$0xff] %v5136_v31  ;;  %v5138_v37 = vadd.f32 %v5122_v49, %v5106_v45 }
 0xa95   :  { %v5772_v2 = vpop.eup %5771  ;;  %v5067_v44 = vsel %vm5052_vm0, %v5768_v63, %v5770_v55 }
 0xa96   :  { %v5774_v56 = vpop.eup %5773  ;;  %v5107_v42 = vmul.f32 %v5091_v30, %v5067_v44  ;;  %5154 = vst [vmem:[%s9786_s7 + $0x68] sm:$0x7] %v5138_v37 }
 0xa97   :  { %v5068_v4 = vsel %vm5052_vm0, %v5772_v2, %v5774_v56 }
 0xa98   :  { %v5139_v33 = vadd.f32 %v5123_v40, %v5107_v42  ;;  %v5108_v5 = vmul.f32 %v5091_v30, %v5068_v4 }
 0xa9a   :  { %5155 = vst [vmem:[%s9786_s7 + $0x70] sm:$0x7] %v5139_v33  ;;  %v5140_v19 = vadd.f32 %v5124_v15, %v5108_v5 }
 0xa9c   :  { %5156 = vst [vmem:[%s9786_s7 + $0x78] sm:$0x7] %v5140_v19 }
 0xa9d   :  { %5165 = vsyncpa [#allocation4], 1 }
 0xa9e   :  { %5166 = vsyncpa [#allocation6], 1 }
 0xa9f   :  { %5167 = vsyncpa [#allocation9], 1 }
 0xaa0   :  { %5168 = vsyncpa [#allocation12], 1 }
 0xaa1   :  { %5169 = vsyncpa [#allocation15], 1 }
 0xaa2   :  { %5170 = vsyncpa [#allocation18], 1 }

</bundles_post_ra>
